<compile_context>
chip_gen: v7x
topology: tpu7x:2x2x1
jax: 0.10.0
libtpu: 0.0.40
codegen_flags: <defaults>
</compile_context>

<pallas_src>
import functools

import jax
import jax.numpy as jnp
import numpy as np
from jax.experimental import pallas as pl
from jax.experimental.pallas import tpu as pltpu

LANE = 128


def _round_up(x, m):
    return ((x + m - 1) // m) * m


# ----------------------------- Pallas kernel ---------------------------------

def _gru_gates(gi, gh, h, hidden):
    """PyTorch GRU gate math (gate order r, z, n); gi = x@W_ih+b_ih, gh = h@W_hh+b_hh."""
    # r and z share one fused sigmoid over the contiguous, lane-aligned [:, :2H] slice.
    rz = jax.nn.sigmoid(gi[:, :2 * hidden] + gh[:, :2 * hidden])
    r = rz[:, :hidden]
    z = rz[:, hidden:]
    n = jnp.tanh(gi[:, 2 * hidden:] + r * gh[:, 2 * hidden:])
    return (1.0 - z) * n + z * h


def _encoder_kernel(hidden_p, t_chunk, seq_pad,
                    lens_ref, gif_ref, gib_ref,
                    whf_ref, whb_ref, bhf_ref, bhb_ref,
                    memf_ref, memb_ref, finf_ref, finb_ref,
                    hf_scr, hb_scr):
    # grid = (batch_tiles [parallel], time_chunks [arbitrary / sequential])
    c = pl.program_id(1)
    num_c = pl.num_programs(1)

    @pl.when(c == 0)
    def _():
        hf_scr[...] = jnp.zeros_like(hf_scr)
        hb_scr[...] = jnp.zeros_like(hb_scr)

    lens = lens_ref[...]                                   # [Bt, 1] int32
    b_hh_f = bhf_ref[...].astype(jnp.float32)              # [1, 3Hp]
    b_hh_b = bhb_ref[...].astype(jnp.float32)
    mxu_dt = whf_ref.dtype

    h_f = hf_scr[...]                                      # [Bt, Hp] f32 carries
    h_b = hb_scr[...]

    # Statically unrolled time loop: all ref indices (incl. the batch-major
    # memory-bank stores) are static; masks use the traced global time.
    # TODO(synk): at production sizes sweep partial unroll / fori_loop for vreg pressure.
    for i in range(t_chunk):
        t = c * t_chunk + i                                # global forward time
        p = seq_pad - 1 - t                                # global backward time
        j = t_chunk - 1 - i                                # local index in backward block

        gi_f = gif_ref[i].astype(jnp.float32)              # [Bt, 3Hp]
        gi_b = gib_ref[j].astype(jnp.float32)

        # Recurrent matmuls for both directions issued back-to-back (bf16 operands,
        # f32 accumulation). Weights read from VMEM inside the loop -> low vreg pressure.
        gh_f = jnp.dot(h_f.astype(mxu_dt), whf_ref[...],
                       preferred_element_type=jnp.float32) + b_hh_f
        gh_b = jnp.dot(h_b.astype(mxu_dt), whb_ref[...],
                       preferred_element_type=jnp.float32) + b_hh_b

        h_f_new = _gru_gates(gi_f, gh_f, h_f, hidden_p)
        h_b_new = _gru_gates(gi_b, gh_b, h_b, hidden_p)

        mask_f = lens > t                                  # [Bt, 1]
        mask_b = lens > p
        h_f = jnp.where(mask_f, h_f_new, h_f)              # freeze past length
        h_b = jnp.where(mask_b, h_b_new, h_b)

        # Batch-major memory-bank stores (lane-dense, static indices).
        memf_ref[:, i, :] = jnp.where(mask_f, h_f, 0.0).astype(memf_ref.dtype)
        memb_ref[:, j, :] = jnp.where(mask_b, h_b, 0.0).astype(memb_ref.dtype)

    hf_scr[...] = h_f
    hb_scr[...] = h_b

    @pl.when(c == num_c - 1)
    def _():
        finf_ref[...] = h_f
        finb_ref[...] = h_b


# ----------------------------- wrapper ---------------------------------------

def encoder_forward(src, src_lens, params, *, t_chunk=16,
                    stream_dtype=jnp.bfloat16, mxu_dtype=jnp.bfloat16,
                    batch_block=None):
    """src: [batch, seq] int32; src_lens: list of lengths (sorted desc, as in PyTorch)."""
    emb_table = params["embedding"]
    batch, seq = src.shape
    hidden = params["w_hh_f"].shape[0]
    emb_dim = emb_table.shape[1]

    stream_dtype = jnp.dtype(stream_dtype)
    mxu_dtype = jnp.dtype(mxu_dtype)
    s_mult = 16 if stream_dtype.itemsize < 4 else 8        # native sublane tile

    # ---- padded / aligned geometry ------------------------------------------------
    hp = _round_up(hidden, LANE)                           # lane-aligned hidden
    b_tile = _round_up(batch_block or _round_up(batch, s_mult), s_mult)
    b_pad = _round_up(batch, b_tile)
    num_b = b_pad // b_tile
    t_chunk = _round_up(max(1, min(t_chunk, seq)), s_mult)
    seq_pad = _round_up(seq, t_chunk)
    num_chunks = seq_pad // t_chunk

    # ---- per-gate zero padding of the GRU parameters (hidden -> hp) ----------------
    def pad_gates(w):                                      # [..., 3H] -> [..., 3Hp]
        parts = []
        for g in range(3):
            blk = w[..., g * hidden:(g + 1) * hidden]
            pad_width = [(0, 0)] * (blk.ndim - 1) + [(0, hp - hidden)]
            parts.append(jnp.pad(blk, pad_width))
        return jnp.concatenate(parts, axis=-1)

    def prep_whh(w):                                       # [H, 3H] -> [Hp, 3Hp]
        w = pad_gates(w)
        return jnp.pad(w, ((0, hp - hidden), (0, 0))).astype(mxu_dtype)

    w_hh_f = prep_whh(params["w_hh_f"])
    w_hh_b = prep_whh(params["w_hh_b"])
    b_hh_f = pad_gates(params["b_hh_f"]).astype(jnp.float32)   # [1, 3Hp]
    b_hh_b = pad_gates(params["b_hh_b"]).astype(jnp.float32)
    w_ih_f = pad_gates(params["w_ih_f"])                       # [E, 3Hp]
    w_ih_b = pad_gates(params["w_ih_b"])
    b_ih_f = pad_gates(params["b_ih_f"])
    b_ih_b = pad_gates(params["b_ih_b"])

    lens = jnp.zeros((b_pad, 1), jnp.int32).at[:batch, 0].set(
        jnp.asarray(src_lens, jnp.int32))

    # ---- embedding gather (time-major) + hoisted input projection ------------------
    emb_tm = jnp.take(emb_table, src.T, axis=0).astype(jnp.float32)   # [S, B, E]
    emb_tm = jnp.pad(emb_tm, ((0, seq_pad - seq), (0, b_pad - batch), (0, 0)))

    # ONE large MXU matmul for all timesteps and BOTH directions; stored in bf16.
    # TODO(synk): if profiling shows the gi stream HBM-bound even in bf16, fold this
    # projection into the kernel per-chunk via pltpu.emit_pipeline.
    w_ih = jnp.concatenate([w_ih_f, w_ih_b], axis=1).astype(mxu_dtype)    # [E, 6Hp]
    b_ih = jnp.concatenate([b_ih_f, b_ih_b], axis=1)                      # [1, 6Hp] f32
    gi = jnp.einsum("sbe,eg->sbg", emb_tm.astype(mxu_dtype), w_ih,
                    preferred_element_type=jnp.float32) + b_ih
    gi = gi.astype(stream_dtype)                                          # [S_pad, B_pad, 6Hp]

    # ---- pallas_call ----------------------------------------------------------------
    kernel = functools.partial(_encoder_kernel, hp, t_chunk, seq_pad)

    stream_bytes = stream_dtype.itemsize
    mxu_bytes = mxu_dtype.itemsize
    blk_bytes = (
        2 * 2 * t_chunk * b_tile * 3 * hp * stream_bytes       # gi fwd/bwd blocks (x2 buf)
        + 2 * 2 * b_tile * t_chunk * hp * stream_bytes         # memory-bank blocks
        + 2 * 2 * hp * 3 * hp * mxu_bytes                      # W_hh fwd/bwd
        + 2 * 2 * 3 * hp * 4 + 2 * b_tile * 4                  # biases + lens
        + 2 * 2 * b_tile * hp * 4                              # final-state blocks
        + 2 * b_tile * hp * 4)                                 # h carry scratch
    vmem_limit = int(min(max(2 * blk_bytes, 32 << 20), 60 << 20))

    cost = pl.CostEstimate(
        flops=int(2 * 2 * seq_pad * b_pad * hp * 3 * hp),            # recurrent matmuls
        transcendentals=int(2 * 3 * seq_pad * b_pad * hp),           # sigmoids + tanh
        bytes_accessed=int(
            stream_bytes * (seq_pad * b_pad * 6 * hp                 # gi stream
                            + 2 * seq_pad * b_pad * hp)              # memory banks
            + mxu_bytes * 2 * hp * 3 * hp * num_chunks * num_b       # W_hh re-fetches
            + 4 * 2 * b_pad * hp))                                   # final states

    # TODO(synk): for very large H, single-buffer the grid-invariant weights
    # (pipeline_mode=pl.Buffered(1)) and/or stage W_hh in the MXU weight registers
    # once per chunk via pltpu.matmul_push_rhs / matmul_acc_lhs / matmul_pop.
    grid_spec = pltpu.PrefetchScalarGridSpec(
        num_scalar_prefetch=0,
        grid=(num_b, num_chunks),
        in_specs=[
            pl.BlockSpec((b_tile, 1), lambda b, c: (b, 0)),                       # lens
            pl.BlockSpec((t_chunk, b_tile, 3 * hp), lambda b, c: (c, b, 0)),      # gi fwd
            pl.BlockSpec((t_chunk, b_tile, 3 * hp),
                         lambda b, c: (num_chunks - 1 - c, b, 1)),                # gi bwd
            pl.BlockSpec((hp, 3 * hp), lambda b, c: (0, 0)),                      # W_hh fwd
            pl.BlockSpec((hp, 3 * hp), lambda b, c: (0, 0)),                      # W_hh bwd
            pl.BlockSpec((1, 3 * hp), lambda b, c: (0, 0)),                       # b_hh fwd
            pl.BlockSpec((1, 3 * hp), lambda b, c: (0, 0)),                       # b_hh bwd
        ],
        out_specs=[
            pl.BlockSpec((b_tile, t_chunk, hp), lambda b, c: (b, c, 0)),          # mem fwd
            pl.BlockSpec((b_tile, t_chunk, hp),
                         lambda b, c: (b, num_chunks - 1 - c, 0)),                # mem bwd
            pl.BlockSpec((b_tile, hp), lambda b, c: (b, 0)),                      # final fwd
            pl.BlockSpec((b_tile, hp), lambda b, c: (b, 0)),                      # final bwd
        ],
        scratch_shapes=[
            pltpu.VMEM((b_tile, hp), jnp.float32),     # forward hidden carry
            pltpu.VMEM((b_tile, hp), jnp.float32),     # backward hidden carry
        ],
    )

    mem_f, mem_b, fin_f, fin_b = pl.pallas_call(
        kernel,
        grid_spec=grid_spec,
        out_shape=(
            jax.ShapeDtypeStruct((b_pad, seq_pad, hp), stream_dtype),
            jax.ShapeDtypeStruct((b_pad, seq_pad, hp), stream_dtype),
            jax.ShapeDtypeStruct((b_pad, hp), jnp.float32),
            jax.ShapeDtypeStruct((b_pad, hp), jnp.float32),
        ),
        compiler_params=pltpu.CompilerParams(
            dimension_semantics=("parallel", "arbitrary"),   # batch tiles || , time sequential
            vmem_limit_bytes=vmem_limit),
        cost_estimate=cost,
    )(lens, gi, gi, w_hh_f, w_hh_b, b_hh_f, b_hh_b)

    # pad_packed_sequence pads only up to max(src_lens); strip batch/hidden padding.
    max_len = int(max(src_lens))
    memory_bank = jnp.concatenate(
        [mem_f[:batch, :max_len, :hidden], mem_b[:batch, :max_len, :hidden]],
        axis=-1)                                            # [batch, max_len, 2H] (stream dtype)
    # torch.cat((h[-1], h[-2]), 1) == cat(backward, forward)
    encoder_last_layer_final_state = jnp.concatenate(
        [fin_b[:batch, :hidden], fin_f[:batch, :hidden]], axis=-1)
    return memory_bank, encoder_last_layer_final_state


# ----------------------------- params & reference ----------------------------

def init_params(key, vocab_size, emb_dim, hidden_dim):
    keys = jax.random.split(key, 9)
    bound = 1.0 / float(np.sqrt(hidden_dim))

    def u(k, shape):
        return jax.random.uniform(k, shape, jnp.float32, -bound, bound)

    return {
        "embedding": jax.random.normal(keys[0], (vocab_size, emb_dim), jnp.float32),
        # stored transposed w.r.t. PyTorch: [in, 3H], gate order (r, z, n)
        "w_ih_f": u(keys[1], (emb_dim, 3 * hidden_dim)),
        "w_hh_f": u(keys[2], (hidden_dim, 3 * hidden_dim)),
        "b_ih_f": u(keys[3], (1, 3 * hidden_dim)),
        "b_hh_f": u(keys[4], (1, 3 * hidden_dim)),
        "w_ih_b": u(keys[5], (emb_dim, 3 * hidden_dim)),
        "w_hh_b": u(keys[6], (hidden_dim, 3 * hidden_dim)),
        "b_ih_b": u(keys[7], (1, 3 * hidden_dim)),
        "b_hh_b": u(keys[8], (1, 3 * hidden_dim)),
    }


def reference_forward(src, src_lens, params):
    """Pure-JAX reference matching PyTorch packed bidirectional GRU semantics."""
    emb = jnp.take(params["embedding"], src, axis=0).astype(jnp.float32)
    batch, seq, _ = emb.shape
    hidden = params["w_hh_f"].shape[0]
    lens = jnp.asarray(src_lens, jnp.int32)

    def cell(x_t, h, w_ih, w_hh, b_ih, b_hh):
        gi = x_t @ w_ih + b_ih
        gh = h @ w_hh + b_hh
        r = jax.nn.sigmoid(gi[:, :hidden] + gh[:, :hidden])
        z = jax.nn.sigmoid(gi[:, hidden:2 * hidden] + gh[:, hidden:2 * hidden])
        n = jnp.tanh(gi[:, 2 * hidden:] + r * gh[:, 2 * hidden:])
        return (1.0 - z) * n + z * h

    def run(tag, times):
        w_ih, w_hh = params[f"w_ih_{tag}"], params[f"w_hh_{tag}"]
        b_ih, b_hh = params[f"b_ih_{tag}"], params[f"b_hh_{tag}"]
        h = jnp.zeros((batch, hidden), jnp.float32)
        outs = [None] * seq
        for t in times:
            mask = (lens > t)[:, None]
            h = jnp.where(mask, cell(emb[:, t, :], h, w_ih, w_hh, b_ih, b_hh), h)
            outs[t] = jnp.where(mask, h, 0.0)
        return jnp.stack(outs, axis=1), h

    out_f, h_f = run("f", range(seq))
    out_b, h_b = run("b", range(seq - 1, -1, -1))
    mem = jnp.concatenate([out_f, out_b], axis=-1)[:, :int(max(src_lens)), :]
    return mem, jnp.concatenate([h_b, h_f], axis=-1)


# ----------------------------- main -------------------------------------------

if __name__ == "__main__":
    vocab_size, emb_dim, hidden_dim = 50, 16, 32
    batch, seq = 2, 12

    key = jax.random.PRNGKey(0)
    pkey, skey = jax.random.split(key)
    params = init_params(pkey, vocab_size, emb_dim, hidden_dim)
    src = jax.random.randint(skey, (batch, seq), 0, vocab_size, dtype=jnp.int32)
    src_lens = [11, 7]   # sorted descending, as pack_padded_sequence requires

    # TODO(synk): nn.GRU dropout is a no-op for a single-layer GRU; not modeled.
    mem_ref, fin_ref = reference_forward(src, src_lens, params)

    # 1) Full-precision path (multi-chunk grid) -- tight numerical check.
    mem32, fin32 = encoder_forward(src, src_lens, params, t_chunk=8,
                                   stream_dtype=jnp.float32, mxu_dtype=jnp.float32)
    jax.block_until_ready((mem32, fin32))
    np.testing.assert_allclose(np.asarray(mem32).astype(np.float32),
                               np.asarray(mem_ref), rtol=1e-5, atol=1e-5)
    np.testing.assert_allclose(np.asarray(fin32).astype(np.float32),
                               np.asarray(fin_ref), rtol=1e-5, atol=1e-5)

    # 2) Performance configuration (bf16 MXU operands + bf16 gi / memory-bank streams).
    mem16, fin16 = encoder_forward(src, src_lens, params)
    jax.block_until_ready((mem16, fin16))
    np.testing.assert_allclose(np.asarray(mem16).astype(np.float32),
                               np.asarray(mem_ref), rtol=5e-2, atol=5e-2)
    np.testing.assert_allclose(np.asarray(fin16).astype(np.float32),
                               np.asarray(fin_ref), rtol=5e-2, atol=5e-2)

    print("KERNEL_OK")
</pallas_src>

<mosaic_0001>
module attributes {stable_mosaic.version = 11 : i64} {
  func.func @_encoder_kernel(%arg0: i32, %arg1: i32, %arg2: memref<8x1xi32, #tpu.memory_space<vmem>>, %arg3: memref<8x8x384xf32, #tpu.memory_space<vmem>>, %arg4: memref<8x8x384xf32, #tpu.memory_space<vmem>>, %arg5: memref<128x384xf32, #tpu.memory_space<vmem>>, %arg6: memref<128x384xf32, #tpu.memory_space<vmem>>, %arg7: memref<1x384xf32, #tpu.memory_space<vmem>>, %arg8: memref<1x384xf32, #tpu.memory_space<vmem>>, %arg9: memref<8x8x128xf32, #tpu.memory_space<vmem>>, %arg10: memref<8x8x128xf32, #tpu.memory_space<vmem>>, %arg11: memref<8x128xf32, #tpu.memory_space<vmem>>, %arg12: memref<8x128xf32, #tpu.memory_space<vmem>>, %arg13: memref<8x128xf32, #tpu.memory_space<vmem>>, %arg14: memref<8x128xf32, #tpu.memory_space<vmem>>) attributes {dimension_semantics = [#tpu.dimension_semantics<parallel>, #tpu.dimension_semantics<arbitrary>], iteration_bounds = array<i64: 1, 2>, scalar_prefetch = 0 : i64, scratch_operands = 2 : i64, tpu.core_type = #tpu.core_type<tc>, window_params = [{transform_indices = @transform_0, window_bounds = array<i64: 8, 1>}, {transform_indices = @transform_1, window_bounds = array<i64: 8, 8, 384>}, {transform_indices = @transform_2, window_bounds = array<i64: 8, 8, 384>}, {pipeline_mode = #tpu.pipeline_mode<synchronous>, transform_indices = @transform_3, window_bounds = array<i64: 128, 384>}, {pipeline_mode = #tpu.pipeline_mode<synchronous>, transform_indices = @transform_4, window_bounds = array<i64: 128, 384>}, {pipeline_mode = #tpu.pipeline_mode<synchronous>, transform_indices = @transform_5, window_bounds = array<i64: 1, 384>}, {pipeline_mode = #tpu.pipeline_mode<synchronous>, transform_indices = @transform_6, window_bounds = array<i64: 1, 384>}, {transform_indices = @transform_7, window_bounds = array<i64: 8, 8, 128>}, {transform_indices = @transform_8, window_bounds = array<i64: 8, 8, 128>}, {transform_indices = @transform_9, window_bounds = array<i64: 8, 128>}, {transform_indices = @transform_10, window_bounds = array<i64: 8, 128>}]} {
    %c0_i32 = arith.constant 0 : i32
    %0 = arith.cmpi eq, %arg1, %c0_i32 : i32
    %1 = arith.extui %0 : i1 to i32
    %c0_i32_0 = arith.constant 0 : i32
    %2 = arith.cmpi ne, %1, %c0_i32_0 : i32
    scf.if %2 {
      %cst_215 = arith.constant 0.000000e+00 : f32
      %645 = vector.broadcast %cst_215 : f32 to vector<8x128xf32>
      %c0_216 = arith.constant 0 : index
      %c0_217 = arith.constant 0 : index
      %646 = vector.load %arg13[%c0_216, %c0_217] : memref<8x128xf32, #tpu.memory_space<vmem>>, vector<8x128xf32>
      tpu.vector_store %arg13[%c0_216, %c0_217], %645 {strides = array<i32>} : memref<8x128xf32, #tpu.memory_space<vmem>>, vector<8x128xf32>,
      %cst_218 = arith.constant 0.000000e+00 : f32
      %647 = vector.broadcast %cst_218 : f32 to vector<8x128xf32>
      %c0_219 = arith.constant 0 : index
      %c0_220 = arith.constant 0 : index
      %648 = vector.load %arg14[%c0_219, %c0_220] : memref<8x128xf32, #tpu.memory_space<vmem>>, vector<8x128xf32>
      tpu.vector_store %arg14[%c0_219, %c0_220], %647 {strides = array<i32>} : memref<8x128xf32, #tpu.memory_space<vmem>>, vector<8x128xf32>,
    } else {
    }
    %c0 = arith.constant 0 : index
    %c0_1 = arith.constant 0 : index
    %3 = vector.load %arg2[%c0, %c0_1] : memref<8x1xi32, #tpu.memory_space<vmem>>, vector<8x1xi32>
    %c0_2 = arith.constant 0 : index
    %c0_3 = arith.constant 0 : index
    %4 = vector.load %arg7[%c0_2, %c0_3] : memref<1x384xf32, #tpu.memory_space<vmem>>, vector<1x384xf32>
    %c0_4 = arith.constant 0 : index
    %c0_5 = arith.constant 0 : index
    %5 = vector.load %arg8[%c0_4, %c0_5] : memref<1x384xf32, #tpu.memory_space<vmem>>, vector<1x384xf32>
    %c0_6 = arith.constant 0 : index
    %c0_7 = arith.constant 0 : index
    %6 = vector.load %arg13[%c0_6, %c0_7] : memref<8x128xf32, #tpu.memory_space<vmem>>, vector<8x128xf32>
    %c0_8 = arith.constant 0 : index
    %c0_9 = arith.constant 0 : index
    %7 = vector.load %arg14[%c0_8, %c0_9] : memref<8x128xf32, #tpu.memory_space<vmem>>, vector<8x128xf32>
    %c8_i32 = arith.constant 8 : i32
    %8 = arith.muli %arg1, %c8_i32 : i32
    %c0_i32_10 = arith.constant 0 : i32
    %9 = arith.addi %8, %c0_i32_10 : i32
    %c15_i32 = arith.constant 15 : i32
    %10 = arith.subi %c15_i32, %9 : i32
    %c0_11 = arith.constant 0 : index
    %c0_12 = arith.constant 0 : index
    %c0_13 = arith.constant 0 : index
    %11 = vector.load %arg3[%c0_11, %c0_12, %c0_13] : memref<8x8x384xf32, #tpu.memory_space<vmem>>, vector<1x8x384xf32>
    %12 = vector.shape_cast %11 : vector<1x8x384xf32> to vector<8x384xf32>
    %c7 = arith.constant 7 : index
    %c0_14 = arith.constant 0 : index
    %c0_15 = arith.constant 0 : index
    %13 = vector.load %arg4[%c7, %c0_14, %c0_15] : memref<8x8x384xf32, #tpu.memory_space<vmem>>, vector<1x8x384xf32>
    %14 = vector.shape_cast %13 : vector<1x8x384xf32> to vector<8x384xf32>
    %c0_16 = arith.constant 0 : index
    %c0_17 = arith.constant 0 : index
    %15 = vector.load %arg5[%c0_16, %c0_17] : memref<128x384xf32, #tpu.memory_space<vmem>>, vector<128x384xf32>
    %cst = arith.constant dense<0.000000e+00> : vector<8x384xf32>
    %16 = tpu.matmul %6, %15, %cst {dimension_numbers = #tpu.dot_dimension_numbers<[1], [0], [0], [1], [0, 0, 1, 1], [], []>} : vector<8x128xf32>, vector<128x384xf32>, vector<8x384xf32> -> vector<8x384xf32>
    %17 = vector.broadcast %4 : vector<1x384xf32> to vector<8x384xf32>
    %18 = arith.addf %16, %17 : vector<8x384xf32>
    %c0_18 = arith.constant 0 : index
    %c0_19 = arith.constant 0 : index
    %19 = vector.load %arg6[%c0_18, %c0_19] : memref<128x384xf32, #tpu.memory_space<vmem>>, vector<128x384xf32>
    %cst_20 = arith.constant dense<0.000000e+00> : vector<8x384xf32>
    %20 = tpu.matmul %7, %19, %cst_20 {dimension_numbers = #tpu.dot_dimension_numbers<[1], [0], [0], [1], [0, 0, 1, 1], [], []>} : vector<8x128xf32>, vector<128x384xf32>, vector<8x384xf32> -> vector<8x384xf32>
    %21 = vector.broadcast %5 : vector<1x384xf32> to vector<8x384xf32>
    %22 = arith.addf %20, %21 : vector<8x384xf32>
    %23 = vector.extract_strided_slice %12 {offsets = [0, 0], sizes = [8, 256], strides = [1, 1]} : vector<8x384xf32> to vector<8x256xf32>
    %24 = vector.extract_strided_slice %18 {offsets = [0, 0], sizes = [8, 256], strides = [1, 1]} : vector<8x384xf32> to vector<8x256xf32>
    %25 = arith.addf %23, %24 : vector<8x256xf32>
    %26 = arith.negf %25 : vector<8x256xf32>
    %27 = math.exp %26 : vector<8x256xf32>
    %cst_21 = arith.constant 1.000000e+00 : f32
    %28 = vector.broadcast %cst_21 : f32 to vector<8x256xf32>
    %29 = arith.addf %28, %27 : vector<8x256xf32>
    %30 = arith.divf %28, %29 : vector<8x256xf32>
    %31 = vector.extract_strided_slice %30 {offsets = [0, 0], sizes = [8, 128], strides = [1, 1]} : vector<8x256xf32> to vector<8x128xf32>
    %32 = vector.extract_strided_slice %30 {offsets = [0, 128], sizes = [8, 128], strides = [1, 1]} : vector<8x256xf32> to vector<8x128xf32>
    %33 = vector.extract_strided_slice %12 {offsets = [0, 256], sizes = [8, 128], strides = [1, 1]} : vector<8x384xf32> to vector<8x128xf32>
    %34 = vector.extract_strided_slice %18 {offsets = [0, 256], sizes = [8, 128], strides = [1, 1]} : vector<8x384xf32> to vector<8x128xf32>
    %35 = arith.mulf %31, %34 : vector<8x128xf32>
    %36 = arith.addf %33, %35 : vector<8x128xf32>
    %37 = math.tanh %36 : vector<8x128xf32>
    %cst_22 = arith.constant 1.000000e+00 : f32
    %38 = vector.broadcast %cst_22 : f32 to vector<8x128xf32>
    %39 = arith.subf %38, %32 : vector<8x128xf32>
    %40 = arith.mulf %39, %37 : vector<8x128xf32>
    %41 = arith.mulf %32, %6 : vector<8x128xf32>
    %42 = arith.addf %40, %41 : vector<8x128xf32>
    %43 = vector.extract_strided_slice %14 {offsets = [0, 0], sizes = [8, 256], strides = [1, 1]} : vector<8x384xf32> to vector<8x256xf32>
    %44 = vector.extract_strided_slice %22 {offsets = [0, 0], sizes = [8, 256], strides = [1, 1]} : vector<8x384xf32> to vector<8x256xf32>
    %45 = arith.addf %43, %44 : vector<8x256xf32>
    %46 = arith.negf %45 : vector<8x256xf32>
    %47 = math.exp %46 : vector<8x256xf32>
    %cst_23 = arith.constant 1.000000e+00 : f32
    %48 = vector.broadcast %cst_23 : f32 to vector<8x256xf32>
    %49 = arith.addf %48, %47 : vector<8x256xf32>
    %50 = arith.divf %48, %49 : vector<8x256xf32>
    %51 = vector.extract_strided_slice %50 {offsets = [0, 0], sizes = [8, 128], strides = [1, 1]} : vector<8x256xf32> to vector<8x128xf32>
    %52 = vector.extract_strided_slice %50 {offsets = [0, 128], sizes = [8, 128], strides = [1, 1]} : vector<8x256xf32> to vector<8x128xf32>
    %53 = vector.extract_strided_slice %14 {offsets = [0, 256], sizes = [8, 128], strides = [1, 1]} : vector<8x384xf32> to vector<8x128xf32>
    %54 = vector.extract_strided_slice %22 {offsets = [0, 256], sizes = [8, 128], strides = [1, 1]} : vector<8x384xf32> to vector<8x128xf32>
    %55 = arith.mulf %51, %54 : vector<8x128xf32>
    %56 = arith.addf %53, %55 : vector<8x128xf32>
    %57 = math.tanh %56 : vector<8x128xf32>
    %cst_24 = arith.constant 1.000000e+00 : f32
    %58 = vector.broadcast %cst_24 : f32 to vector<8x128xf32>
    %59 = arith.subf %58, %52 : vector<8x128xf32>
    %60 = arith.mulf %59, %57 : vector<8x128xf32>
    %61 = arith.mulf %52, %7 : vector<8x128xf32>
    %62 = arith.addf %60, %61 : vector<8x128xf32>
    %63 = vector.broadcast %9 : i32 to vector<8x1xi32>
    %64 = arith.cmpi sgt, %3, %63 : vector<8x1xi32>
    %65 = vector.broadcast %10 : i32 to vector<8x1xi32>
    %66 = arith.cmpi sgt, %3, %65 : vector<8x1xi32>
    %67 = vector.shape_cast %64 : vector<8x1xi1> to vector<8x1xi1>
    %68 = vector.broadcast %67 : vector<8x1xi1> to vector<8x128xi1>
    %69 = arith.select %68, %42, %6 : vector<8x128xi1>, vector<8x128xf32>
    %70 = vector.shape_cast %66 : vector<8x1xi1> to vector<8x1xi1>
    %71 = vector.broadcast %70 : vector<8x1xi1> to vector<8x128xi1>
    %72 = arith.select %71, %62, %7 : vector<8x128xi1>, vector<8x128xf32>
    %cst_25 = arith.constant 0.000000e+00 : f32
    %73 = vector.shape_cast %64 : vector<8x1xi1> to vector<8x1xi1>
    %74 = vector.broadcast %73 : vector<8x1xi1> to vector<8x128xi1>
    %75 = vector.broadcast %cst_25 : f32 to vector<8x128xf32>
    %76 = arith.select %74, %69, %75 : vector<8x128xi1>, vector<8x128xf32>
    %c0_26 = arith.constant 0 : index
    %c0_27 = arith.constant 0 : index
    %c0_28 = arith.constant 0 : index
    %77 = vector.load %arg9[%c0_26, %c0_27, %c0_28] : memref<8x8x128xf32, #tpu.memory_space<vmem>>, vector<8x1x128xf32>
    %78 = vector.shape_cast %77 : vector<8x1x128xf32> to vector<8x128xf32>
    %79 = vector.shape_cast %76 : vector<8x128xf32> to vector<8x1x128xf32>
    tpu.vector_store %arg9[%c0_26, %c0_27, %c0_28], %79 {strides = array<i32>} : memref<8x8x128xf32, #tpu.memory_space<vmem>>, vector<8x1x128xf32>,
    %cst_29 = arith.constant 0.000000e+00 : f32
    %80 = vector.shape_cast %66 : vector<8x1xi1> to vector<8x1xi1>
    %81 = vector.broadcast %80 : vector<8x1xi1> to vector<8x128xi1>
    %82 = vector.broadcast %cst_29 : f32 to vector<8x128xf32>
    %83 = arith.select %81, %72, %82 : vector<8x128xi1>, vector<8x128xf32>
    %c0_30 = arith.constant 0 : index
    %c7_31 = arith.constant 7 : index
    %c0_32 = arith.constant 0 : index
    %84 = vector.load %arg10[%c0_30, %c7_31, %c0_32] : memref<8x8x128xf32, #tpu.memory_space<vmem>>, vector<8x1x128xf32>
    %85 = vector.shape_cast %84 : vector<8x1x128xf32> to vector<8x128xf32>
    %86 = vector.shape_cast %83 : vector<8x128xf32> to vector<8x1x128xf32>
    tpu.vector_store %arg10[%c0_30, %c7_31, %c0_32], %86 {strides = array<i32>} : memref<8x8x128xf32, #tpu.memory_space<vmem>>, vector<8x1x128xf32>,
    %c8_i32_33 = arith.constant 8 : i32
    %87 = arith.muli %arg1, %c8_i32_33 : i32
    %c1_i32 = arith.constant 1 : i32
    %88 = arith.addi %87, %c1_i32 : i32
    %c15_i32_34 = arith.constant 15 : i32
    %89 = arith.subi %c15_i32_34, %88 : i32
    %c1 = arith.constant 1 : index
    %c0_35 = arith.constant 0 : index
    %c0_36 = arith.constant 0 : index
    %90 = vector.load %arg3[%c1, %c0_35, %c0_36] : memref<8x8x384xf32, #tpu.memory_space<vmem>>, vector<1x8x384xf32>
    %91 = vector.shape_cast %90 : vector<1x8x384xf32> to vector<8x384xf32>
    %c6 = arith.constant 6 : index
    %c0_37 = arith.constant 0 : index
    %c0_38 = arith.constant 0 : index
    %92 = vector.load %arg4[%c6, %c0_37, %c0_38] : memref<8x8x384xf32, #tpu.memory_space<vmem>>, vector<1x8x384xf32>
    %93 = vector.shape_cast %92 : vector<1x8x384xf32> to vector<8x384xf32>
    %c0_39 = arith.constant 0 : index
    %c0_40 = arith.constant 0 : index
    %94 = vector.load %arg5[%c0_39, %c0_40] : memref<128x384xf32, #tpu.memory_space<vmem>>, vector<128x384xf32>
    %cst_41 = arith.constant dense<0.000000e+00> : vector<8x384xf32>
    %95 = tpu.matmul %69, %94, %cst_41 {dimension_numbers = #tpu.dot_dimension_numbers<[1], [0], [0], [1], [0, 0, 1, 1], [], []>} : vector<8x128xf32>, vector<128x384xf32>, vector<8x384xf32> -> vector<8x384xf32>
    %96 = vector.broadcast %4 : vector<1x384xf32> to vector<8x384xf32>
    %97 = arith.addf %95, %96 : vector<8x384xf32>
    %c0_42 = arith.constant 0 : index
    %c0_43 = arith.constant 0 : index
    %98 = vector.load %arg6[%c0_42, %c0_43] : memref<128x384xf32, #tpu.memory_space<vmem>>, vector<128x384xf32>
    %cst_44 = arith.constant dense<0.000000e+00> : vector<8x384xf32>
    %99 = tpu.matmul %72, %98, %cst_44 {dimension_numbers = #tpu.dot_dimension_numbers<[1], [0], [0], [1], [0, 0, 1, 1], [], []>} : vector<8x128xf32>, vector<128x384xf32>, vector<8x384xf32> -> vector<8x384xf32>
    %100 = vector.broadcast %5 : vector<1x384xf32> to vector<8x384xf32>
    %101 = arith.addf %99, %100 : vector<8x384xf32>
    %102 = vector.extract_strided_slice %91 {offsets = [0, 0], sizes = [8, 256], strides = [1, 1]} : vector<8x384xf32> to vector<8x256xf32>
    %103 = vector.extract_strided_slice %97 {offsets = [0, 0], sizes = [8, 256], strides = [1, 1]} : vector<8x384xf32> to vector<8x256xf32>
    %104 = arith.addf %102, %103 : vector<8x256xf32>
    %105 = arith.negf %104 : vector<8x256xf32>
    %106 = math.exp %105 : vector<8x256xf32>
    %cst_45 = arith.constant 1.000000e+00 : f32
    %107 = vector.broadcast %cst_45 : f32 to vector<8x256xf32>
    %108 = arith.addf %107, %106 : vector<8x256xf32>
    %109 = arith.divf %107, %108 : vector<8x256xf32>
    %110 = vector.extract_strided_slice %109 {offsets = [0, 0], sizes = [8, 128], strides = [1, 1]} : vector<8x256xf32> to vector<8x128xf32>
    %111 = vector.extract_strided_slice %109 {offsets = [0, 128], sizes = [8, 128], strides = [1, 1]} : vector<8x256xf32> to vector<8x128xf32>
    %112 = vector.extract_strided_slice %91 {offsets = [0, 256], sizes = [8, 128], strides = [1, 1]} : vector<8x384xf32> to vector<8x128xf32>
    %113 = vector.extract_strided_slice %97 {offsets = [0, 256], sizes = [8, 128], strides = [1, 1]} : vector<8x384xf32> to vector<8x128xf32>
    %114 = arith.mulf %110, %113 : vector<8x128xf32>
    %115 = arith.addf %112, %114 : vector<8x128xf32>
    %116 = math.tanh %115 : vector<8x128xf32>
    %cst_46 = arith.constant 1.000000e+00 : f32
    %117 = vector.broadcast %cst_46 : f32 to vector<8x128xf32>
    %118 = arith.subf %117, %111 : vector<8x128xf32>
    %119 = arith.mulf %118, %116 : vector<8x128xf32>
    %120 = arith.mulf %111, %69 : vector<8x128xf32>
    %121 = arith.addf %119, %120 : vector<8x128xf32>
    %122 = vector.extract_strided_slice %93 {offsets = [0, 0], sizes = [8, 256], strides = [1, 1]} : vector<8x384xf32> to vector<8x256xf32>
    %123 = vector.extract_strided_slice %101 {offsets = [0, 0], sizes = [8, 256], strides = [1, 1]} : vector<8x384xf32> to vector<8x256xf32>
    %124 = arith.addf %122, %123 : vector<8x256xf32>
    %125 = arith.negf %124 : vector<8x256xf32>
    %126 = math.exp %125 : vector<8x256xf32>
    %cst_47 = arith.constant 1.000000e+00 : f32
    %127 = vector.broadcast %cst_47 : f32 to vector<8x256xf32>
    %128 = arith.addf %127, %126 : vector<8x256xf32>
    %129 = arith.divf %127, %128 : vector<8x256xf32>
    %130 = vector.extract_strided_slice %129 {offsets = [0, 0], sizes = [8, 128], strides = [1, 1]} : vector<8x256xf32> to vector<8x128xf32>
    %131 = vector.extract_strided_slice %129 {offsets = [0, 128], sizes = [8, 128], strides = [1, 1]} : vector<8x256xf32> to vector<8x128xf32>
    %132 = vector.extract_strided_slice %93 {offsets = [0, 256], sizes = [8, 128], strides = [1, 1]} : vector<8x384xf32> to vector<8x128xf32>
    %133 = vector.extract_strided_slice %101 {offsets = [0, 256], sizes = [8, 128], strides = [1, 1]} : vector<8x384xf32> to vector<8x128xf32>
    %134 = arith.mulf %130, %133 : vector<8x128xf32>
    %135 = arith.addf %132, %134 : vector<8x128xf32>
    %136 = math.tanh %135 : vector<8x128xf32>
    %cst_48 = arith.constant 1.000000e+00 : f32
    %137 = vector.broadcast %cst_48 : f32 to vector<8x128xf32>
    %138 = arith.subf %137, %131 : vector<8x128xf32>
    %139 = arith.mulf %138, %136 : vector<8x128xf32>
    %140 = arith.mulf %131, %72 : vector<8x128xf32>
    %141 = arith.addf %139, %140 : vector<8x128xf32>
    %142 = vector.broadcast %88 : i32 to vector<8x1xi32>
    %143 = arith.cmpi sgt, %3, %142 : vector<8x1xi32>
    %144 = vector.broadcast %89 : i32 to vector<8x1xi32>
    %145 = arith.cmpi sgt, %3, %144 : vector<8x1xi32>
    %146 = vector.shape_cast %143 : vector<8x1xi1> to vector<8x1xi1>
    %147 = vector.broadcast %146 : vector<8x1xi1> to vector<8x128xi1>
    %148 = arith.select %147, %121, %69 : vector<8x128xi1>, vector<8x128xf32>
    %149 = vector.shape_cast %145 : vector<8x1xi1> to vector<8x1xi1>
    %150 = vector.broadcast %149 : vector<8x1xi1> to vector<8x128xi1>
    %151 = arith.select %150, %141, %72 : vector<8x128xi1>, vector<8x128xf32>
    %cst_49 = arith.constant 0.000000e+00 : f32
    %152 = vector.shape_cast %143 : vector<8x1xi1> to vector<8x1xi1>
    %153 = vector.broadcast %152 : vector<8x1xi1> to vector<8x128xi1>
    %154 = vector.broadcast %cst_49 : f32 to vector<8x128xf32>
    %155 = arith.select %153, %148, %154 : vector<8x128xi1>, vector<8x128xf32>
    %c0_50 = arith.constant 0 : index
    %c1_51 = arith.constant 1 : index
    %c0_52 = arith.constant 0 : index
    %156 = vector.load %arg9[%c0_50, %c1_51, %c0_52] : memref<8x8x128xf32, #tpu.memory_space<vmem>>, vector<8x1x128xf32>
    %157 = vector.shape_cast %156 : vector<8x1x128xf32> to vector<8x128xf32>
    %158 = vector.shape_cast %155 : vector<8x128xf32> to vector<8x1x128xf32>
    tpu.vector_store %arg9[%c0_50, %c1_51, %c0_52], %158 {strides = array<i32>} : memref<8x8x128xf32, #tpu.memory_space<vmem>>, vector<8x1x128xf32>,
    %cst_53 = arith.constant 0.000000e+00 : f32
    %159 = vector.shape_cast %145 : vector<8x1xi1> to vector<8x1xi1>
    %160 = vector.broadcast %159 : vector<8x1xi1> to vector<8x128xi1>
    %161 = vector.broadcast %cst_53 : f32 to vector<8x128xf32>
    %162 = arith.select %160, %151, %161 : vector<8x128xi1>, vector<8x128xf32>
    %c0_54 = arith.constant 0 : index
    %c6_55 = arith.constant 6 : index
    %c0_56 = arith.constant 0 : index
    %163 = vector.load %arg10[%c0_54, %c6_55, %c0_56] : memref<8x8x128xf32, #tpu.memory_space<vmem>>, vector<8x1x128xf32>
    %164 = vector.shape_cast %163 : vector<8x1x128xf32> to vector<8x128xf32>
    %165 = vector.shape_cast %162 : vector<8x128xf32> to vector<8x1x128xf32>
    tpu.vector_store %arg10[%c0_54, %c6_55, %c0_56], %165 {strides = array<i32>} : memref<8x8x128xf32, #tpu.memory_space<vmem>>, vector<8x1x128xf32>,
    %c8_i32_57 = arith.constant 8 : i32
    %166 = arith.muli %arg1, %c8_i32_57 : i32
    %c2_i32 = arith.constant 2 : i32
    %167 = arith.addi %166, %c2_i32 : i32
    %c15_i32_58 = arith.constant 15 : i32
    %168 = arith.subi %c15_i32_58, %167 : i32
    %c2 = arith.constant 2 : index
    %c0_59 = arith.constant 0 : index
    %c0_60 = arith.constant 0 : index
    %169 = vector.load %arg3[%c2, %c0_59, %c0_60] : memref<8x8x384xf32, #tpu.memory_space<vmem>>, vector<1x8x384xf32>
    %170 = vector.shape_cast %169 : vector<1x8x384xf32> to vector<8x384xf32>
    %c5 = arith.constant 5 : index
    %c0_61 = arith.constant 0 : index
    %c0_62 = arith.constant 0 : index
    %171 = vector.load %arg4[%c5, %c0_61, %c0_62] : memref<8x8x384xf32, #tpu.memory_space<vmem>>, vector<1x8x384xf32>
    %172 = vector.shape_cast %171 : vector<1x8x384xf32> to vector<8x384xf32>
    %c0_63 = arith.constant 0 : index
    %c0_64 = arith.constant 0 : index
    %173 = vector.load %arg5[%c0_63, %c0_64] : memref<128x384xf32, #tpu.memory_space<vmem>>, vector<128x384xf32>
    %cst_65 = arith.constant dense<0.000000e+00> : vector<8x384xf32>
    %174 = tpu.matmul %148, %173, %cst_65 {dimension_numbers = #tpu.dot_dimension_numbers<[1], [0], [0], [1], [0, 0, 1, 1], [], []>} : vector<8x128xf32>, vector<128x384xf32>, vector<8x384xf32> -> vector<8x384xf32>
    %175 = vector.broadcast %4 : vector<1x384xf32> to vector<8x384xf32>
    %176 = arith.addf %174, %175 : vector<8x384xf32>
    %c0_66 = arith.constant 0 : index
    %c0_67 = arith.constant 0 : index
    %177 = vector.load %arg6[%c0_66, %c0_67] : memref<128x384xf32, #tpu.memory_space<vmem>>, vector<128x384xf32>
    %cst_68 = arith.constant dense<0.000000e+00> : vector<8x384xf32>
    %178 = tpu.matmul %151, %177, %cst_68 {dimension_numbers = #tpu.dot_dimension_numbers<[1], [0], [0], [1], [0, 0, 1, 1], [], []>} : vector<8x128xf32>, vector<128x384xf32>, vector<8x384xf32> -> vector<8x384xf32>
    %179 = vector.broadcast %5 : vector<1x384xf32> to vector<8x384xf32>
    %180 = arith.addf %178, %179 : vector<8x384xf32>
    %181 = vector.extract_strided_slice %170 {offsets = [0, 0], sizes = [8, 256], strides = [1, 1]} : vector<8x384xf32> to vector<8x256xf32>
    %182 = vector.extract_strided_slice %176 {offsets = [0, 0], sizes = [8, 256], strides = [1, 1]} : vector<8x384xf32> to vector<8x256xf32>
    %183 = arith.addf %181, %182 : vector<8x256xf32>
    %184 = arith.negf %183 : vector<8x256xf32>
    %185 = math.exp %184 : vector<8x256xf32>
    %cst_69 = arith.constant 1.000000e+00 : f32
    %186 = vector.broadcast %cst_69 : f32 to vector<8x256xf32>
    %187 = arith.addf %186, %185 : vector<8x256xf32>
    %188 = arith.divf %186, %187 : vector<8x256xf32>
    %189 = vector.extract_strided_slice %188 {offsets = [0, 0], sizes = [8, 128], strides = [1, 1]} : vector<8x256xf32> to vector<8x128xf32>
    %190 = vector.extract_strided_slice %188 {offsets = [0, 128], sizes = [8, 128], strides = [1, 1]} : vector<8x256xf32> to vector<8x128xf32>
    %191 = vector.extract_strided_slice %170 {offsets = [0, 256], sizes = [8, 128], strides = [1, 1]} : vector<8x384xf32> to vector<8x128xf32>
    %192 = vector.extract_strided_slice %176 {offsets = [0, 256], sizes = [8, 128], strides = [1, 1]} : vector<8x384xf32> to vector<8x128xf32>
    %193 = arith.mulf %189, %192 : vector<8x128xf32>
    %194 = arith.addf %191, %193 : vector<8x128xf32>
    %195 = math.tanh %194 : vector<8x128xf32>
    %cst_70 = arith.constant 1.000000e+00 : f32
    %196 = vector.broadcast %cst_70 : f32 to vector<8x128xf32>
    %197 = arith.subf %196, %190 : vector<8x128xf32>
    %198 = arith.mulf %197, %195 : vector<8x128xf32>
    %199 = arith.mulf %190, %148 : vector<8x128xf32>
    %200 = arith.addf %198, %199 : vector<8x128xf32>
    %201 = vector.extract_strided_slice %172 {offsets = [0, 0], sizes = [8, 256], strides = [1, 1]} : vector<8x384xf32> to vector<8x256xf32>
    %202 = vector.extract_strided_slice %180 {offsets = [0, 0], sizes = [8, 256], strides = [1, 1]} : vector<8x384xf32> to vector<8x256xf32>
    %203 = arith.addf %201, %202 : vector<8x256xf32>
    %204 = arith.negf %203 : vector<8x256xf32>
    %205 = math.exp %204 : vector<8x256xf32>
    %cst_71 = arith.constant 1.000000e+00 : f32
    %206 = vector.broadcast %cst_71 : f32 to vector<8x256xf32>
    %207 = arith.addf %206, %205 : vector<8x256xf32>
    %208 = arith.divf %206, %207 : vector<8x256xf32>
    %209 = vector.extract_strided_slice %208 {offsets = [0, 0], sizes = [8, 128], strides = [1, 1]} : vector<8x256xf32> to vector<8x128xf32>
    %210 = vector.extract_strided_slice %208 {offsets = [0, 128], sizes = [8, 128], strides = [1, 1]} : vector<8x256xf32> to vector<8x128xf32>
    %211 = vector.extract_strided_slice %172 {offsets = [0, 256], sizes = [8, 128], strides = [1, 1]} : vector<8x384xf32> to vector<8x128xf32>
    %212 = vector.extract_strided_slice %180 {offsets = [0, 256], sizes = [8, 128], strides = [1, 1]} : vector<8x384xf32> to vector<8x128xf32>
    %213 = arith.mulf %209, %212 : vector<8x128xf32>
    %214 = arith.addf %211, %213 : vector<8x128xf32>
    %215 = math.tanh %214 : vector<8x128xf32>
    %cst_72 = arith.constant 1.000000e+00 : f32
    %216 = vector.broadcast %cst_72 : f32 to vector<8x128xf32>
    %217 = arith.subf %216, %210 : vector<8x128xf32>
    %218 = arith.mulf %217, %215 : vector<8x128xf32>
    %219 = arith.mulf %210, %151 : vector<8x128xf32>
    %220 = arith.addf %218, %219 : vector<8x128xf32>
    %221 = vector.broadcast %167 : i32 to vector<8x1xi32>
    %222 = arith.cmpi sgt, %3, %221 : vector<8x1xi32>
    %223 = vector.broadcast %168 : i32 to vector<8x1xi32>
    %224 = arith.cmpi sgt, %3, %223 : vector<8x1xi32>
    %225 = vector.shape_cast %222 : vector<8x1xi1> to vector<8x1xi1>
    %226 = vector.broadcast %225 : vector<8x1xi1> to vector<8x128xi1>
    %227 = arith.select %226, %200, %148 : vector<8x128xi1>, vector<8x128xf32>
    %228 = vector.shape_cast %224 : vector<8x1xi1> to vector<8x1xi1>
    %229 = vector.broadcast %228 : vector<8x1xi1> to vector<8x128xi1>
    %230 = arith.select %229, %220, %151 : vector<8x128xi1>, vector<8x128xf32>
    %cst_73 = arith.constant 0.000000e+00 : f32
    %231 = vector.shape_cast %222 : vector<8x1xi1> to vector<8x1xi1>
    %232 = vector.broadcast %231 : vector<8x1xi1> to vector<8x128xi1>
    %233 = vector.broadcast %cst_73 : f32 to vector<8x128xf32>
    %234 = arith.select %232, %227, %233 : vector<8x128xi1>, vector<8x128xf32>
    %c0_74 = arith.constant 0 : index
    %c2_75 = arith.constant 2 : index
    %c0_76 = arith.constant 0 : index
    %235 = vector.load %arg9[%c0_74, %c2_75, %c0_76] : memref<8x8x128xf32, #tpu.memory_space<vmem>>, vector<8x1x128xf32>
    %236 = vector.shape_cast %235 : vector<8x1x128xf32> to vector<8x128xf32>
    %237 = vector.shape_cast %234 : vector<8x128xf32> to vector<8x1x128xf32>
    tpu.vector_store %arg9[%c0_74, %c2_75, %c0_76], %237 {strides = array<i32>} : memref<8x8x128xf32, #tpu.memory_space<vmem>>, vector<8x1x128xf32>,
    %cst_77 = arith.constant 0.000000e+00 : f32
    %238 = vector.shape_cast %224 : vector<8x1xi1> to vector<8x1xi1>
    %239 = vector.broadcast %238 : vector<8x1xi1> to vector<8x128xi1>
    %240 = vector.broadcast %cst_77 : f32 to vector<8x128xf32>
    %241 = arith.select %239, %230, %240 : vector<8x128xi1>, vector<8x128xf32>
    %c0_78 = arith.constant 0 : index
    %c5_79 = arith.constant 5 : index
    %c0_80 = arith.constant 0 : index
    %242 = vector.load %arg10[%c0_78, %c5_79, %c0_80] : memref<8x8x128xf32, #tpu.memory_space<vmem>>, vector<8x1x128xf32>
    %243 = vector.shape_cast %242 : vector<8x1x128xf32> to vector<8x128xf32>
    %244 = vector.shape_cast %241 : vector<8x128xf32> to vector<8x1x128xf32>
    tpu.vector_store %arg10[%c0_78, %c5_79, %c0_80], %244 {strides = array<i32>} : memref<8x8x128xf32, #tpu.memory_space<vmem>>, vector<8x1x128xf32>,
    %c8_i32_81 = arith.constant 8 : i32
    %245 = arith.muli %arg1, %c8_i32_81 : i32
    %c3_i32 = arith.constant 3 : i32
    %246 = arith.addi %245, %c3_i32 : i32
    %c15_i32_82 = arith.constant 15 : i32
    %247 = arith.subi %c15_i32_82, %246 : i32
    %c3 = arith.constant 3 : index
    %c0_83 = arith.constant 0 : index
    %c0_84 = arith.constant 0 : index
    %248 = vector.load %arg3[%c3, %c0_83, %c0_84] : memref<8x8x384xf32, #tpu.memory_space<vmem>>, vector<1x8x384xf32>
    %249 = vector.shape_cast %248 : vector<1x8x384xf32> to vector<8x384xf32>
    %c4 = arith.constant 4 : index
    %c0_85 = arith.constant 0 : index
    %c0_86 = arith.constant 0 : index
    %250 = vector.load %arg4[%c4, %c0_85, %c0_86] : memref<8x8x384xf32, #tpu.memory_space<vmem>>, vector<1x8x384xf32>
    %251 = vector.shape_cast %250 : vector<1x8x384xf32> to vector<8x384xf32>
    %c0_87 = arith.constant 0 : index
    %c0_88 = arith.constant 0 : index
    %252 = vector.load %arg5[%c0_87, %c0_88] : memref<128x384xf32, #tpu.memory_space<vmem>>, vector<128x384xf32>
    %cst_89 = arith.constant dense<0.000000e+00> : vector<8x384xf32>
    %253 = tpu.matmul %227, %252, %cst_89 {dimension_numbers = #tpu.dot_dimension_numbers<[1], [0], [0], [1], [0, 0, 1, 1], [], []>} : vector<8x128xf32>, vector<128x384xf32>, vector<8x384xf32> -> vector<8x384xf32>
    %254 = vector.broadcast %4 : vector<1x384xf32> to vector<8x384xf32>
    %255 = arith.addf %253, %254 : vector<8x384xf32>
    %c0_90 = arith.constant 0 : index
    %c0_91 = arith.constant 0 : index
    %256 = vector.load %arg6[%c0_90, %c0_91] : memref<128x384xf32, #tpu.memory_space<vmem>>, vector<128x384xf32>
    %cst_92 = arith.constant dense<0.000000e+00> : vector<8x384xf32>
    %257 = tpu.matmul %230, %256, %cst_92 {dimension_numbers = #tpu.dot_dimension_numbers<[1], [0], [0], [1], [0, 0, 1, 1], [], []>} : vector<8x128xf32>, vector<128x384xf32>, vector<8x384xf32> -> vector<8x384xf32>
    %258 = vector.broadcast %5 : vector<1x384xf32> to vector<8x384xf32>
    %259 = arith.addf %257, %258 : vector<8x384xf32>
    %260 = vector.extract_strided_slice %249 {offsets = [0, 0], sizes = [8, 256], strides = [1, 1]} : vector<8x384xf32> to vector<8x256xf32>
    %261 = vector.extract_strided_slice %255 {offsets = [0, 0], sizes = [8, 256], strides = [1, 1]} : vector<8x384xf32> to vector<8x256xf32>
    %262 = arith.addf %260, %261 : vector<8x256xf32>
    %263 = arith.negf %262 : vector<8x256xf32>
    %264 = math.exp %263 : vector<8x256xf32>
    %cst_93 = arith.constant 1.000000e+00 : f32
    %265 = vector.broadcast %cst_93 : f32 to vector<8x256xf32>
    %266 = arith.addf %265, %264 : vector<8x256xf32>
    %267 = arith.divf %265, %266 : vector<8x256xf32>
    %268 = vector.extract_strided_slice %267 {offsets = [0, 0], sizes = [8, 128], strides = [1, 1]} : vector<8x256xf32> to vector<8x128xf32>
    %269 = vector.extract_strided_slice %267 {offsets = [0, 128], sizes = [8, 128], strides = [1, 1]} : vector<8x256xf32> to vector<8x128xf32>
    %270 = vector.extract_strided_slice %249 {offsets = [0, 256], sizes = [8, 128], strides = [1, 1]} : vector<8x384xf32> to vector<8x128xf32>
    %271 = vector.extract_strided_slice %255 {offsets = [0, 256], sizes = [8, 128], strides = [1, 1]} : vector<8x384xf32> to vector<8x128xf32>
    %272 = arith.mulf %268, %271 : vector<8x128xf32>
    %273 = arith.addf %270, %272 : vector<8x128xf32>
    %274 = math.tanh %273 : vector<8x128xf32>
    %cst_94 = arith.constant 1.000000e+00 : f32
    %275 = vector.broadcast %cst_94 : f32 to vector<8x128xf32>
    %276 = arith.subf %275, %269 : vector<8x128xf32>
    %277 = arith.mulf %276, %274 : vector<8x128xf32>
    %278 = arith.mulf %269, %227 : vector<8x128xf32>
    %279 = arith.addf %277, %278 : vector<8x128xf32>
    %280 = vector.extract_strided_slice %251 {offsets = [0, 0], sizes = [8, 256], strides = [1, 1]} : vector<8x384xf32> to vector<8x256xf32>
    %281 = vector.extract_strided_slice %259 {offsets = [0, 0], sizes = [8, 256], strides = [1, 1]} : vector<8x384xf32> to vector<8x256xf32>
    %282 = arith.addf %280, %281 : vector<8x256xf32>
    %283 = arith.negf %282 : vector<8x256xf32>
    %284 = math.exp %283 : vector<8x256xf32>
    %cst_95 = arith.constant 1.000000e+00 : f32
    %285 = vector.broadcast %cst_95 : f32 to vector<8x256xf32>
    %286 = arith.addf %285, %284 : vector<8x256xf32>
    %287 = arith.divf %285, %286 : vector<8x256xf32>
    %288 = vector.extract_strided_slice %287 {offsets = [0, 0], sizes = [8, 128], strides = [1, 1]} : vector<8x256xf32> to vector<8x128xf32>
    %289 = vector.extract_strided_slice %287 {offsets = [0, 128], sizes = [8, 128], strides = [1, 1]} : vector<8x256xf32> to vector<8x128xf32>
    %290 = vector.extract_strided_slice %251 {offsets = [0, 256], sizes = [8, 128], strides = [1, 1]} : vector<8x384xf32> to vector<8x128xf32>
    %291 = vector.extract_strided_slice %259 {offsets = [0, 256], sizes = [8, 128], strides = [1, 1]} : vector<8x384xf32> to vector<8x128xf32>
    %292 = arith.mulf %288, %291 : vector<8x128xf32>
    %293 = arith.addf %290, %292 : vector<8x128xf32>
    %294 = math.tanh %293 : vector<8x128xf32>
    %cst_96 = arith.constant 1.000000e+00 : f32
    %295 = vector.broadcast %cst_96 : f32 to vector<8x128xf32>
    %296 = arith.subf %295, %289 : vector<8x128xf32>
    %297 = arith.mulf %296, %294 : vector<8x128xf32>
    %298 = arith.mulf %289, %230 : vector<8x128xf32>
    %299 = arith.addf %297, %298 : vector<8x128xf32>
    %300 = vector.broadcast %246 : i32 to vector<8x1xi32>
    %301 = arith.cmpi sgt, %3, %300 : vector<8x1xi32>
    %302 = vector.broadcast %247 : i32 to vector<8x1xi32>
    %303 = arith.cmpi sgt, %3, %302 : vector<8x1xi32>
    %304 = vector.shape_cast %301 : vector<8x1xi1> to vector<8x1xi1>
    %305 = vector.broadcast %304 : vector<8x1xi1> to vector<8x128xi1>
    %306 = arith.select %305, %279, %227 : vector<8x128xi1>, vector<8x128xf32>
    %307 = vector.shape_cast %303 : vector<8x1xi1> to vector<8x1xi1>
    %308 = vector.broadcast %307 : vector<8x1xi1> to vector<8x128xi1>
    %309 = arith.select %308, %299, %230 : vector<8x128xi1>, vector<8x128xf32>
    %cst_97 = arith.constant 0.000000e+00 : f32
    %310 = vector.shape_cast %301 : vector<8x1xi1> to vector<8x1xi1>
    %311 = vector.broadcast %310 : vector<8x1xi1> to vector<8x128xi1>
    %312 = vector.broadcast %cst_97 : f32 to vector<8x128xf32>
    %313 = arith.select %311, %306, %312 : vector<8x128xi1>, vector<8x128xf32>
    %c0_98 = arith.constant 0 : index
    %c3_99 = arith.constant 3 : index
    %c0_100 = arith.constant 0 : index
    %314 = vector.load %arg9[%c0_98, %c3_99, %c0_100] : memref<8x8x128xf32, #tpu.memory_space<vmem>>, vector<8x1x128xf32>
    %315 = vector.shape_cast %314 : vector<8x1x128xf32> to vector<8x128xf32>
    %316 = vector.shape_cast %313 : vector<8x128xf32> to vector<8x1x128xf32>
    tpu.vector_store %arg9[%c0_98, %c3_99, %c0_100], %316 {strides = array<i32>} : memref<8x8x128xf32, #tpu.memory_space<vmem>>, vector<8x1x128xf32>,
    %cst_101 = arith.constant 0.000000e+00 : f32
    %317 = vector.shape_cast %303 : vector<8x1xi1> to vector<8x1xi1>
    %318 = vector.broadcast %317 : vector<8x1xi1> to vector<8x128xi1>
    %319 = vector.broadcast %cst_101 : f32 to vector<8x128xf32>
    %320 = arith.select %318, %309, %319 : vector<8x128xi1>, vector<8x128xf32>
    %c0_102 = arith.constant 0 : index
    %c4_103 = arith.constant 4 : index
    %c0_104 = arith.constant 0 : index
    %321 = vector.load %arg10[%c0_102, %c4_103, %c0_104] : memref<8x8x128xf32, #tpu.memory_space<vmem>>, vector<8x1x128xf32>
    %322 = vector.shape_cast %321 : vector<8x1x128xf32> to vector<8x128xf32>
    %323 = vector.shape_cast %320 : vector<8x128xf32> to vector<8x1x128xf32>
    tpu.vector_store %arg10[%c0_102, %c4_103, %c0_104], %323 {strides = array<i32>} : memref<8x8x128xf32, #tpu.memory_space<vmem>>, vector<8x1x128xf32>,
    %c8_i32_105 = arith.constant 8 : i32
    %324 = arith.muli %arg1, %c8_i32_105 : i32
    %c4_i32 = arith.constant 4 : i32
    %325 = arith.addi %324, %c4_i32 : i32
    %c15_i32_106 = arith.constant 15 : i32
    %326 = arith.subi %c15_i32_106, %325 : i32
    %c4_107 = arith.constant 4 : index
    %c0_108 = arith.constant 0 : index
    %c0_109 = arith.constant 0 : index
    %327 = vector.load %arg3[%c4_107, %c0_108, %c0_109] : memref<8x8x384xf32, #tpu.memory_space<vmem>>, vector<1x8x384xf32>
    %328 = vector.shape_cast %327 : vector<1x8x384xf32> to vector<8x384xf32>
    %c3_110 = arith.constant 3 : index
    %c0_111 = arith.constant 0 : index
    %c0_112 = arith.constant 0 : index
    %329 = vector.load %arg4[%c3_110, %c0_111, %c0_112] : memref<8x8x384xf32, #tpu.memory_space<vmem>>, vector<1x8x384xf32>
    %330 = vector.shape_cast %329 : vector<1x8x384xf32> to vector<8x384xf32>
    %c0_113 = arith.constant 0 : index
    %c0_114 = arith.constant 0 : index
    %331 = vector.load %arg5[%c0_113, %c0_114] : memref<128x384xf32, #tpu.memory_space<vmem>>, vector<128x384xf32>
    %cst_115 = arith.constant dense<0.000000e+00> : vector<8x384xf32>
    %332 = tpu.matmul %306, %331, %cst_115 {dimension_numbers = #tpu.dot_dimension_numbers<[1], [0], [0], [1], [0, 0, 1, 1], [], []>} : vector<8x128xf32>, vector<128x384xf32>, vector<8x384xf32> -> vector<8x384xf32>
    %333 = vector.broadcast %4 : vector<1x384xf32> to vector<8x384xf32>
    %334 = arith.addf %332, %333 : vector<8x384xf32>
    %c0_116 = arith.constant 0 : index
    %c0_117 = arith.constant 0 : index
    %335 = vector.load %arg6[%c0_116, %c0_117] : memref<128x384xf32, #tpu.memory_space<vmem>>, vector<128x384xf32>
    %cst_118 = arith.constant dense<0.000000e+00> : vector<8x384xf32>
    %336 = tpu.matmul %309, %335, %cst_118 {dimension_numbers = #tpu.dot_dimension_numbers<[1], [0], [0], [1], [0, 0, 1, 1], [], []>} : vector<8x128xf32>, vector<128x384xf32>, vector<8x384xf32> -> vector<8x384xf32>
    %337 = vector.broadcast %5 : vector<1x384xf32> to vector<8x384xf32>
    %338 = arith.addf %336, %337 : vector<8x384xf32>
    %339 = vector.extract_strided_slice %328 {offsets = [0, 0], sizes = [8, 256], strides = [1, 1]} : vector<8x384xf32> to vector<8x256xf32>
    %340 = vector.extract_strided_slice %334 {offsets = [0, 0], sizes = [8, 256], strides = [1, 1]} : vector<8x384xf32> to vector<8x256xf32>
    %341 = arith.addf %339, %340 : vector<8x256xf32>
    %342 = arith.negf %341 : vector<8x256xf32>
    %343 = math.exp %342 : vector<8x256xf32>
    %cst_119 = arith.constant 1.000000e+00 : f32
    %344 = vector.broadcast %cst_119 : f32 to vector<8x256xf32>
    %345 = arith.addf %344, %343 : vector<8x256xf32>
    %346 = arith.divf %344, %345 : vector<8x256xf32>
    %347 = vector.extract_strided_slice %346 {offsets = [0, 0], sizes = [8, 128], strides = [1, 1]} : vector<8x256xf32> to vector<8x128xf32>
    %348 = vector.extract_strided_slice %346 {offsets = [0, 128], sizes = [8, 128], strides = [1, 1]} : vector<8x256xf32> to vector<8x128xf32>
    %349 = vector.extract_strided_slice %328 {offsets = [0, 256], sizes = [8, 128], strides = [1, 1]} : vector<8x384xf32> to vector<8x128xf32>
    %350 = vector.extract_strided_slice %334 {offsets = [0, 256], sizes = [8, 128], strides = [1, 1]} : vector<8x384xf32> to vector<8x128xf32>
    %351 = arith.mulf %347, %350 : vector<8x128xf32>
    %352 = arith.addf %349, %351 : vector<8x128xf32>
    %353 = math.tanh %352 : vector<8x128xf32>
    %cst_120 = arith.constant 1.000000e+00 : f32
    %354 = vector.broadcast %cst_120 : f32 to vector<8x128xf32>
    %355 = arith.subf %354, %348 : vector<8x128xf32>
    %356 = arith.mulf %355, %353 : vector<8x128xf32>
    %357 = arith.mulf %348, %306 : vector<8x128xf32>
    %358 = arith.addf %356, %357 : vector<8x128xf32>
    %359 = vector.extract_strided_slice %330 {offsets = [0, 0], sizes = [8, 256], strides = [1, 1]} : vector<8x384xf32> to vector<8x256xf32>
    %360 = vector.extract_strided_slice %338 {offsets = [0, 0], sizes = [8, 256], strides = [1, 1]} : vector<8x384xf32> to vector<8x256xf32>
    %361 = arith.addf %359, %360 : vector<8x256xf32>
    %362 = arith.negf %361 : vector<8x256xf32>
    %363 = math.exp %362 : vector<8x256xf32>
    %cst_121 = arith.constant 1.000000e+00 : f32
    %364 = vector.broadcast %cst_121 : f32 to vector<8x256xf32>
    %365 = arith.addf %364, %363 : vector<8x256xf32>
    %366 = arith.divf %364, %365 : vector<8x256xf32>
    %367 = vector.extract_strided_slice %366 {offsets = [0, 0], sizes = [8, 128], strides = [1, 1]} : vector<8x256xf32> to vector<8x128xf32>
    %368 = vector.extract_strided_slice %366 {offsets = [0, 128], sizes = [8, 128], strides = [1, 1]} : vector<8x256xf32> to vector<8x128xf32>
    %369 = vector.extract_strided_slice %330 {offsets = [0, 256], sizes = [8, 128], strides = [1, 1]} : vector<8x384xf32> to vector<8x128xf32>
    %370 = vector.extract_strided_slice %338 {offsets = [0, 256], sizes = [8, 128], strides = [1, 1]} : vector<8x384xf32> to vector<8x128xf32>
    %371 = arith.mulf %367, %370 : vector<8x128xf32>
    %372 = arith.addf %369, %371 : vector<8x128xf32>
    %373 = math.tanh %372 : vector<8x128xf32>
    %cst_122 = arith.constant 1.000000e+00 : f32
    %374 = vector.broadcast %cst_122 : f32 to vector<8x128xf32>
    %375 = arith.subf %374, %368 : vector<8x128xf32>
    %376 = arith.mulf %375, %373 : vector<8x128xf32>
    %377 = arith.mulf %368, %309 : vector<8x128xf32>
    %378 = arith.addf %376, %377 : vector<8x128xf32>
    %379 = vector.broadcast %325 : i32 to vector<8x1xi32>
    %380 = arith.cmpi sgt, %3, %379 : vector<8x1xi32>
    %381 = vector.broadcast %326 : i32 to vector<8x1xi32>
    %382 = arith.cmpi sgt, %3, %381 : vector<8x1xi32>
    %383 = vector.shape_cast %380 : vector<8x1xi1> to vector<8x1xi1>
    %384 = vector.broadcast %383 : vector<8x1xi1> to vector<8x128xi1>
    %385 = arith.select %384, %358, %306 : vector<8x128xi1>, vector<8x128xf32>
    %386 = vector.shape_cast %382 : vector<8x1xi1> to vector<8x1xi1>
    %387 = vector.broadcast %386 : vector<8x1xi1> to vector<8x128xi1>
    %388 = arith.select %387, %378, %309 : vector<8x128xi1>, vector<8x128xf32>
    %cst_123 = arith.constant 0.000000e+00 : f32
    %389 = vector.shape_cast %380 : vector<8x1xi1> to vector<8x1xi1>
    %390 = vector.broadcast %389 : vector<8x1xi1> to vector<8x128xi1>
    %391 = vector.broadcast %cst_123 : f32 to vector<8x128xf32>
    %392 = arith.select %390, %385, %391 : vector<8x128xi1>, vector<8x128xf32>
    %c0_124 = arith.constant 0 : index
    %c4_125 = arith.constant 4 : index
    %c0_126 = arith.constant 0 : index
    %393 = vector.load %arg9[%c0_124, %c4_125, %c0_126] : memref<8x8x128xf32, #tpu.memory_space<vmem>>, vector<8x1x128xf32>
    %394 = vector.shape_cast %393 : vector<8x1x128xf32> to vector<8x128xf32>
    %395 = vector.shape_cast %392 : vector<8x128xf32> to vector<8x1x128xf32>
    tpu.vector_store %arg9[%c0_124, %c4_125, %c0_126], %395 {strides = array<i32>} : memref<8x8x128xf32, #tpu.memory_space<vmem>>, vector<8x1x128xf32>,
    %cst_127 = arith.constant 0.000000e+00 : f32
    %396 = vector.shape_cast %382 : vector<8x1xi1> to vector<8x1xi1>
    %397 = vector.broadcast %396 : vector<8x1xi1> to vector<8x128xi1>
    %398 = vector.broadcast %cst_127 : f32 to vector<8x128xf32>
    %399 = arith.select %397, %388, %398 : vector<8x128xi1>, vector<8x128xf32>
    %c0_128 = arith.constant 0 : index
    %c3_129 = arith.constant 3 : index
    %c0_130 = arith.constant 0 : index
    %400 = vector.load %arg10[%c0_128, %c3_129, %c0_130] : memref<8x8x128xf32, #tpu.memory_space<vmem>>, vector<8x1x128xf32>
    %401 = vector.shape_cast %400 : vector<8x1x128xf32> to vector<8x128xf32>
    %402 = vector.shape_cast %399 : vector<8x128xf32> to vector<8x1x128xf32>
    tpu.vector_store %arg10[%c0_128, %c3_129, %c0_130], %402 {strides = array<i32>} : memref<8x8x128xf32, #tpu.memory_space<vmem>>, vector<8x1x128xf32>,
    %c8_i32_131 = arith.constant 8 : i32
    %403 = arith.muli %arg1, %c8_i32_131 : i32
    %c5_i32 = arith.constant 5 : i32
    %404 = arith.addi %403, %c5_i32 : i32
    %c15_i32_132 = arith.constant 15 : i32
    %405 = arith.subi %c15_i32_132, %404 : i32
    %c5_133 = arith.constant 5 : index
    %c0_134 = arith.constant 0 : index
    %c0_135 = arith.constant 0 : index
    %406 = vector.load %arg3[%c5_133, %c0_134, %c0_135] : memref<8x8x384xf32, #tpu.memory_space<vmem>>, vector<1x8x384xf32>
    %407 = vector.shape_cast %406 : vector<1x8x384xf32> to vector<8x384xf32>
    %c2_136 = arith.constant 2 : index
    %c0_137 = arith.constant 0 : index
    %c0_138 = arith.constant 0 : index
    %408 = vector.load %arg4[%c2_136, %c0_137, %c0_138] : memref<8x8x384xf32, #tpu.memory_space<vmem>>, vector<1x8x384xf32>
    %409 = vector.shape_cast %408 : vector<1x8x384xf32> to vector<8x384xf32>
    %c0_139 = arith.constant 0 : index
    %c0_140 = arith.constant 0 : index
    %410 = vector.load %arg5[%c0_139, %c0_140] : memref<128x384xf32, #tpu.memory_space<vmem>>, vector<128x384xf32>
    %cst_141 = arith.constant dense<0.000000e+00> : vector<8x384xf32>
    %411 = tpu.matmul %385, %410, %cst_141 {dimension_numbers = #tpu.dot_dimension_numbers<[1], [0], [0], [1], [0, 0, 1, 1], [], []>} : vector<8x128xf32>, vector<128x384xf32>, vector<8x384xf32> -> vector<8x384xf32>
    %412 = vector.broadcast %4 : vector<1x384xf32> to vector<8x384xf32>
    %413 = arith.addf %411, %412 : vector<8x384xf32>
    %c0_142 = arith.constant 0 : index
    %c0_143 = arith.constant 0 : index
    %414 = vector.load %arg6[%c0_142, %c0_143] : memref<128x384xf32, #tpu.memory_space<vmem>>, vector<128x384xf32>
    %cst_144 = arith.constant dense<0.000000e+00> : vector<8x384xf32>
    %415 = tpu.matmul %388, %414, %cst_144 {dimension_numbers = #tpu.dot_dimension_numbers<[1], [0], [0], [1], [0, 0, 1, 1], [], []>} : vector<8x128xf32>, vector<128x384xf32>, vector<8x384xf32> -> vector<8x384xf32>
    %416 = vector.broadcast %5 : vector<1x384xf32> to vector<8x384xf32>
    %417 = arith.addf %415, %416 : vector<8x384xf32>
    %418 = vector.extract_strided_slice %407 {offsets = [0, 0], sizes = [8, 256], strides = [1, 1]} : vector<8x384xf32> to vector<8x256xf32>
    %419 = vector.extract_strided_slice %413 {offsets = [0, 0], sizes = [8, 256], strides = [1, 1]} : vector<8x384xf32> to vector<8x256xf32>
    %420 = arith.addf %418, %419 : vector<8x256xf32>
    %421 = arith.negf %420 : vector<8x256xf32>
    %422 = math.exp %421 : vector<8x256xf32>
    %cst_145 = arith.constant 1.000000e+00 : f32
    %423 = vector.broadcast %cst_145 : f32 to vector<8x256xf32>
    %424 = arith.addf %423, %422 : vector<8x256xf32>
    %425 = arith.divf %423, %424 : vector<8x256xf32>
    %426 = vector.extract_strided_slice %425 {offsets = [0, 0], sizes = [8, 128], strides = [1, 1]} : vector<8x256xf32> to vector<8x128xf32>
    %427 = vector.extract_strided_slice %425 {offsets = [0, 128], sizes = [8, 128], strides = [1, 1]} : vector<8x256xf32> to vector<8x128xf32>
    %428 = vector.extract_strided_slice %407 {offsets = [0, 256], sizes = [8, 128], strides = [1, 1]} : vector<8x384xf32> to vector<8x128xf32>
    %429 = vector.extract_strided_slice %413 {offsets = [0, 256], sizes = [8, 128], strides = [1, 1]} : vector<8x384xf32> to vector<8x128xf32>
    %430 = arith.mulf %426, %429 : vector<8x128xf32>
    %431 = arith.addf %428, %430 : vector<8x128xf32>
    %432 = math.tanh %431 : vector<8x128xf32>
    %cst_146 = arith.constant 1.000000e+00 : f32
    %433 = vector.broadcast %cst_146 : f32 to vector<8x128xf32>
    %434 = arith.subf %433, %427 : vector<8x128xf32>
    %435 = arith.mulf %434, %432 : vector<8x128xf32>
    %436 = arith.mulf %427, %385 : vector<8x128xf32>
    %437 = arith.addf %435, %436 : vector<8x128xf32>
    %438 = vector.extract_strided_slice %409 {offsets = [0, 0], sizes = [8, 256], strides = [1, 1]} : vector<8x384xf32> to vector<8x256xf32>
    %439 = vector.extract_strided_slice %417 {offsets = [0, 0], sizes = [8, 256], strides = [1, 1]} : vector<8x384xf32> to vector<8x256xf32>
    %440 = arith.addf %438, %439 : vector<8x256xf32>
    %441 = arith.negf %440 : vector<8x256xf32>
    %442 = math.exp %441 : vector<8x256xf32>
    %cst_147 = arith.constant 1.000000e+00 : f32
    %443 = vector.broadcast %cst_147 : f32 to vector<8x256xf32>
    %444 = arith.addf %443, %442 : vector<8x256xf32>
    %445 = arith.divf %443, %444 : vector<8x256xf32>
    %446 = vector.extract_strided_slice %445 {offsets = [0, 0], sizes = [8, 128], strides = [1, 1]} : vector<8x256xf32> to vector<8x128xf32>
    %447 = vector.extract_strided_slice %445 {offsets = [0, 128], sizes = [8, 128], strides = [1, 1]} : vector<8x256xf32> to vector<8x128xf32>
    %448 = vector.extract_strided_slice %409 {offsets = [0, 256], sizes = [8, 128], strides = [1, 1]} : vector<8x384xf32> to vector<8x128xf32>
    %449 = vector.extract_strided_slice %417 {offsets = [0, 256], sizes = [8, 128], strides = [1, 1]} : vector<8x384xf32> to vector<8x128xf32>
    %450 = arith.mulf %446, %449 : vector<8x128xf32>
    %451 = arith.addf %448, %450 : vector<8x128xf32>
    %452 = math.tanh %451 : vector<8x128xf32>
    %cst_148 = arith.constant 1.000000e+00 : f32
    %453 = vector.broadcast %cst_148 : f32 to vector<8x128xf32>
    %454 = arith.subf %453, %447 : vector<8x128xf32>
    %455 = arith.mulf %454, %452 : vector<8x128xf32>
    %456 = arith.mulf %447, %388 : vector<8x128xf32>
    %457 = arith.addf %455, %456 : vector<8x128xf32>
    %458 = vector.broadcast %404 : i32 to vector<8x1xi32>
    %459 = arith.cmpi sgt, %3, %458 : vector<8x1xi32>
    %460 = vector.broadcast %405 : i32 to vector<8x1xi32>
    %461 = arith.cmpi sgt, %3, %460 : vector<8x1xi32>
    %462 = vector.shape_cast %459 : vector<8x1xi1> to vector<8x1xi1>
    %463 = vector.broadcast %462 : vector<8x1xi1> to vector<8x128xi1>
    %464 = arith.select %463, %437, %385 : vector<8x128xi1>, vector<8x128xf32>
    %465 = vector.shape_cast %461 : vector<8x1xi1> to vector<8x1xi1>
    %466 = vector.broadcast %465 : vector<8x1xi1> to vector<8x128xi1>
    %467 = arith.select %466, %457, %388 : vector<8x128xi1>, vector<8x128xf32>
    %cst_149 = arith.constant 0.000000e+00 : f32
    %468 = vector.shape_cast %459 : vector<8x1xi1> to vector<8x1xi1>
    %469 = vector.broadcast %468 : vector<8x1xi1> to vector<8x128xi1>
    %470 = vector.broadcast %cst_149 : f32 to vector<8x128xf32>
    %471 = arith.select %469, %464, %470 : vector<8x128xi1>, vector<8x128xf32>
    %c0_150 = arith.constant 0 : index
    %c5_151 = arith.constant 5 : index
    %c0_152 = arith.constant 0 : index
    %472 = vector.load %arg9[%c0_150, %c5_151, %c0_152] : memref<8x8x128xf32, #tpu.memory_space<vmem>>, vector<8x1x128xf32>
    %473 = vector.shape_cast %472 : vector<8x1x128xf32> to vector<8x128xf32>
    %474 = vector.shape_cast %471 : vector<8x128xf32> to vector<8x1x128xf32>
    tpu.vector_store %arg9[%c0_150, %c5_151, %c0_152], %474 {strides = array<i32>} : memref<8x8x128xf32, #tpu.memory_space<vmem>>, vector<8x1x128xf32>,
    %cst_153 = arith.constant 0.000000e+00 : f32
    %475 = vector.shape_cast %461 : vector<8x1xi1> to vector<8x1xi1>
    %476 = vector.broadcast %475 : vector<8x1xi1> to vector<8x128xi1>
    %477 = vector.broadcast %cst_153 : f32 to vector<8x128xf32>
    %478 = arith.select %476, %467, %477 : vector<8x128xi1>, vector<8x128xf32>
    %c0_154 = arith.constant 0 : index
    %c2_155 = arith.constant 2 : index
    %c0_156 = arith.constant 0 : index
    %479 = vector.load %arg10[%c0_154, %c2_155, %c0_156] : memref<8x8x128xf32, #tpu.memory_space<vmem>>, vector<8x1x128xf32>
    %480 = vector.shape_cast %479 : vector<8x1x128xf32> to vector<8x128xf32>
    %481 = vector.shape_cast %478 : vector<8x128xf32> to vector<8x1x128xf32>
    tpu.vector_store %arg10[%c0_154, %c2_155, %c0_156], %481 {strides = array<i32>} : memref<8x8x128xf32, #tpu.memory_space<vmem>>, vector<8x1x128xf32>,
    %c8_i32_157 = arith.constant 8 : i32
    %482 = arith.muli %arg1, %c8_i32_157 : i32
    %c6_i32 = arith.constant 6 : i32
    %483 = arith.addi %482, %c6_i32 : i32
    %c15_i32_158 = arith.constant 15 : i32
    %484 = arith.subi %c15_i32_158, %483 : i32
    %c6_159 = arith.constant 6 : index
    %c0_160 = arith.constant 0 : index
    %c0_161 = arith.constant 0 : index
    %485 = vector.load %arg3[%c6_159, %c0_160, %c0_161] : memref<8x8x384xf32, #tpu.memory_space<vmem>>, vector<1x8x384xf32>
    %486 = vector.shape_cast %485 : vector<1x8x384xf32> to vector<8x384xf32>
    %c1_162 = arith.constant 1 : index
    %c0_163 = arith.constant 0 : index
    %c0_164 = arith.constant 0 : index
    %487 = vector.load %arg4[%c1_162, %c0_163, %c0_164] : memref<8x8x384xf32, #tpu.memory_space<vmem>>, vector<1x8x384xf32>
    %488 = vector.shape_cast %487 : vector<1x8x384xf32> to vector<8x384xf32>
    %c0_165 = arith.constant 0 : index
    %c0_166 = arith.constant 0 : index
    %489 = vector.load %arg5[%c0_165, %c0_166] : memref<128x384xf32, #tpu.memory_space<vmem>>, vector<128x384xf32>
    %cst_167 = arith.constant dense<0.000000e+00> : vector<8x384xf32>
    %490 = tpu.matmul %464, %489, %cst_167 {dimension_numbers = #tpu.dot_dimension_numbers<[1], [0], [0], [1], [0, 0, 1, 1], [], []>} : vector<8x128xf32>, vector<128x384xf32>, vector<8x384xf32> -> vector<8x384xf32>
    %491 = vector.broadcast %4 : vector<1x384xf32> to vector<8x384xf32>
    %492 = arith.addf %490, %491 : vector<8x384xf32>
    %c0_168 = arith.constant 0 : index
    %c0_169 = arith.constant 0 : index
    %493 = vector.load %arg6[%c0_168, %c0_169] : memref<128x384xf32, #tpu.memory_space<vmem>>, vector<128x384xf32>
    %cst_170 = arith.constant dense<0.000000e+00> : vector<8x384xf32>
    %494 = tpu.matmul %467, %493, %cst_170 {dimension_numbers = #tpu.dot_dimension_numbers<[1], [0], [0], [1], [0, 0, 1, 1], [], []>} : vector<8x128xf32>, vector<128x384xf32>, vector<8x384xf32> -> vector<8x384xf32>
    %495 = vector.broadcast %5 : vector<1x384xf32> to vector<8x384xf32>
    %496 = arith.addf %494, %495 : vector<8x384xf32>
    %497 = vector.extract_strided_slice %486 {offsets = [0, 0], sizes = [8, 256], strides = [1, 1]} : vector<8x384xf32> to vector<8x256xf32>
    %498 = vector.extract_strided_slice %492 {offsets = [0, 0], sizes = [8, 256], strides = [1, 1]} : vector<8x384xf32> to vector<8x256xf32>
    %499 = arith.addf %497, %498 : vector<8x256xf32>
    %500 = arith.negf %499 : vector<8x256xf32>
    %501 = math.exp %500 : vector<8x256xf32>
    %cst_171 = arith.constant 1.000000e+00 : f32
    %502 = vector.broadcast %cst_171 : f32 to vector<8x256xf32>
    %503 = arith.addf %502, %501 : vector<8x256xf32>
    %504 = arith.divf %502, %503 : vector<8x256xf32>
    %505 = vector.extract_strided_slice %504 {offsets = [0, 0], sizes = [8, 128], strides = [1, 1]} : vector<8x256xf32> to vector<8x128xf32>
    %506 = vector.extract_strided_slice %504 {offsets = [0, 128], sizes = [8, 128], strides = [1, 1]} : vector<8x256xf32> to vector<8x128xf32>
    %507 = vector.extract_strided_slice %486 {offsets = [0, 256], sizes = [8, 128], strides = [1, 1]} : vector<8x384xf32> to vector<8x128xf32>
    %508 = vector.extract_strided_slice %492 {offsets = [0, 256], sizes = [8, 128], strides = [1, 1]} : vector<8x384xf32> to vector<8x128xf32>
    %509 = arith.mulf %505, %508 : vector<8x128xf32>
    %510 = arith.addf %507, %509 : vector<8x128xf32>
    %511 = math.tanh %510 : vector<8x128xf32>
    %cst_172 = arith.constant 1.000000e+00 : f32
    %512 = vector.broadcast %cst_172 : f32 to vector<8x128xf32>
    %513 = arith.subf %512, %506 : vector<8x128xf32>
    %514 = arith.mulf %513, %511 : vector<8x128xf32>
    %515 = arith.mulf %506, %464 : vector<8x128xf32>
    %516 = arith.addf %514, %515 : vector<8x128xf32>
    %517 = vector.extract_strided_slice %488 {offsets = [0, 0], sizes = [8, 256], strides = [1, 1]} : vector<8x384xf32> to vector<8x256xf32>
    %518 = vector.extract_strided_slice %496 {offsets = [0, 0], sizes = [8, 256], strides = [1, 1]} : vector<8x384xf32> to vector<8x256xf32>
    %519 = arith.addf %517, %518 : vector<8x256xf32>
    %520 = arith.negf %519 : vector<8x256xf32>
    %521 = math.exp %520 : vector<8x256xf32>
    %cst_173 = arith.constant 1.000000e+00 : f32
    %522 = vector.broadcast %cst_173 : f32 to vector<8x256xf32>
    %523 = arith.addf %522, %521 : vector<8x256xf32>
    %524 = arith.divf %522, %523 : vector<8x256xf32>
    %525 = vector.extract_strided_slice %524 {offsets = [0, 0], sizes = [8, 128], strides = [1, 1]} : vector<8x256xf32> to vector<8x128xf32>
    %526 = vector.extract_strided_slice %524 {offsets = [0, 128], sizes = [8, 128], strides = [1, 1]} : vector<8x256xf32> to vector<8x128xf32>
    %527 = vector.extract_strided_slice %488 {offsets = [0, 256], sizes = [8, 128], strides = [1, 1]} : vector<8x384xf32> to vector<8x128xf32>
    %528 = vector.extract_strided_slice %496 {offsets = [0, 256], sizes = [8, 128], strides = [1, 1]} : vector<8x384xf32> to vector<8x128xf32>
    %529 = arith.mulf %525, %528 : vector<8x128xf32>
    %530 = arith.addf %527, %529 : vector<8x128xf32>
    %531 = math.tanh %530 : vector<8x128xf32>
    %cst_174 = arith.constant 1.000000e+00 : f32
    %532 = vector.broadcast %cst_174 : f32 to vector<8x128xf32>
    %533 = arith.subf %532, %526 : vector<8x128xf32>
    %534 = arith.mulf %533, %531 : vector<8x128xf32>
    %535 = arith.mulf %526, %467 : vector<8x128xf32>
    %536 = arith.addf %534, %535 : vector<8x128xf32>
    %537 = vector.broadcast %483 : i32 to vector<8x1xi32>
    %538 = arith.cmpi sgt, %3, %537 : vector<8x1xi32>
    %539 = vector.broadcast %484 : i32 to vector<8x1xi32>
    %540 = arith.cmpi sgt, %3, %539 : vector<8x1xi32>
    %541 = vector.shape_cast %538 : vector<8x1xi1> to vector<8x1xi1>
    %542 = vector.broadcast %541 : vector<8x1xi1> to vector<8x128xi1>
    %543 = arith.select %542, %516, %464 : vector<8x128xi1>, vector<8x128xf32>
    %544 = vector.shape_cast %540 : vector<8x1xi1> to vector<8x1xi1>
    %545 = vector.broadcast %544 : vector<8x1xi1> to vector<8x128xi1>
    %546 = arith.select %545, %536, %467 : vector<8x128xi1>, vector<8x128xf32>
    %cst_175 = arith.constant 0.000000e+00 : f32
    %547 = vector.shape_cast %538 : vector<8x1xi1> to vector<8x1xi1>
    %548 = vector.broadcast %547 : vector<8x1xi1> to vector<8x128xi1>
    %549 = vector.broadcast %cst_175 : f32 to vector<8x128xf32>
    %550 = arith.select %548, %543, %549 : vector<8x128xi1>, vector<8x128xf32>
    %c0_176 = arith.constant 0 : index
    %c6_177 = arith.constant 6 : index
    %c0_178 = arith.constant 0 : index
    %551 = vector.load %arg9[%c0_176, %c6_177, %c0_178] : memref<8x8x128xf32, #tpu.memory_space<vmem>>, vector<8x1x128xf32>
    %552 = vector.shape_cast %551 : vector<8x1x128xf32> to vector<8x128xf32>
    %553 = vector.shape_cast %550 : vector<8x128xf32> to vector<8x1x128xf32>
    tpu.vector_store %arg9[%c0_176, %c6_177, %c0_178], %553 {strides = array<i32>} : memref<8x8x128xf32, #tpu.memory_space<vmem>>, vector<8x1x128xf32>,
    %cst_179 = arith.constant 0.000000e+00 : f32
    %554 = vector.shape_cast %540 : vector<8x1xi1> to vector<8x1xi1>
    %555 = vector.broadcast %554 : vector<8x1xi1> to vector<8x128xi1>
    %556 = vector.broadcast %cst_179 : f32 to vector<8x128xf32>
    %557 = arith.select %555, %546, %556 : vector<8x128xi1>, vector<8x128xf32>
    %c0_180 = arith.constant 0 : index
    %c1_181 = arith.constant 1 : index
    %c0_182 = arith.constant 0 : index
    %558 = vector.load %arg10[%c0_180, %c1_181, %c0_182] : memref<8x8x128xf32, #tpu.memory_space<vmem>>, vector<8x1x128xf32>
    %559 = vector.shape_cast %558 : vector<8x1x128xf32> to vector<8x128xf32>
    %560 = vector.shape_cast %557 : vector<8x128xf32> to vector<8x1x128xf32>
    tpu.vector_store %arg10[%c0_180, %c1_181, %c0_182], %560 {strides = array<i32>} : memref<8x8x128xf32, #tpu.memory_space<vmem>>, vector<8x1x128xf32>,
    %c8_i32_183 = arith.constant 8 : i32
    %561 = arith.muli %arg1, %c8_i32_183 : i32
    %c7_i32 = arith.constant 7 : i32
    %562 = arith.addi %561, %c7_i32 : i32
    %c15_i32_184 = arith.constant 15 : i32
    %563 = arith.subi %c15_i32_184, %562 : i32
    %c7_185 = arith.constant 7 : index
    %c0_186 = arith.constant 0 : index
    %c0_187 = arith.constant 0 : index
    %564 = vector.load %arg3[%c7_185, %c0_186, %c0_187] : memref<8x8x384xf32, #tpu.memory_space<vmem>>, vector<1x8x384xf32>
    %565 = vector.shape_cast %564 : vector<1x8x384xf32> to vector<8x384xf32>
    %c0_188 = arith.constant 0 : index
    %c0_189 = arith.constant 0 : index
    %c0_190 = arith.constant 0 : index
    %566 = vector.load %arg4[%c0_188, %c0_189, %c0_190] : memref<8x8x384xf32, #tpu.memory_space<vmem>>, vector<1x8x384xf32>
    %567 = vector.shape_cast %566 : vector<1x8x384xf32> to vector<8x384xf32>
    %c0_191 = arith.constant 0 : index
    %c0_192 = arith.constant 0 : index
    %568 = vector.load %arg5[%c0_191, %c0_192] : memref<128x384xf32, #tpu.memory_space<vmem>>, vector<128x384xf32>
    %cst_193 = arith.constant dense<0.000000e+00> : vector<8x384xf32>
    %569 = tpu.matmul %543, %568, %cst_193 {dimension_numbers = #tpu.dot_dimension_numbers<[1], [0], [0], [1], [0, 0, 1, 1], [], []>} : vector<8x128xf32>, vector<128x384xf32>, vector<8x384xf32> -> vector<8x384xf32>
    %570 = vector.broadcast %4 : vector<1x384xf32> to vector<8x384xf32>
    %571 = arith.addf %569, %570 : vector<8x384xf32>
    %c0_194 = arith.constant 0 : index
    %c0_195 = arith.constant 0 : index
    %572 = vector.load %arg6[%c0_194, %c0_195] : memref<128x384xf32, #tpu.memory_space<vmem>>, vector<128x384xf32>
    %cst_196 = arith.constant dense<0.000000e+00> : vector<8x384xf32>
    %573 = tpu.matmul %546, %572, %cst_196 {dimension_numbers = #tpu.dot_dimension_numbers<[1], [0], [0], [1], [0, 0, 1, 1], [], []>} : vector<8x128xf32>, vector<128x384xf32>, vector<8x384xf32> -> vector<8x384xf32>
    %574 = vector.broadcast %5 : vector<1x384xf32> to vector<8x384xf32>
    %575 = arith.addf %573, %574 : vector<8x384xf32>
    %576 = vector.extract_strided_slice %565 {offsets = [0, 0], sizes = [8, 256], strides = [1, 1]} : vector<8x384xf32> to vector<8x256xf32>
    %577 = vector.extract_strided_slice %571 {offsets = [0, 0], sizes = [8, 256], strides = [1, 1]} : vector<8x384xf32> to vector<8x256xf32>
    %578 = arith.addf %576, %577 : vector<8x256xf32>
    %579 = arith.negf %578 : vector<8x256xf32>
    %580 = math.exp %579 : vector<8x256xf32>
    %cst_197 = arith.constant 1.000000e+00 : f32
    %581 = vector.broadcast %cst_197 : f32 to vector<8x256xf32>
    %582 = arith.addf %581, %580 : vector<8x256xf32>
    %583 = arith.divf %581, %582 : vector<8x256xf32>
    %584 = vector.extract_strided_slice %583 {offsets = [0, 0], sizes = [8, 128], strides = [1, 1]} : vector<8x256xf32> to vector<8x128xf32>
    %585 = vector.extract_strided_slice %583 {offsets = [0, 128], sizes = [8, 128], strides = [1, 1]} : vector<8x256xf32> to vector<8x128xf32>
    %586 = vector.extract_strided_slice %565 {offsets = [0, 256], sizes = [8, 128], strides = [1, 1]} : vector<8x384xf32> to vector<8x128xf32>
    %587 = vector.extract_strided_slice %571 {offsets = [0, 256], sizes = [8, 128], strides = [1, 1]} : vector<8x384xf32> to vector<8x128xf32>
    %588 = arith.mulf %584, %587 : vector<8x128xf32>
    %589 = arith.addf %586, %588 : vector<8x128xf32>
    %590 = math.tanh %589 : vector<8x128xf32>
    %cst_198 = arith.constant 1.000000e+00 : f32
    %591 = vector.broadcast %cst_198 : f32 to vector<8x128xf32>
    %592 = arith.subf %591, %585 : vector<8x128xf32>
    %593 = arith.mulf %592, %590 : vector<8x128xf32>
    %594 = arith.mulf %585, %543 : vector<8x128xf32>
    %595 = arith.addf %593, %594 : vector<8x128xf32>
    %596 = vector.extract_strided_slice %567 {offsets = [0, 0], sizes = [8, 256], strides = [1, 1]} : vector<8x384xf32> to vector<8x256xf32>
    %597 = vector.extract_strided_slice %575 {offsets = [0, 0], sizes = [8, 256], strides = [1, 1]} : vector<8x384xf32> to vector<8x256xf32>
    %598 = arith.addf %596, %597 : vector<8x256xf32>
    %599 = arith.negf %598 : vector<8x256xf32>
    %600 = math.exp %599 : vector<8x256xf32>
    %cst_199 = arith.constant 1.000000e+00 : f32
    %601 = vector.broadcast %cst_199 : f32 to vector<8x256xf32>
    %602 = arith.addf %601, %600 : vector<8x256xf32>
    %603 = arith.divf %601, %602 : vector<8x256xf32>
    %604 = vector.extract_strided_slice %603 {offsets = [0, 0], sizes = [8, 128], strides = [1, 1]} : vector<8x256xf32> to vector<8x128xf32>
    %605 = vector.extract_strided_slice %603 {offsets = [0, 128], sizes = [8, 128], strides = [1, 1]} : vector<8x256xf32> to vector<8x128xf32>
    %606 = vector.extract_strided_slice %567 {offsets = [0, 256], sizes = [8, 128], strides = [1, 1]} : vector<8x384xf32> to vector<8x128xf32>
    %607 = vector.extract_strided_slice %575 {offsets = [0, 256], sizes = [8, 128], strides = [1, 1]} : vector<8x384xf32> to vector<8x128xf32>
    %608 = arith.mulf %604, %607 : vector<8x128xf32>
    %609 = arith.addf %606, %608 : vector<8x128xf32>
    %610 = math.tanh %609 : vector<8x128xf32>
    %cst_200 = arith.constant 1.000000e+00 : f32
    %611 = vector.broadcast %cst_200 : f32 to vector<8x128xf32>
    %612 = arith.subf %611, %605 : vector<8x128xf32>
    %613 = arith.mulf %612, %610 : vector<8x128xf32>
    %614 = arith.mulf %605, %546 : vector<8x128xf32>
    %615 = arith.addf %613, %614 : vector<8x128xf32>
    %616 = vector.broadcast %562 : i32 to vector<8x1xi32>
    %617 = arith.cmpi sgt, %3, %616 : vector<8x1xi32>
    %618 = vector.broadcast %563 : i32 to vector<8x1xi32>
    %619 = arith.cmpi sgt, %3, %618 : vector<8x1xi32>
    %620 = vector.shape_cast %617 : vector<8x1xi1> to vector<8x1xi1>
    %621 = vector.broadcast %620 : vector<8x1xi1> to vector<8x128xi1>
    %622 = arith.select %621, %595, %543 : vector<8x128xi1>, vector<8x128xf32>
    %623 = vector.shape_cast %619 : vector<8x1xi1> to vector<8x1xi1>
    %624 = vector.broadcast %623 : vector<8x1xi1> to vector<8x128xi1>
    %625 = arith.select %624, %615, %546 : vector<8x128xi1>, vector<8x128xf32>
    %cst_201 = arith.constant 0.000000e+00 : f32
    %626 = vector.shape_cast %617 : vector<8x1xi1> to vector<8x1xi1>
    %627 = vector.broadcast %626 : vector<8x1xi1> to vector<8x128xi1>
    %628 = vector.broadcast %cst_201 : f32 to vector<8x128xf32>
    %629 = arith.select %627, %622, %628 : vector<8x128xi1>, vector<8x128xf32>
    %c0_202 = arith.constant 0 : index
    %c7_203 = arith.constant 7 : index
    %c0_204 = arith.constant 0 : index
    %630 = vector.load %arg9[%c0_202, %c7_203, %c0_204] : memref<8x8x128xf32, #tpu.memory_space<vmem>>, vector<8x1x128xf32>
    %631 = vector.shape_cast %630 : vector<8x1x128xf32> to vector<8x128xf32>
    %632 = vector.shape_cast %629 : vector<8x128xf32> to vector<8x1x128xf32>
    tpu.vector_store %arg9[%c0_202, %c7_203, %c0_204], %632 {strides = array<i32>} : memref<8x8x128xf32, #tpu.memory_space<vmem>>, vector<8x1x128xf32>,
    %cst_205 = arith.constant 0.000000e+00 : f32
    %633 = vector.shape_cast %619 : vector<8x1xi1> to vector<8x1xi1>
    %634 = vector.broadcast %633 : vector<8x1xi1> to vector<8x128xi1>
    %635 = vector.broadcast %cst_205 : f32 to vector<8x128xf32>
    %636 = arith.select %634, %625, %635 : vector<8x128xi1>, vector<8x128xf32>
    %c0_206 = arith.constant 0 : index
    %c0_207 = arith.constant 0 : index
    %c0_208 = arith.constant 0 : index
    %637 = vector.load %arg10[%c0_206, %c0_207, %c0_208] : memref<8x8x128xf32, #tpu.memory_space<vmem>>, vector<8x1x128xf32>
    %638 = vector.shape_cast %637 : vector<8x1x128xf32> to vector<8x128xf32>
    %639 = vector.shape_cast %636 : vector<8x128xf32> to vector<8x1x128xf32>
    tpu.vector_store %arg10[%c0_206, %c0_207, %c0_208], %639 {strides = array<i32>} : memref<8x8x128xf32, #tpu.memory_space<vmem>>, vector<8x1x128xf32>,
    %c0_209 = arith.constant 0 : index
    %c0_210 = arith.constant 0 : index
    %640 = vector.load %arg13[%c0_209, %c0_210] : memref<8x128xf32, #tpu.memory_space<vmem>>, vector<8x128xf32>
    tpu.vector_store %arg13[%c0_209, %c0_210], %622 {strides = array<i32>} : memref<8x128xf32, #tpu.memory_space<vmem>>, vector<8x128xf32>,
    %c0_211 = arith.constant 0 : index
    %c0_212 = arith.constant 0 : index
    %641 = vector.load %arg14[%c0_211, %c0_212] : memref<8x128xf32, #tpu.memory_space<vmem>>, vector<8x128xf32>
    tpu.vector_store %arg14[%c0_211, %c0_212], %625 {strides = array<i32>} : memref<8x128xf32, #tpu.memory_space<vmem>>, vector<8x128xf32>,
    %c1_i32_213 = arith.constant 1 : i32
    %642 = arith.cmpi eq, %arg1, %c1_i32_213 : i32
    %643 = arith.extui %642 : i1 to i32
    %c0_i32_214 = arith.constant 0 : i32
    %644 = arith.cmpi ne, %643, %c0_i32_214 : i32
    scf.if %644 {
      %c0_215 = arith.constant 0 : index
      %c0_216 = arith.constant 0 : index
      %645 = vector.load %arg11[%c0_215, %c0_216] : memref<8x128xf32, #tpu.memory_space<vmem>>, vector<8x128xf32>
      tpu.vector_store %arg11[%c0_215, %c0_216], %622 {strides = array<i32>} : memref<8x128xf32, #tpu.memory_space<vmem>>, vector<8x128xf32>,
      %c0_217 = arith.constant 0 : index
      %c0_218 = arith.constant 0 : index
      %646 = vector.load %arg12[%c0_217, %c0_218] : memref<8x128xf32, #tpu.memory_space<vmem>>, vector<8x128xf32>
      tpu.vector_store %arg12[%c0_217, %c0_218], %625 {strides = array<i32>} : memref<8x128xf32, #tpu.memory_space<vmem>>, vector<8x128xf32>,
    } else {
    }
    return
  }
  func.func @transform_0(%arg0: i32, %arg1: i32) -> (i32, i32) {
    %c0_i32 = arith.constant 0 : i32
    %c0_i32_0 = arith.constant 0 : i32
    return %arg0, %c0_i32 : i32, i32
  }
  func.func @transform_1(%arg0: i32, %arg1: i32) -> (i32, i32, i32) {
    %c0_i32 = arith.constant 0 : i32
    %c0_i32_0 = arith.constant 0 : i32
    return %arg1, %arg0, %c0_i32 : i32, i32, i32
  }
  func.func @transform_2(%arg0: i32, %arg1: i32) -> (i32, i32, i32) {
    %c1_i32 = arith.constant 1 : i32
    %0 = arith.subi %c1_i32, %arg1 : i32
    %c1_i32_0 = arith.constant 1 : i32
    %c0_i32 = arith.constant 0 : i32
    return %0, %arg0, %c1_i32_0 : i32, i32, i32
  }
  func.func @transform_3(%arg0: i32, %arg1: i32) -> (i32, i32) {
    %c0_i32 = arith.constant 0 : i32
    %c0_i32_0 = arith.constant 0 : i32
    %c0_i32_1 = arith.constant 0 : i32
    return %c0_i32, %c0_i32_0 : i32, i32
  }
  func.func @transform_4(%arg0: i32, %arg1: i32) -> (i32, i32) {
    %c0_i32 = arith.constant 0 : i32
    %c0_i32_0 = arith.constant 0 : i32
    %c0_i32_1 = arith.constant 0 : i32
    return %c0_i32, %c0_i32_0 : i32, i32
  }
  func.func @transform_5(%arg0: i32, %arg1: i32) -> (i32, i32) {
    %c0_i32 = arith.constant 0 : i32
    %c0_i32_0 = arith.constant 0 : i32
    %c0_i32_1 = arith.constant 0 : i32
    return %c0_i32, %c0_i32_0 : i32, i32
  }
  func.func @transform_6(%arg0: i32, %arg1: i32) -> (i32, i32) {
    %c0_i32 = arith.constant 0 : i32
    %c0_i32_0 = arith.constant 0 : i32
    %c0_i32_1 = arith.constant 0 : i32
    return %c0_i32, %c0_i32_0 : i32, i32
  }
  func.func @transform_7(%arg0: i32, %arg1: i32) -> (i32, i32, i32) {
    %c0_i32 = arith.constant 0 : i32
    %c0_i32_0 = arith.constant 0 : i32
    return %arg0, %arg1, %c0_i32 : i32, i32, i32
  }
  func.func @transform_8(%arg0: i32, %arg1: i32) -> (i32, i32, i32) {
    %c1_i32 = arith.constant 1 : i32
    %0 = arith.subi %c1_i32, %arg1 : i32
    %c0_i32 = arith.constant 0 : i32
    %c0_i32_0 = arith.constant 0 : i32
    return %arg0, %0, %c0_i32 : i32, i32, i32
  }
  func.func @transform_9(%arg0: i32, %arg1: i32) -> (i32, i32) {
    %c0_i32 = arith.constant 0 : i32
    %c0_i32_0 = arith.constant 0 : i32
    return %arg0, %c0_i32 : i32, i32
  }
  func.func @transform_10(%arg0: i32, %arg1: i32) -> (i32, i32) {
    %c0_i32 = arith.constant 0 : i32
    %c0_i32_0 = arith.constant 0 : i32
    return %arg0, %c0_i32 : i32, i32
  }
}

</mosaic_0001>

<bundles_post_ra>
// kernel: tpu_custom_call.1
= control target key start
LH: loop header
LB: loop body
LE: loop exit
PB: predicated region body
PF: predicated region fallthrough
CT: control target
= control target key end

     0   :  { %s10037_s0 = inlined_call_operand.vmem [shape: s32[8,1], index: 0, kind: input, shape index: {}]   ;;  %s10038_s1 = inlined_call_operand.hbm [shape: f32[16,8,768], index: 1, kind: input, shape index: {}]   ;;  %s10039_s2 = inlined_call_operand.hbm [shape: f32[16,8,768], index: 2, kind: input, shape index: {}]   ;;  %s10040_s3 = inlined_call_operand.hbm [shape: f32[128,384], index: 3, kind: input, shape index: {}]   ;;  %s10041_s4 = inlined_call_operand.hbm [shape: f32[128,384], index: 4, kind: input, shape index: {}]   ;;  %s10042_s5 = inlined_call_operand.vmem [shape: f32[1,384], index: 5, kind: input, shape index: {}]   ;;  %s10043_s6 = inlined_call_operand.vmem [shape: f32[1,384], index: 6, kind: input, shape index: {}]   ;;  %s10044_s7 = inlined_call_operand.hbm [shape: f32[8,16,128], index: 7, kind: output, shape index: {0}]   ;;  %s10045_s8 = inlined_call_operand.hbm [shape: f32[8,16,128], index: 8, kind: output, shape index: {1}]   ;;  %s10046_s9 = inlined_call_operand.hbm [shape: f32[8,128], index: 9, kind: output, shape index: {2}]   ;;  %s10047_s10 = inlined_call_operand.hbm [shape: f32[8,128], index: 10, kind: output, shape index: {3}]  }
   0x1   :  { %10096 = sst [smem:[#allocation40_spill]] %s10037_s0 }
   0x2   :  { %10097 = sst [smem:[#allocation41_spill]] %s10038_s1 }
   0x3   :  { %10098 = sst [smem:[#allocation42_spill]] %s10040_s3 }
   0x4   :  { %10099 = sst [smem:[#allocation43_spill]] %s10041_s4 }
   0x5   :  { %10100 = sst [smem:[#allocation44_spill]] %s10042_s5 }
   0x6   :  { %10101 = sst [smem:[#allocation45_spill]] %s10043_s6 }
   0x7   :  { %10102 = sst [smem:[#allocation46_spill]] %s10044_s7 }
   0x8   :  { %10103 = sst [smem:[#allocation47_spill]] %s10045_s8 }
   0x9   :  { %10104 = sst [smem:[#allocation48_spill]] %s10046_s9 }
   0xa   :  { %10105 = sst [smem:[#allocation49_spill]] %s10047_s10 }
   0xb   :  { %16 = vsyncpa [#allocation5], 0 }
   0xc   :  { %18 = vsyncpa [#allocation5 + $0x1], 0 }
   0xd   :  { %19 = vsyncpa [#allocation8], 0 }
   0xe   :  { %21 = vsyncpa [#allocation8 + $0x1], 0 }
   0xf   :  { %22 = vsyncpa [#allocation11], 0 }
  0x10   :  { %23 = vsyncpa [#allocation6], 0 }
  0x11   :  { %25 = vsyncpa [#allocation6 + $0x1], 0 }
  0x12   :  { %26 = vsyncpa [#allocation14], 0 }
  0x13   :  { %28 = vsyncpa [#allocation14 + $0x1], 0 }
  0x14   :  { %29 = vsyncpa [#allocation17], 0  ;;  %s8088_s13 = smov 0   ;;  %s8090_s14 = smov 0  }
  0x15   :  { %s8092_s15 = smov 0   ;;  %s8094_s16 = smov 0  }
  0x16   :  { %s8096_s17 = smov 0   ;;  %s8098_s18 = smov 0  }
  0x17   :  { %s8100_s19 = smov 0   ;;  %s8102_s20 = smov 0  }
  0x18   :  { %s8104_s21 = smov 0  }
  0x19 LB: > { %10106 = sst [smem:[#allocation26_spill]] %s7991_s16  ;;  %s8132_s22 = sadd.s32 4294967295, %s8011_s21   ;;  %s8011_s21 = sphi %s8104_s21, %s35_s21   ;;  %s8007_s20 = sphi %s8102_s20, %s10217_s20   ;;  %s8003_s19 = sphi %s8100_s19, %s10216_s19   ;;  %s7999_s18 = sphi %s8098_s18, %s10215_s18   ;;  %s7995_s17 = sphi %s8096_s17, %s10214_s17   ;;  %s7991_s16 = sphi %s8094_s16, %s10213_s16   ;;  %s7987_s15 = sphi %s8092_s15, %s10212_s15   ;;  %s7983_s14 = sphi %s8090_s14, %s10211_s14   ;;  %s7979_s13 = sphi %s8088_s13, %s10210_s13  }
  0x1a   : > { %10107 = sst [smem:[#allocation27_spill]] %s7999_s18  ;;  %s10052_s23 = sadd.s32 4294967294, %s8011_s21  }
  0x1b   : > { %10108 = sst [smem:[#allocation28_spill]] %s8003_s19  ;;  %p10048_p0 = scmp.eq.s32.totalorder %s8011_s21, 0 }
  0x1c   : > { %p95_p1 = scmp.ne.s32.totalorder %s7995_s17, %s7991_s16  ;;  %p10049_p2 = scmp.eq.s32.totalorder %s8132_s22, 0 }
  0x1d   : > { %p119_p3 = scmp.ne.s32.totalorder %s7987_s15, %s7983_s14  ;;  %p125_p4 = scmp.ne.s32.totalorder %s7983_s14, %s7979_s13 }
  0x1e   : > { %p10050_p5 = scmp.eq.s32.totalorder %s8132_s22, 1  ;;  %p8145_p6 = por %p10049_p2, %p95_p1 }
  0x1f   : > { %p8151_p7 = por %p119_p3, %p10048_p0  ;;  %p8157_p8 = por %p125_p4, %p10049_p2 }
  0x20   : > { %s10109_s24 = scalar_select %p8145_p6, 1, 0 }
  0x21   : > { %s10111_s26 = scalar_select %p8157_p8, 1, 0 }
  0x22   : > { %p241_p9 = scmp.eq.s32.totalorder %s10052_s23, 1  ;;  %p8165_p10 = por %p10050_p5, %p119_p3 }
  0x23   : > { %p5481_p11 = scmp.ge.s32.totalorder %s8011_s21, 1  ;;  %p330_p0 = scmp.lt.s32.totalorder %s8011_s21, 3 }
  0x24   : > { %s10112_s27 = scalar_select %p8165_p10, 1, 0 }
  0x25   : > { %p8170_p12 = por %p241_p9, %p95_p1  ;;  %p8174_p13 = por %p241_p9, %p125_p4 }
  0x26   : > { %10113 = sst [smem:[#allocation29_spill]] %s10112_s27  ;;  %p8179_p2 = pnand %p5481_p11, %p330_p0 }
  0x27   : > { %s10114_s28 = scalar_select %p8170_p12, 1, 0 }
  0x28   : > { %s10116_s29 = scalar_select %p8174_p13, 1, 0 }
  0x29   : > { %10115 = sst [smem:[#allocation30_spill]] %s10114_s28  ;;  %s8013_s11 = smov [#allocation9]  }
  0x2a   : > { %10117 = sst [smem:[#allocation31_spill]] %s10116_s29  ;;  %s349_s12 = sshll.u32 %s8013_s11, 4  ;;  %s8183_s12 = int_to_ptr.vmem [resolvable:$true] %s349_s12 }
  0x2b   : > { %s10118_s30 = scalar_select %p8179_p2, 1, 0 }
  0x2c   : > { %p7403_p3 = pneg %p8179_p2  ;;  %p10059_p5 = scmp.lt.s32.totalorder %s8011_s21, 2 }
  0x2d   : > { %p10119_p10 = scmp.eq.s32.totalorder %s8132_s22, 0  ;;  %s8014_s23 = smov [#allocation10]  }
  0x2e   : > { %s362_s29 = sshll.u32 %s8014_s23, 4  ;;  %p8199_p0 = pnand %p10059_p5, %p8151_p7  ;;  %s8203_s29 = int_to_ptr.vmem [resolvable:$true] %s362_s29 }
  0x2f   : > { %p8191_p12 = pnand %p7403_p3, %p10119_p10  ;;  %s10122_s3 = sld [smem:[#allocation42_spill]] }
  0x31   : > { %p7686_p9 = pneg %p8191_p12 }
  0x35   : > { %s7684_s10 = scalar_lea.hbm %s10122_s3, 6144 }
  0x36   : > { %p7685_p4 = scmp.ne.s32.totalorder %s10122_s3, %s7684_s10  ;;  %p7691_p7 = scmp.lt.u32.totalorder %s7684_s10, %s10122_s3 }
  0x38   : > { %p7687_p10 = pnand %p7686_p9, %p7685_p4 }
  0x3a   : > { %p7688_p11 = pneg %p7687_p10 }
  0x3c   : > { %p7693_p3 = pnand %p7691_p7, %p7688_p11 }
  0x3e   : > { %7696 = shalt.err (!%p7693_p3)
}
  0x3f   : > { %s7697_s16 = scalar_lea.vmem %s8183_s12, 6144  ;;  %p7705_p8 = scmp.lt.s32.totalorder %s8183_s12, %s8183_s12 }
  0x40   : > { %p7698_p1 = scmp.ne.s32.totalorder %s8183_s12, %s7697_s16  ;;  %p7706_p4 = scmp.lt.s32.totalorder %s7697_s16, %s7697_s16 }
  0x42   : > { %p7700_p5 = pnand %p7698_p1, %p7686_p9  ;;  %p7707_p10 = por %p7706_p4, %p7705_p8 }
  0x44   : > { %p7701_p13 = pneg %p7700_p5 }
  0x46   : > { %p7708_p6 = pnand %p7707_p10, %p7701_p13 }
  0x48   : > { %7711 = shalt.err (!%p7708_p6)
}
  0x49   : > { %s10065_s7 = smov 384   ;;  %s10067_s9 = smov 24  }
  0x4a   : > { %7406 = dma.hbm_to_vmem [thread:$0]  (!%p8191_p12), %s10122_s3, 6144, %s8183_s12, [#allocation8], %s10065_s7, %s10065_s7, %s10067_s9  }
  0x4b   : > { %s10123_s4 = sld [smem:[#allocation43_spill]] }
  0x51   : > { %s7712_s16 = scalar_lea.hbm %s10123_s4, 6144 }
  0x52   : > { %p7713_p5 = scmp.ne.s32.totalorder %s10123_s4, %s7712_s16  ;;  %p7719_p13 = scmp.lt.u32.totalorder %s7712_s16, %s10123_s4 }
  0x54   : > { %p7715_p6 = pnand %p7713_p5, %p7686_p9 }
  0x56   : > { %p7716_p8 = pneg %p7715_p6 }
  0x58   : > { %p7721_p1 = pnand %p7719_p13, %p7716_p8 }
  0x5a   : > { %7724 = shalt.err (!%p7721_p1)
}
  0x5b   : > { %s7725_s12 = scalar_lea.vmem %s8203_s29, 6144  ;;  %p7733_p4 = scmp.lt.s32.totalorder %s8203_s29, %s8203_s29 }
  0x5c   : > { %p7726_p11 = scmp.ne.s32.totalorder %s8203_s29, %s7725_s12  ;;  %p7734_p10 = scmp.lt.s32.totalorder %s7725_s12, %s7725_s12 }
  0x5e   : > { %p7728_p7 = pnand %p7726_p11, %p7686_p9  ;;  %p7735_p5 = por %p7734_p10, %p7733_p4 }
  0x60   : > { %p7729_p3 = pneg %p7728_p7 }
  0x62   : > { %p7736_p6 = pnand %p7735_p5, %p7729_p3 }
  0x64   : > { %7739 = shalt.err (!%p7736_p6)
}
  0x65   : > { %7409 = dma.hbm_to_vmem [thread:$0]  (!%p8191_p12), %s10123_s4, 6144, %s8203_s29, [#allocation11], %s10065_s7, %s10065_s7, %s10067_s9  }
  0x66   : > { %s44_s8 = sadd.s32 1, %s8007_s20  ;;  %s82_s27 = sadd.s32 1, %s7999_s18 }
  0x67   : > { %p45_p9 = scmp.ge.s32.totalorder %s44_s8, 2  ;;  %p89_p8 = scmp.ne.s32.totalorder %s7999_s18, %s7995_s17 }
  0x68   : > { %s382_s13 = sand.u32 1, %s7999_s18   ;;  %s7375_s10 = smul.u32 6144, %s8007_s20 }
  0x69   : > { %s10219_s8 = smov (%p45_p9, %s44_s8), 0  ;;  %p10124_p13 = scmp.eq.s32.totalorder %s8011_s21, 0 }
  0x6a   : > { %p10125_p11 = scmp.eq.s32.totalorder %s8132_s22, 1  ;;  %s77_s23 = ssub.s32 %s8007_s20, %s10219_s8 }
  0x6b   : > { %p91_p1 = por %p10124_p13, %p89_p8  ;;  %p80_p3 = scmp.eq.s32.totalorder %s77_s23, 0 }
  0x6c   : > { %p8275_p7 = por %p10125_p11, %p89_p8  ;;  %s7374_s29 = smul.u32 192, %s382_s13 }
  0x6d   : > { %s10128_s1 = sld [smem:[#allocation41_spill]]  ;;  %p10129_p12 = scmp.lt.s32.totalorder %s8011_s21, 2 }
  0x6e   : > { %s10126_s11 = scalar_select %p8275_p7, 1, 0 }
  0x6f   : > { %p8288_p4 = pnand %p10129_p12, %p91_p1  ;;  %s386_s23 = scalar_lea.vmem [#allocation4], %s7374_s29 }
  0x70   : > { %10127 = sst [smem:[#allocation32_spill]] %s10126_s11  ;;  %s396_s7 = sshll.u32 %s386_s23, 4  ;;  %s8295_s7 = int_to_ptr.vmem [resolvable:$true] %s396_s7 }
  0x71   : > { %s8293_s6 = scalar_select %p80_p3, %s7999_s18, %s82_s27  }
  0x72   : > { %s105_s25 = ssub.s32 1, %s8007_s20  ;;  %p7742_p5 = pneg %p8288_p4 }
  0x73   : > { %s8284_s12 = scalar_lea.hbm %s10128_s1, %s7375_s10  ;;  %10131 = sst [smem:[#allocation33_spill]] %s8293_s6 }
  0x74   : > { %s8298_s10 = scalar_lea.sflag [#allocation5], %s382_s13  ;;  %s7740_s16 = scalar_lea.hbm %s8284_s12, 3072 }
  0x75   : > { %p7741_p10 = scmp.ne.s32.totalorder %s8284_s12, %s7740_s16  ;;  %s7745_s27 = scalar_lea.hbm %s10128_s1, 12288 }
  0x76   : > { %p7746_p8 = scmp.lt.u32.totalorder %s8284_s12, %s10128_s1  ;;  %p7747_p13 = scmp.lt.u32.totalorder %s7745_s27, %s7740_s16 }
  0x77   : > { %p7743_p6 = pnand %p7742_p5, %p7741_p10  ;;  %p7749_p11 = scmp.lt.u32.totalorder %s7740_s16, %s8284_s12 }
  0x78   : > { %p7748_p1 = por %p7747_p13, %p7746_p8 }
  0x79   : > { %p7744_p9 = pneg %p7743_p6 }
  0x7a   : > { %p7750_p3 = por %p7749_p11, %p7748_p1 }
  0x7c   : > { %p7751_p12 = pnand %p7750_p3, %p7744_p9 }
  0x7e   : > { %7754 = shalt.err (!%p7751_p12)
}
  0x7f   : > { %s7755_s13 = scalar_lea.vmem %s8295_s7, 3072  ;;  %s8017_s3 = smov [#allocation4]  }
  0x80   : > { %p7756_p10 = scmp.ne.s32.totalorder %s8295_s7, %s7755_s13  ;;  %s7760_s9 = sshll.u32 %s8017_s3, 4  ;;  %s7761_s9 = int_to_ptr.vmem [resolvable:$false] %s7760_s9 }
  0x81   : > { %s7762_s4 = scalar_lea.vmem %s7761_s9, 6144  ;;  %p7763_p2 = scmp.lt.s32.totalorder %s8295_s7, %s7761_s9 }
  0x82   : > { %p7758_p6 = pnand %p7756_p10, %p7742_p5  ;;  %p7764_p8 = scmp.lt.s32.totalorder %s7762_s4, %s7755_s13 }
  0x84   : > { %p7759_p7 = pneg %p7758_p6  ;;  %p7765_p13 = por %p7764_p8, %p7763_p2 }
  0x86   : > { %p7766_p1 = pnand %p7765_p13, %p7759_p7 }
  0x88   : > { %7769 = shalt.err (!%p7766_p1)
}
  0x89   : > { %s8018_s23 = smov 768   ;;  %s10132_s16 = smov 24  }
  0x8a   : > { %s10133_s27 = smov 384   ;;  %s106_s29 = ssub.s32 1, %s10219_s8 }
  0x8b   : > { %7413 = dma.hbm_to_vmem [thread:$0]  (!%p8288_p4), %s8284_s12, 3072, %s8295_s7, %s8298_s10, %s8018_s23, %s10133_s27, %s10132_s16  }
  0x8c   : > { %s107_s13 = ssub.s32 %s105_s25, %s106_s29  ;;  %s112_s3 = sadd.s32 1, %s7987_s15 }
  0x8d   : > { %p110_p2 = scmp.eq.s32.totalorder %s107_s13, 0  ;;  %s406_s5 = sand.u32 1, %s8011_s21  }
  0x8e   : > { %s408_s9 = sand.u32 1, %s7987_s15   ;;  %s5489_s4 = smul.u32 6144, %s105_s25 }
  0x8f   : > { %s8338_s1 = scalar_select %p110_p2, %s7987_s15, %s112_s3  }
  0x90   : > { %s7376_s6 = smul.u32 192, %s408_s9  ;;  %s5342_s0 = scalar_lea.hbm %s10039_s2, %s5489_s4 }
  0x91   : > { %s8343_s19 = scalar_lea.hbm %s5342_s0, 384  ;;  %s8347_s10 = scalar_lea.sflag [#allocation8], %s406_s5 }
  0x92   : > { %s410_s7 = scalar_lea.vmem [#allocation7], %s7376_s6  ;;  %s7800_s29 = scalar_lea.hbm %s5342_s0, 3456 }
  0x93   : > { %s422_s12 = sshll.u32 %s410_s7, 4  ;;  %p7771_p7 = scmp.ne.s32.totalorder %s8343_s19, %s7800_s29  ;;  %s8345_s12 = int_to_ptr.vmem [resolvable:$true] %s422_s12 }
  0x94   : > { %p7772_p4 = pneg %p8199_p0  ;;  %s7775_s25 = scalar_lea.hbm %s10039_s2, 12288 }
  0x95   : > { %p7776_p11 = scmp.lt.u32.totalorder %s8343_s19, %s10039_s2  ;;  %p7777_p3 = scmp.lt.u32.totalorder %s7775_s25, %s7800_s29 }
  0x96   : > { %p7773_p5 = pnand %p7772_p4, %p7771_p7  ;;  %p7779_p10 = scmp.lt.u32.totalorder %s7800_s29, %s8343_s19 }
  0x97   : > { %p7778_p12 = por %p7777_p3, %p7776_p11 }
  0x98   : > { %p7774_p9 = pneg %p7773_p5 }
  0x99   : > { %p7780_p6 = por %p7779_p10, %p7778_p12 }
  0x9b   : > { %p7781_p8 = pnand %p7780_p6, %p7774_p9 }
  0x9d   : > { %7784 = shalt.err (!%p7781_p8)
}
  0x9e   : > { %s7785_s0 = scalar_lea.vmem %s8345_s12, 3072  ;;  %s8019_s6 = smov [#allocation7]  }
  0x9f   : > { %p7786_p13 = scmp.ne.s32.totalorder %s8345_s12, %s7785_s0  ;;  %s7790_s5 = sshll.u32 %s8019_s6, 4  ;;  %s7791_s5 = int_to_ptr.vmem [resolvable:$false] %s7790_s5 }
  0xa0   : > { %s7792_s9 = scalar_lea.vmem %s7791_s5, 6144  ;;  %p7793_p7 = scmp.lt.s32.totalorder %s8345_s12, %s7791_s5 }
  0xa1   : > { %p7788_p1 = pnand %p7786_p13, %p7772_p4  ;;  %p7794_p5 = scmp.lt.s32.totalorder %s7792_s9, %s7785_s0 }
  0xa3   : > { %p7789_p2 = pneg %p7788_p1  ;;  %p7795_p11 = por %p7794_p5, %p7793_p7 }
  0xa5   : > { %p7796_p3 = pnand %p7795_p11, %p7789_p2 }
  0xa7   : > { %7799 = shalt.err (!%p7796_p3)
}
  0xa8   : > { %7416 = dma.hbm_to_vmem [thread:$0]  (!%p8199_p0), %s8343_s19, 3072, %s8345_s12, %s8347_s10, %s8018_s23, %s10133_s27, %s10132_s16  }
  0xa9   : > { %p10134_p4 = scmp.ne.s32.totalorder %s10118_s30, 0 }
  0xab   : > { %434 = sbr.rel (%p10134_p4) target bundleno = 2505 (0x9c9), region = 48 }
  0xb2   : > { %s8380_s4 = sand.u32 1, %s7995_s17   ;;  %p10135_p9 = scmp.ne.s32.totalorder %s10109_s24, 0 }
  0xb3   : > { %s7377_s7 = smul.u32 192, %s8380_s4  ;;  %s437_s29 = scalar_lea.sflag [#allocation5], %s8380_s4 }
  0xb5   : > { %s8384_s18 = scalar_lea.vmem [#allocation4], %s7377_s7 }
  0xb6   : > { %7946 = dma.done.wait (%p10135_p9), %s437_s29, 3072  }
  0xb7   : > { %7948 = vsyncadd (%p10135_p9), %s437_s29, 4294964224  ;;  %s445_s19 = sand.u32 1, %s8132_s22   ;;  %s447_s28 = sand.u32 1, %s7983_s14  }
  0xb8   : > { %s7378_s30 = smul.u32 192, %s447_s28  ;;  %s446_s23 = scalar_lea.sflag [#allocation8], %s445_s19 }
  0xb9   : > { %p10136_p0 = scmp.ne.s32.totalorder %s10111_s26, 0 }
  0xba   : > { %s8394_s16 = scalar_lea.vmem [#allocation7], %s7378_s30 }
  0xbb   : > { %7950 = dma.done.wait (%p10136_p0), %s446_s23, 3072  }
  0xbc   : > { %7952 = vsyncadd (%p10136_p0), %s446_s23, 4294964224  ;;  %p10137_p12 = scmp.eq.s32.totalorder %s8132_s22, 0 }
  0xbe   : > { %7954 = dma.done.wait (%p10137_p12), [#allocation8], 6144   ;;  %p10138_p10 = pmov %p10137_p12 }
  0xc0   : > { %7956 = vsyncadd (%p10138_p10), [#allocation8], 4294961152  ;;  %p10139_p6 = pmov %p10138_p10 }
  0xc2   : > { %7958 = dma.done.wait (%p10139_p6), [#allocation11], 6144   ;;  %p10140_p8 = pmov %p10139_p6 }
  0xc3   : > { %s5493_s24 = sshll.u32 %s8380_s4, 6  ;;  %s5494_s27 = sshll.u32 %s447_s28, 6 }
  0xc4   : > { %7960 = vsyncadd (%p10140_p8), [#allocation11], 4294961152  ;;  %s8409_s12 = scalar_lea.vmem [#allocation12], %s5493_s24  ;;  %s8411_s10 = scalar_lea.vmem [#allocation13], %s5494_s27 }
  0xc5   : > { %s10141_s26 = sld [smem:[#allocation28_spill]] }
  0xcb   : > { %p5495_p13 = scmp.ne.s32.totalorder %s10141_s26, 0 }
  0xcc   : > { %v8020_v0 = vmov (!%p5495_p13), 0.0  }
  0xcd   : > { %521 = sbr.rel (%p5495_p13) target bundleno = 212 (0xd4), region = 68  ;;  %522 = vst [vmem:[#allocation2] sm:$0xff] (!%p5495_p13), %v8020_v0  ;;  %523 = vst [vmem:[#allocation3] sm:$0xff] (!%p5495_p13), %v8020_v0 }
  0xd4 PF: > { %v539_v1 = vld [vmem:[#allocation9 + $0x8] sm:$0xff]  ;;  %v542_v2 = vld [vmem:[#allocation9 + $0x20] sm:$0xff]  ;;  %v541_v5 = vld [vmem:[#allocation9 + $0x18] sm:$0xff]  ;;  %v8021_v8 = vmov 0.0|0.0   ;;  %v10076_v9 = vmov 0.0   ;;  %vm8023_vm0 = vmmov 0  }
  0xd5   : > { %v538_v3 = vld [vmem:[#allocation9] sm:$0xff]  ;;  %v8414_v4 = vpack.c.bf16 %v542_v2, %v539_v1  ;;  %v545_v6 = vld [vmem:[#allocation9 + $0x38] sm:$0xff]  ;;  %v548_v7 = vld [vmem:[#allocation9 + $0x50] sm:$0xff]  ;;  %6510 = vmatprep.subr.bf16.mxu1 %v8021_v8  ;;  %666 = vmatprep.mubr.f32.mxu0 %v10076_v9  ;;  %v8024_v15 = vmov 0   ;;  %s10142_s11 = sld [smem:[#allocation28_spill]]  ;;  %s10143_s5 = sld [smem:[#allocation40_spill]] }
  0xd6   : > { %v8418_v10 = vpack.c.bf16 %v541_v5, %v538_v3  ;;  %v8420_v11 = vpack.c.bf16 %v548_v7, %v545_v6  ;;  %v544_v12 = vld [vmem:[#allocation9 + $0x30] sm:$0xff]  ;;  %v547_v13 = vld [vmem:[#allocation9 + $0x48] sm:$0xff]  ;;  %5950 = vmatprep.mubr.msk.f32.mxu1 %vm8023_vm0, %v10076_v9  ;;  %7522 = vset.pattern.permute.xlu0 %v8024_v15  ;;  %v554_v16 = vld [vmem:[#allocation9 + $0x80] sm:$0xff] }
  0xd7   : > { %v551_v14 = vld [vmem:[#allocation9 + $0x68] sm:$0xff]  ;;  %6479 = vmatprep.subr.bf16.mxu0 %v8414_v4  ;;  %7523 = vset.pattern.permute.xlu1 %v8024_v15  ;;  %v8428_v17 = vpack.c.bf16 %v547_v13, %v544_v12  ;;  %v550_v19 = vld [vmem:[#allocation9 + $0x60] sm:$0xff]  ;;  %v553_v20 = vld [vmem:[#allocation9 + $0x78] sm:$0xff] }
  0xd8   : > { %6481 = vmatpush1.bf16.msra.mxu0 %v8418_v10  ;;  %v8431_v18 = vpack.c.bf16 %v554_v16, %v551_v14  ;;  %v557_v21 = vld [vmem:[#allocation9 + $0x98] sm:$0xff]  ;;  %v560_v22 = vld [vmem:[#allocation9 + $0xb0] sm:$0xff]  ;;  %v8434_v23 = vpack.c.bf16 %v553_v20, %v550_v19  ;;  %v559_v26 = vld [vmem:[#allocation9 + $0xa8] sm:$0xff] }
  0xd9   : > { %6483 = vmatprep.subr.bf16.mxu0 %v8420_v11  ;;  %v8437_v24 = vpack.c.bf16 %v560_v22, %v557_v21  ;;  %v556_v25 = vld [vmem:[#allocation9 + $0x90] sm:$0xff]  ;;  %v563_v27 = vld [vmem:[#allocation9 + $0xc8] sm:$0xff]  ;;  %v566_v28 = vld [vmem:[#allocation9 + $0xe0] sm:$0xff] }
  0xda   : > { %v540_v29 = vld [vmem:[#allocation9 + $0x10] sm:$0xff]  ;;  %v543_v30 = vld [vmem:[#allocation9 + $0x28] sm:$0xff]  ;;  %v546_v32 = vld [vmem:[#allocation9 + $0x40] sm:$0xff]  ;;  %v8442_v33 = vpack.c.bf16 %v559_v26, %v556_v25  ;;  %v8445_v35 = vpack.c.bf16 %v566_v28, %v563_v27 }
  0xdb   : > { %v8439_v31 = vpack.c.bf16 %v543_v30, %v540_v29  ;;  %v549_v34 = vld [vmem:[#allocation9 + $0x58] sm:$0xff]  ;;  %v562_v36 = vld [vmem:[#allocation9 + $0xc0] sm:$0xff]  ;;  %v572_v40 = vld [vmem:[#allocation9 + $0x110] sm:$0xff]  ;;  %s8482_s25 = sshll.u32 %s10142_s11, 3  ;;  %p5635_p1 = scmp.ne.s32.totalorder %s10142_s11, 1 }
  0xdc   : > { %6485 = vmatpush1.bf16.msra.mxu0 %v8428_v17  ;;  %v565_v37 = vld [vmem:[#allocation9 + $0xd8] sm:$0xff]  ;;  %v8448_v39 = vpack.c.bf16 %v549_v34, %v546_v32  ;;  %v552_v41 = vld [vmem:[#allocation9 + $0x70] sm:$0xff]  ;;  %v555_v42 = vld [vmem:[#allocation9 + $0x88] sm:$0xff]  ;;  %s530_s13 = ssub.s32 15, %s8482_s25  ;;  %v990_v25 = vstv %s8482_s25  ;;  %s1720_s3 = sadd.s32 2, %s8482_s25 }
  0xdd   : > { %6487 = vmatprep.subr.bf16.mxu0 %v8431_v18  ;;  %v569_v38 = vld [vmem:[#allocation9 + $0xf8] sm:$0xff]  ;;  %6512 = vmatpush3.bf16.msra.mxu1 %v8439_v31  ;;  %v8452_v43 = vpack.c.bf16 %v565_v37, %v562_v36  ;;  %v568_v45 = vld [vmem:[#allocation9 + $0xf0] sm:$0xff]  ;;  %v571_v46 = vld [vmem:[#allocation9 + $0x108] sm:$0xff]  ;;  %v8458_v48 = vpack.c.bf16 %v555_v42, %v552_v41  ;;  %v992_v26 = vstv %s530_s13  ;;  %s2300_s9 = sadd.s32 3, %s8482_s25  ;;  %s2880_s7 = sadd.s32 4, %s8482_s25 }
  0xde   : > { %6513 = vmatprep.subr.bf16.mxu1 %v8021_v8  ;;  %v8455_v44 = vpack.c.bf16 %v572_v40, %v569_v38  ;;  %v575_v47 = vld [vmem:[#allocation9 + $0x128] sm:$0xff]  ;;  %v578_v49 = vld [vmem:[#allocation9 + $0x140] sm:$0xff]  ;;  %v561_v51 = vld [vmem:[#allocation9 + $0xb8] sm:$0xff]  ;;  %v8462_v52 = vpack.c.bf16 %v571_v46, %v568_v45  ;;  %v2150_v45 = vstv %s1720_s3  ;;  %s3460_s29 = sadd.s32 5, %s8482_s25  ;;  %s4040_s28 = sadd.s32 6, %s8482_s25 }
  0xdf   : > { %v558_v50 = vld [vmem:[#allocation9 + $0xa0] sm:$0xff]  ;;  %v8465_v53 = vpack.c.bf16 %v578_v49, %v575_v47  ;;  %v577_v55 = vld [vmem:[#allocation9 + $0x138] sm:$0xff]  ;;  %v584_v58 = vld [vmem:[#allocation9 + $0x170] sm:$0xff]  ;;  %s4620_s30 = sadd.s32 7, %s8482_s25  ;;  %s1140_s23 = sadd.s32 1, %s8482_s25 }
  0xe0   : > { %6489 = vmatpush1.bf16.msra.mxu0 %v8434_v23  ;;  %v574_v54 = vld [vmem:[#allocation9 + $0x120] sm:$0xff]  ;;  %v581_v56 = vld [vmem:[#allocation9 + $0x158] sm:$0xff]  ;;  %v8468_v57 = vpack.c.bf16 %v561_v51, %v558_v50  ;;  %v564_v59 = vld [vmem:[#allocation9 + $0xd0] sm:$0xff]  ;;  %s1141_s24 = ssub.s32 14, %s8482_s25  ;;  %s1721_s27 = ssub.s32 13, %s8482_s25 }
  0xe1   : > { %6491 = vmatprep.subr.bf16.mxu0 %v8437_v24  ;;  %6515 = vmatpush3.bf16.msra.mxu1 %v8448_v39  ;;  %v567_v60 = vld [vmem:[#allocation9 + $0xe8] sm:$0xff]  ;;  %v8472_v61 = vpack.c.bf16 %v577_v55, %v574_v54  ;;  %v8475_v62 = vpack.c.bf16 %v584_v58, %v581_v56  ;;  %v580_v63 = vld [vmem:[#allocation9 + $0x150] sm:$0xff]  ;;  %v747_v3 = vld [vmem:[#allocation10 + $0x20] sm:$0xff]  ;;  %s2301_s26 = ssub.s32 12, %s8482_s25  ;;  %s2881_s13 = ssub.s32 11, %s8482_s25 }
  0xe2   : > { %6516 = vmatprep.subr.bf16.mxu1 %v8021_v8  ;;  %v583_v0 = vld [vmem:[#allocation9 + $0x168] sm:$0xff]  ;;  %v8478_v2 = vpack.c.bf16 %v567_v60, %v564_v59  ;;  %v570_v5 = vld [vmem:[#allocation9 + $0x100] sm:$0xff]  ;;  %v573_v6 = vld [vmem:[#allocation9 + $0x118] sm:$0xff]  ;;  %v2730_v60 = vstv %s2300_s9  ;;  %s3461_s3 = ssub.s32 10, %s8482_s25  ;;  %s4041_s0 = ssub.s32 9, %s8482_s25 }
  0xe3   : > { %v744_v1 = vld [vmem:[#allocation10 + $0x8] sm:$0xff]  ;;  %v8486_v7 = vpack.c.bf16 %v583_v0, %v580_v63  ;;  %v743_v12 = vld [vmem:[#allocation10] sm:$0xff]  ;;  %v746_v14 = vld [vmem:[#allocation10 + $0x18] sm:$0xff]  ;;  %v8492_v20 = vpack.c.bf16 %v573_v6, %v570_v5  ;;  %s4621_s6 = ssub.s32 8, %s8482_s25  ;;  %s10144_s25 = sld [smem:[#allocation44_spill]] }
  0xe4   : > { %6493 = vmatpush1.bf16.msra.mxu0 %v8442_v33  ;;  %v8489_v13 = vpack.c.bf16 %v747_v3, %v744_v1  ;;  %v750_v16 = vld [vmem:[#allocation10 + $0x38] sm:$0xff]  ;;  %v753_v19 = vld [vmem:[#allocation10 + $0x50] sm:$0xff]  ;;  %v579_v22 = vld [vmem:[#allocation9 + $0x148] sm:$0xff]  ;;  %v8500_v28 = vpack.c.bf16 %v746_v14, %v743_v12 }
  0xe5   : > { %6495 = vmatprep.subr.bf16.mxu0 %v8445_v35  ;;  %6518 = vmatpush3.bf16.msra.mxu1 %v8458_v48  ;;  %v576_v21 = vld [vmem:[#allocation9 + $0x130] sm:$0xff]  ;;  %v8502_v29 = vpack.c.bf16 %v753_v19, %v750_v16  ;;  %v752_v34 = vld [vmem:[#allocation10 + $0x48] sm:$0xff]  ;;  %v759_v38 = vld [vmem:[#allocation10 + $0x80] sm:$0xff] }
  0xe6   : > { %6519 = vmatprep.subr.bf16.mxu1 %v8021_v8  ;;  %v8498_v27 = vld [vmem:[#allocation2] sm:$0xff]  ;;  %v756_v36 = vld [vmem:[#allocation10 + $0x68] sm:$0xff]  ;;  %v8511_v37 = vpack.c.bf16 %v579_v22, %v576_v21  ;;  %v582_v40 = vld [vmem:[#allocation9 + $0x160] sm:$0xff]  ;;  %v3310_v21 = vstv %s2880_s7 }
  0xe7   : > { %v8507_v30 = vld [vmem:[%s10143_s5] sm:$0xff]  ;;  %v585_v41 = vld [vmem:[#allocation9 + $0x178] sm:$0xff]  ;;  %v8525_v49 = vpack.c.bf16 %v759_v38, %v756_v36  ;;  %v755_v50 = vld [vmem:[#allocation10 + $0x60] sm:$0xff] }
  0xe8   : > { %6497 = vmatpush1.bf16.msra.mxu0 %v8452_v43  ;;  %v749_v32 = vld [vmem:[#allocation10 + $0x30] sm:$0xff]  ;;  %vm991_vm1 = vcmp.gt.s32.totalorder %v8507_v30, %v990_v25  ;;  %vm993_vm2 = vcmp.gt.s32.totalorder %v8507_v30, %v992_v26  ;;  %v758_v51 = vld [vmem:[#allocation10 + $0x78] sm:$0xff]  ;;  %v8528_v55 = vpack.c.bf16 %v585_v41, %v582_v40  ;;  %vm2151_vm3 = vcmp.gt.s32.totalorder %v8507_v30, %v2150_v45  ;;  %v748_v59 = vld [vmem:[#allocation10 + $0x28] sm:$0xff] }
  0xe9   : > { %6499 = vmatprep.subr.bf16.mxu0 %v8455_v44  ;;  %6521 = vmatpush3.bf16.msra.mxu1 %v8468_v57  ;;  %v994_v42 = vsel %vm991_vm1, 1, %v8024_v15  ;;  %v8520_v46 = vpack.c.bf16 %v752_v34, %v749_v32  ;;  %v1000_v47 = vsel %vm993_vm2, 1, %v8024_v15  ;;  %v762_v54 = vld [vmem:[#allocation10 + $0x98] sm:$0xff]  ;;  %v765_v56 = vld [vmem:[#allocation10 + $0xb0] sm:$0xff]  ;;  %v8534_v63 = vpack.c.bf16 %v758_v51, %v755_v50  ;;  %v764_v5 = vld [vmem:[#allocation10 + $0xa8] sm:$0xff] }
  0xea   : > { %6522 = vmatprep.subr.bf16.mxu1 %v8021_v8  ;;  %996 = vperm.xlu0 %7522, %v994_v42   ;;  %v745_v58 = vld [vmem:[#allocation10 + $0x10] sm:$0xff]  ;;  %v2154_v0 = vsel %vm2151_vm3, 1, %v8024_v15  ;;  %v8538_v1 = vpack.c.bf16 %v765_v56, %v762_v54  ;;  %v768_v6 = vld [vmem:[#allocation10 + $0xc8] sm:$0xff]  ;;  %vm2731_vm4 = vcmp.gt.s32.totalorder %v8507_v30, %v2730_v60  ;;  %v771_v14 = vld [vmem:[#allocation10 + $0xe0] sm:$0xff]  ;;  %vm3311_vm5 = vcmp.gt.s32.totalorder %v8507_v30, %v3310_v21 }
  0xeb   : > { %v761_v3 = vld [vmem:[#allocation10 + $0x90] sm:$0xff]  ;;  %v8541_v12 = vpack.c.bf16 %v748_v59, %v745_v58  ;;  %v751_v16 = vld [vmem:[#allocation10 + $0x40] sm:$0xff]  ;;  %v754_v19 = vld [vmem:[#allocation10 + $0x58] sm:$0xff]  ;;  %v2734_v25 = vsel %vm2731_vm4, 1, %v8024_v15  ;;  %v8552_v26 = vpack.c.bf16 %v771_v14, %v768_v6  ;;  %v3890_v45 = vstv %s3460_s29 }
  0xec   : > { %6501 = vmatpush1.bf16.msra.mxu0 %v8462_v52  ;;  %v8547_v22 = vpack.c.bf16 %v764_v5, %v761_v3  ;;  %v767_v32 = vld [vmem:[#allocation10 + $0xc0] sm:$0xff]  ;;  %v770_v34 = vld [vmem:[#allocation10 + $0xd8] sm:$0xff]  ;;  %v8555_v38 = vpack.c.bf16 %v754_v19, %v751_v16  ;;  %v777_v40 = vld [vmem:[#allocation10 + $0x110] sm:$0xff]  ;;  %v3314_v50 = vsel %vm3311_vm5, 1, %v8024_v15  ;;  %vm3891_vm6 = vcmp.gt.s32.totalorder %v8507_v30, %v3890_v45 }
  0xed   : > { %6503 = vmatprep.subr.bf16.mxu0 %v8465_v53  ;;  %6524 = vmatpush3.bf16.msra.mxu1 %v8478_v2  ;;  %v774_v36 = vld [vmem:[#allocation10 + $0xf8] sm:$0xff]  ;;  %v757_v41 = vld [vmem:[#allocation10 + $0x70] sm:$0xff]  ;;  %v760_v42 = vld [vmem:[#allocation10 + $0x88] sm:$0xff]  ;;  %v4470_v5 = vstv %s4040_s28  ;;  %v3894_v14 = vsel %vm3891_vm6, 1, %v8024_v15  ;;  %s10145_s28 = sld [smem:[#allocation45_spill]] }
  0xee   : > { %6525 = vmatprep.subr.bf16.mxu1 %v8021_v8  ;;  %1002 = vperm.xlu0 %7522, %v1000_v47   ;;  %v8563_v47 = vpack.c.bf16 %v770_v34, %v767_v32  ;;  %v8567_v51 = vpack.c.bf16 %v777_v40, %v774_v36  ;;  %v773_v54 = vld [vmem:[#allocation10 + $0xf0] sm:$0xff]  ;;  %v776_v56 = vld [vmem:[#allocation10 + $0x108] sm:$0xff]  ;;  %v8570_v59 = vpack.c.bf16 %v760_v42, %v757_v41  ;;  %v783_v60 = vld [vmem:[#allocation10 + $0x140] sm:$0xff]  ;;  %v5049_v41 = vstv %s4620_s30 }
  0xef   : > { %v780_v58 = vld [vmem:[#allocation10 + $0x128] sm:$0xff]  ;;  %v766_v3 = vld [vmem:[#allocation10 + $0xb8] sm:$0xff]  ;;  %v8576_v6 = vpack.c.bf16 %v776_v56, %v773_v54  ;;  %v779_v19 = vld [vmem:[#allocation10 + $0x120] sm:$0xff]  ;;  %vm4471_vm7 = vcmp.gt.s32.totalorder %v8507_v30, %v4470_v5  ;;  %vm5050_vm8 = vcmp.gt.s32.totalorder %v8507_v30, %v5049_v41 }
  0xf0   : > { %6505 = vmatpush1.bf16.msra.mxu0 %v8472_v61  ;;  %v8580_v16 = vpack.c.bf16 %v783_v60, %v780_v58  ;;  %v782_v21 = vld [vmem:[#allocation10 + $0x138] sm:$0xff]  ;;  %v789_v34 = vld [vmem:[#allocation10 + $0x170] sm:$0xff]  ;;  %v772_v40 = vld [vmem:[#allocation10 + $0xe8] sm:$0xff]  ;;  %v4474_v45 = vsel %vm4471_vm7, 1, %v8024_v15  ;;  %v5053_v5 = vsel %vm5050_vm8, 1, %v8024_v15 }
  0xf1   : > { %6507 = vmatprep.subr.bf16.mxu0 %v8475_v62  ;;  %6527 = vmatpush3.bf16.msra.mxu1 %v8492_v20  ;;  %v769_v36 = vld [vmem:[#allocation10 + $0xd0] sm:$0xff]  ;;  %v8588_v42 = vpack.c.bf16 %v782_v21, %v779_v19  ;;  %v788_v56 = vld [vmem:[#allocation10 + $0x168] sm:$0xff]  ;;  %v775_v60 = vld [vmem:[#allocation10 + $0x100] sm:$0xff] }
  0xf2   : > { %6528 = vmatprep.subr.bf16.mxu1 %v8021_v8  ;;  %2156 = vperm.xlu0 %7522, %v2154_v0   ;;  %v763_v0 = vld [vmem:[#allocation10 + $0xa0] sm:$0xff]  ;;  %v785_v54 = vld [vmem:[#allocation10 + $0x150] sm:$0xff]  ;;  %v8595_v58 = vpack.c.bf16 %v772_v40, %v769_v36  ;;  %v784_v21 = vld [vmem:[#allocation10 + $0x148] sm:$0xff] }
  0xf3   : > { %v8583_v32 = vpack.c.bf16 %v766_v3, %v763_v0  ;;  %v778_v0 = vld [vmem:[#allocation10 + $0x118] sm:$0xff]  ;;  %v8600_v3 = vpack.c.bf16 %v788_v56, %v785_v54  ;;  %v781_v19 = vld [vmem:[#allocation10 + $0x130] sm:$0xff]  ;;  %v787_v36 = vld [vmem:[#allocation10 + $0x160] sm:$0xff] }
  0xf4   : > { %6509 = vmatpush1.bf16.msra.mxu0 %v8486_v7  ;;  %v790_v40 = vld [vmem:[#allocation10 + $0x178] sm:$0xff] }
  0xf5   : > { %6535 = vmatprep.subr.bf16.mxu0 %v8489_v13  ;;  %6530 = vmatpush3.bf16.msra.mxu1 %v8511_v37  ;;  %v8620_v41 = vpack.c.bf16 %v790_v40, %v787_v36 }
  0xf6   : > { %6531 = vmatprep.subr.bf16.mxu1 %v8021_v8  ;;  %2736 = vperm.xlu0 %7522, %v2734_v25   ;;  %v786_v25 = vld [vmem:[#allocation10 + $0x158] sm:$0xff] }
  0xf7   : > { %667 = vmatmul.mubr.f32.vlgmr.msra.gmra.mrb[0].mxu0 %v8498_v27 }
  0xf8   : > { %6537 = vmatpush1.bf16.msra.mxu0 %v8500_v28  ;;  %871 = vmatprep.mubr.f32.mxu0 %v10076_v9 }
  0xf9   : > { %6539 = vmatprep.subr.bf16.mxu0 %v8502_v29  ;;  %6533 = vmatpush3.bf16.msra.mxu1 %v8528_v55 }
  0xfa   : > { %6566 = vmatprep.subr.bf16.mxu1 %v8021_v8  ;;  %3316 = vperm.xlu0 %7522, %v3314_v50   ;;  %v8592_v50 = vpack.c.bf16 %v789_v34, %v786_v25  ;;  %v8609_v25 = vld [vmem:[#allocation3] sm:$0xff]  ;;  %v8612_v34 = vpack.c.bf16 %v784_v21, %v781_v19 }
  0xfc   : > { %6541 = vmatpush1.bf16.msra.mxu0 %v8520_v46  ;;  %5951 = vmatmul.mubr.f32.vlgmr.msra.gmra.mrb[0].mxu1 %v8498_v27 }
  0xfd   : > { %6543 = vmatprep.subr.bf16.mxu0 %v8525_v49  ;;  %6568 = vmatpush3.bf16.msra.mxu1 %v8541_v12 }
  0xfe   : > { %6569 = vmatprep.subr.bf16.mxu1 %v8021_v8  ;;  %5985 = vmatprep.mubr.msk.f32.mxu1 %vm8023_vm0, %v10076_v9 }
  0xff   : > { %3896 = vperm.xlu0 %7522, %v3894_v14   ;;  %v8605_v14 = vpack.c.bf16 %v778_v0, %v775_v60  ;;  %v532_v60 = vld [vmem:[%s8384_s18 + $0x8] sm:$0xff] }
 0x100   : > { %6545 = vmatpush1.bf16.msra.mxu0 %v8534_v63 }
 0x101   : > { %6547 = vmatprep.subr.bf16.mxu0 %v8538_v1  ;;  %6571 = vmatpush3.bf16.msra.mxu1 %v8555_v38 }
 0x102   : > { %6572 = vmatprep.subr.bf16.mxu1 %v8021_v8 }
 0x103   : > { %4476 = vperm.xlu0 %7522, %v4474_v45  }
 0x104   : > { %6549 = vmatpush1.bf16.msra.mxu0 %v8547_v22 }
 0x105   : > { %6551 = vmatprep.subr.bf16.mxu0 %v8552_v26  ;;  %6574 = vmatpush3.bf16.msra.mxu1 %v8570_v59 }
 0x106   : > { %6575 = vmatprep.subr.bf16.mxu1 %v8021_v8 }
 0x107   : > { %5055 = vperm.xlu0 %7522, %v5053_v5  }
 0x108   : > { %6553 = vmatpush1.bf16.msra.mxu0 %v8563_v47 }
 0x109   : > { %6555 = vmatprep.subr.bf16.mxu0 %v8567_v51  ;;  %6577 = vmatpush3.bf16.msra.mxu1 %v8583_v32 }
 0x10a   : > { %6578 = vmatprep.subr.bf16.mxu1 %v8021_v8 }
 0x10c   : > { %6557 = vmatpush1.bf16.msra.mxu0 %v8576_v6 }
 0x10d   : > { %6559 = vmatprep.subr.bf16.mxu0 %v8580_v16  ;;  %6580 = vmatpush3.bf16.msra.mxu1 %v8595_v58 }
 0x10e   : > { %6581 = vmatprep.subr.bf16.mxu1 %v8021_v8 }
 0x110   : > { %6561 = vmatpush1.bf16.msra.mxu0 %v8588_v42 }
 0x111   : > { %6563 = vmatprep.subr.bf16.mxu0 %v8592_v50  ;;  %6583 = vmatpush3.bf16.msra.mxu1 %v8605_v14 }
 0x112   : > { %6584 = vmatprep.subr.bf16.mxu1 %v8021_v8 }
 0x114   : > { %6565 = vmatpush1.bf16.msra.mxu0 %v8600_v3 }
 0x115   : > { %6591 = vmatprep.subr.bf16.mxu0 %v8414_v4  ;;  %6586 = vmatpush3.bf16.msra.mxu1 %v8612_v34  ;;  %v1570_v4 = vstv %s1140_s23 }
 0x116   : > { %6587 = vmatprep.subr.bf16.mxu1 %v8021_v8  ;;  %vm1571_vm9 = vcmp.gt.s32.totalorder %v8507_v30, %v1570_v4 }
 0x117   : > { %872 = vmatmul.mubr.f32.vlgmr.msra.gmra.mrb[2].mxu0 %v8609_v25 }
 0x118   : > { %6593 = vmatpush1.bf16.msra.mxu0 %v8418_v10  ;;  %1262 = vmatprep.mubr.f32.mxu0 %v10076_v9  ;;  %v1572_v10 = vstv %s1141_s24 }
 0x119   : > { %6595 = vmatprep.subr.bf16.mxu0 %v8420_v11  ;;  %6589 = vmatpush3.bf16.msra.mxu1 %v8620_v41  ;;  %vm1573_vm10 = vcmp.gt.s32.totalorder %v8507_v30, %v1572_v10  ;;  %v1574_v11 = vsel %vm1571_vm9, 1, %v8024_v15 }
 0x11a   : > { %6622 = vmatprep.subr.bf16.mxu1 %v8021_v8  ;;  %1576 = vperm.xlu1 %7523, %v1574_v11  }
 0x11c   : > { %6597 = vmatpush1.bf16.msra.mxu0 %v8428_v17  ;;  %5986 = vmatmul.mubr.f32.vlgmr.msra.gmra.mrb[2].mxu1 %v8609_v25  ;;  %v2152_v17 = vstv %s1721_s27 }
 0x11d   : > { %6599 = vmatprep.subr.bf16.mxu0 %v8431_v18  ;;  %6624 = vmatpush3.bf16.msra.mxu1 %v8439_v31  ;;  %v1580_v18 = vsel %vm1573_vm10, 1, %v8024_v15  ;;  %vm2153_vm11 = vcmp.gt.s32.totalorder %v8507_v30, %v2152_v17  ;;  %v3312_v31 = vstv %s2881_s13  ;;  %v526_v17 = vld [vmem:[%s10145_s28] sm:$0x7] }
 0x11e   : > { %6625 = vmatprep.subr.bf16.mxu1 %v8021_v8  ;;  %6020 = vmatprep.mubr.msk.f32.mxu1 %vm8023_vm0, %v10076_v9  ;;  %vm3313_vm13 = vcmp.gt.s32.totalorder %v8507_v30, %v3312_v31 }
 0x11f   : > { %1582 = vperm.xlu1 %7523, %v1580_v18  }
 0x120   : > { %6601 = vmatpush1.bf16.msra.mxu0 %v8434_v23  ;;  %v2732_v23 = vstv %s2301_s26 }
 0x121   : > { %6603 = vmatprep.subr.bf16.mxu0 %v8437_v24  ;;  %6627 = vmatpush3.bf16.msra.mxu1 %v8448_v39  ;;  %v2160_v24 = vsel %vm2153_vm11, 1, %v8024_v15  ;;  %vm2733_vm12 = vcmp.gt.s32.totalorder %v8507_v30, %v2732_v23  ;;  %v3320_v39 = vsel %vm3313_vm13, 1, %v8024_v15 }
 0x122   : > { %6628 = vmatprep.subr.bf16.mxu1 %v8021_v8 }
 0x123   : > { %2162 = vperm.xlu1 %7523, %v2160_v24  }
 0x124   : > { %6605 = vmatpush1.bf16.msra.mxu0 %v8442_v33  ;;  %v2740_v33 = vsel %vm2733_vm12, 1, %v8024_v15 }
 0x125   : > { %6607 = vmatprep.subr.bf16.mxu0 %v8445_v35  ;;  %6630 = vmatpush3.bf16.msra.mxu1 %v8458_v48  ;;  %v3892_v35 = vstv %s3461_s3 }
 0x126   : > { %6631 = vmatprep.subr.bf16.mxu1 %v8021_v8  ;;  %vm3893_vm14 = vcmp.gt.s32.totalorder %v8507_v30, %v3892_v35 }
 0x127   : > { %2742 = vperm.xlu1 %7523, %v2740_v33   ;;  %v3900_v48 = vsel %vm3893_vm14, 1, %v8024_v15  ;;  %v533_v33 = vld [vmem:[%s8384_s18 + $0x10] sm:$0xff] }
 0x128   : > { %6609 = vmatpush1.bf16.msra.mxu0 %v8452_v43  ;;  %v4472_v43 = vstv %s4041_s0 }
 0x129   : > { %6611 = vmatprep.subr.bf16.mxu0 %v8455_v44  ;;  %6633 = vmatpush3.bf16.msra.mxu1 %v8468_v57  ;;  %v587_v44 = vlaneseq  ;;  %vm4473_vm15 = vcmp.gt.s32.totalorder %v8507_v30, %v4472_v43  ;;  %v5497_v43 = vld [vmem:[%s8394_s16 + $0xa8] sm:$0xff] }
 0x12a   : > { %6634 = vmatprep.subr.bf16.mxu1 %v8021_v8  ;;  %v4480_v57 = vsel %vm4473_vm15, 1, %v8024_v15 }
 0x12b   : > { %3322 = vperm.xlu1 %7523, %v3320_v39  }
 0x12c   : > { %6613 = vmatpush1.bf16.msra.mxu0 %v8462_v52  ;;  %v5051_v52 = vstv %s4621_s6 }
 0x12d   : > { %6615 = vmatprep.subr.bf16.mxu0 %v8465_v53  ;;  %6636 = vmatpush3.bf16.msra.mxu1 %v8478_v2  ;;  %v8680_v53 = vshrl.u32 %v587_v44, 7  ;;  %vm5052_vm1 = vcmp.gt.s32.totalorder %v8507_v30, %v5051_v52 }
 0x12e   : > { %6637 = vmatprep.subr.bf16.mxu1 %v8021_v8 }
 0x12f   : > { %3902 = vperm.xlu1 %7523, %v3900_v48   ;;  %v593_v2 = vsub.s32 1, %v8680_v53  ;;  %v597_v4 = vsub.s32 2, %v8680_v53 }
 0x130   : > { %6617 = vmatpush1.bf16.msra.mxu0 %v8472_v61  ;;  %v589_v61 = vsub.s32 0, %v8680_v53 }
 0x131   : > { %6619 = vmatprep.subr.bf16.mxu0 %v8475_v62  ;;  %6639 = vmatpush3.bf16.msra.mxu1 %v8492_v20  ;;  %v525_v62 = vld [vmem:[%s10144_s25] sm:$0x7]  ;;  %v8708_v35 = vrot.slane %v526_v17, %v593_v2 }
 0x132   : > { %6640 = vmatprep.subr.bf16.mxu1 %v8021_v8  ;;  %v8692_v20 = vrot.slane %v525_v62, %v593_v2  ;;  %v8699_v10 = vrot.slane %v525_v62, %v597_v4  ;;  %v8705_v24 = vrot.slane %v526_v17, %v589_v61 }
 0x133   : > { %4482 = vperm.xlu1 %7523, %v4480_v57  }
 0x134   : > { %6621 = vmatpush1.bf16.msra.mxu0 %v8486_v7  ;;  %v5059_v7 = vsel %vm5052_vm1, 1, %v8024_v15 }
 0x135   : > { %6647 = vmatprep.subr.bf16.mxu0 %v8489_v13  ;;  %6642 = vmatpush3.bf16.msra.mxu1 %v8511_v37  ;;  %v8690_v13 = vrot.slane %v525_v62, %v589_v61  ;;  %v531_v37 = vld [vmem:[%s8384_s18] sm:$0xff] }
 0x136   : > { %6643 = vmatprep.subr.bf16.mxu1 %v8021_v8 }
 0x137   : > { %5061 = vperm.xlu1 %7523, %v5059_v7  }
 0x139   : > { %6645 = vmatpush3.bf16.msra.mxu1 %v8528_v55 }
 0x13a   : > { %6678 = vmatprep.subr.bf16.mxu1 %v8021_v8 }
 0x1ca   : > { %v668_v55 = vpop.f32.mrb[0].mxu0 }
 0x1cb   : > { %v669_v30 = vadd.f32 %v668_v55, %v8690_v13  ;;  %v670_v45 = vpop.f32.mrb[1].mxu0 }
 0x1cc   : > { %v671_v54 = vadd.f32 %v670_v45, %v8692_v20 }
 0x1cd   : > { %v948_v56 = vadd.f32 %v669_v30, %v531_v37  ;;  %v5498_v37 = vld [vmem:[%s8394_s16 + $0xb0] sm:$0xff]  ;;  %v8025_v30 = vmov 1966171168  }
 0x1ce   : > { %v949_v5 = vadd.f32 %v671_v54, %v532_v60  ;;  %v1010_v45 = vunpack.c.l.s4 %v8025_v30 }
 0x1cf   : > { %v5500_v0 = vmul.f32 -1.442695, %v948_v56  ;;  %v739_v19 = vpop.f32.mrb[0].mxu1 }
 0x1d0   : > { %v5501_v15 = vmul.f32 -1.442695, %v949_v5  ;;  %v5952_v21 = vpop.f32.mrb[1].mxu1  ;;  %v740_v23 = vadd.f32 %v739_v19, %v8699_v10 }
 0x1d1   : > { %7524 = vpow2.f32 %v5500_v0  ;;  %v1011_v0 = vunpack.c.0.s8 %v1010_v45 }
 0x1d2   : > { %7526 = vpow2.f32 %v5501_v15  ;;  %v997_v15 = vpop.permute.xlu0 %996 }
 0x1d3   : > { %vm998_vm2 = vcmp.eq.s32.totalorder %v997_v15, 1  ;;  %v1732_v15 = vld [vmem:[#allocation9 + $0x10] sm:$0xff] }
 0x1db   : > { %v7525_v36 = vpop.eup %7524 }
 0x1dc   : > { %v956_v40 = vadd.f32 1.0, %v7525_v36  ;;  %v7527_v11 = vpop.eup %7526 }
 0x1dd   : > { %v957_v18 = vadd.f32 1.0, %v7527_v11 }
 0x1de   : > { %7528 = vrcp.f32 %v956_v40  ;;  %v8716_v40 = vsub.s32 %v1011_v0, %v8680_v53 }
 0x1df   : > { %7530 = vrcp.f32 %v957_v18 }
 0x1e8   : > { %v7529_v31 = vpop.eup %7528 }
 0x1e9   : > { %v962_v39 = vmul.f32 %v7529_v31, %v740_v23  ;;  %v7531_v2 = vpop.eup %7530 }
 0x1ea   : > { %v873_v44 = vpop.f32.mrb[2].mxu0  ;;  %v965_v5 = vsub.f32 1.0, %v7531_v2  ;;  %v967_v36 = vmul.f32 %v7531_v2, %v8498_v27 }
 0x1eb   : > { %v963_v48 = vadd.f32 %v962_v39, %v533_v33  ;;  %v874_v52 = vadd.f32 %v873_v44, %v8705_v24  ;;  %v875_v57 = vpop.f32.mrb[3].mxu0 }
 0x1ec   : > { %v876_v62 = vadd.f32 %v875_v57, %v8708_v35 }
 0x1ed   : > { %7532 = vtanh.f32 %v963_v48  ;;  %v969_v7 = vadd.f32 %v5497_v43, %v874_v52  ;;  %v8731_v48 = vrot.slane %v526_v17, %v597_v4 }
 0x1ee   : > { %v970_v61 = vadd.f32 %v5498_v37, %v876_v62 }
 0x1ef   : > { %v5502_v55 = vmul.f32 -1.442695, %v969_v7  ;;  %v944_v54 = vpop.f32.mrb[2].mxu1  ;;  %10146 = vst [vmem:[#allocation34_spill] sm:$0xff] %v8731_v48 }
 0x1f0   : > { %v5503_v56 = vmul.f32 -1.442695, %v970_v61  ;;  %v5987_v60 = vpop.f32.mrb[3].mxu1 }
 0x1f1   : > { %7534 = vpow2.f32 %v5502_v55  ;;  %v5499_v55 = vld [vmem:[%s8394_s16 + $0xb8] sm:$0xff]  ;;  %v1734_v60 = vld [vmem:[#allocation9 + $0x20] sm:$0xff] }
 0x1f2   : > { %7536 = vpow2.f32 %v5503_v56  ;;  %v1731_v56 = vld [vmem:[#allocation9 + $0x8] sm:$0xff] }
 0x1f3   : > { %v8798_v0 = vpack.c.bf16 %v1734_v60, %v1731_v56  ;;  %v1767_v60 = vld [vmem:[#allocation9 + $0x128] sm:$0xff] }
 0x1f7   : > { %v7533_v19 = vpop.eup %7532 }
 0x1f8   : > { %v966_v21 = vmul.f32 %v7533_v19, %v965_v5  ;;  %v1730_v5 = vld [vmem:[#allocation9] sm:$0xff]  ;;  %v1733_v19 = vld [vmem:[#allocation9 + $0x18] sm:$0xff] }
 0x1fa   : > { %v968_v11 = vadd.f32 %v967_v36, %v966_v21  ;;  %v8800_v21 = vpack.c.bf16 %v1733_v19, %v1730_v5  ;;  %v1735_v36 = vld [vmem:[#allocation9 + $0x28] sm:$0xff]  ;;  %v1770_v5 = vld [vmem:[#allocation9 + $0x140] sm:$0xff] }
 0x1fb   : > { %v7535_v18 = vpop.eup %7534  ;;  %v8857_v19 = vpack.c.bf16 %v1770_v5, %v1767_v60 }
 0x1fc   : > { %v977_v23 = vadd.f32 1.0, %v7535_v18  ;;  %v8719_v31 = vsel %vm998_vm2, %v968_v11, %v8498_v27  ;;  %v1006_v33 = vsel %vm998_vm2, %v968_v11, 0.0  ;;  %v8803_v11 = vpack.c.bf16 %v1735_v36, %v1732_v15  ;;  %v1737_v18 = vld [vmem:[#allocation9 + $0x38] sm:$0xff]  ;;  %v1766_v15 = vld [vmem:[#allocation9 + $0x120] sm:$0xff] }
 0x1fd   : > { %v1008_v39 = vcombine.high %v1006_v33, %v1006_v33  ;;  %v1015_v43 = vrot.slane %v1006_v33, %v8716_v40  ;;  %1263 = vmatmul.mubr.f32.vlgmr.msra.gmra.mrb[4].mxu0 %v8719_v31  ;;  %6021 = vmatmul.mubr.f32.vlgmr.msra.gmra.mrb[4].mxu1 %v8719_v31  ;;  %v1769_v36 = vld [vmem:[#allocation9 + $0x138] sm:$0xff] }
 0x1fe   : > { %7538 = vrcp.f32 %v977_v23  ;;  %6649 = vmatpush1.bf16.msra.mxu0 %v8500_v28  ;;  %6680 = vmatpush3.bf16.msra.mxu1 %v8541_v12  ;;  %v1740_v23 = vld [vmem:[#allocation9 + $0x50] sm:$0xff] }
 0x1ff   : > { %v1022_v53 = vrot.slane %v1008_v39, %v8716_v40  ;;  %v1023_v44 = vcombine.high %v1015_v43, %v1015_v43  ;;  %v1031_v27 = vrot.slane %v1015_v43, %v8716_v40  ;;  %5504 = vst.sshfl [vmem:[%s8409_s12] sm:$0x1 pattern:$0x73625140] %v1015_v43  ;;  %6651 = vmatprep.subr.bf16.mxu0 %v8502_v29  ;;  %v7537_v29 = vpop.eup %7536  ;;  %v1736_v39 = vld [vmem:[#allocation9 + $0x30] sm:$0xff]  ;;  %v1739_v43 = vld [vmem:[#allocation9 + $0x48] sm:$0xff] }
 0x200   : > { %6681 = vmatprep.subr.bf16.mxu1 %v8021_v8  ;;  %1451 = vmatprep.mubr.f32.mxu0 %v10076_v9  ;;  %v978_v7 = vadd.f32 1.0, %v7537_v29  ;;  %v8807_v33 = vpack.c.bf16 %v1740_v23, %v1737_v18  ;;  %v1742_v29 = vld [vmem:[#allocation9 + $0x60] sm:$0xff]  ;;  %v1768_v18 = vld [vmem:[#allocation9 + $0x130] sm:$0xff]  ;;  %v8860_v23 = vpack.c.bf16 %v1769_v36, %v1766_v15 }
 0x201   : > { %6055 = vmatprep.mubr.msk.f32.mxu1 %vm8023_vm0, %v10076_v9  ;;  %v1024_v28 = vcombine.high %v1022_v53, %v1022_v53  ;;  %v1038_v12 = vrot.slane %v1022_v53, %v8716_v40  ;;  %v1045_v52 = vrot.slane %v1023_v44, %v8716_v40  ;;  %v1053_v57 = vcombine.high %v1031_v27, %v1031_v27  ;;  %v1741_v27 = vld [vmem:[#allocation9 + $0x58] sm:$0xff] }
 0x202   : > { %5505 = vst.sshfl [vmem:[%s8409_s12 + $0x8] sm:$0x1 pattern:$0x73625140] %v1023_v44  ;;  %6653 = vmatpush1.bf16.msra.mxu0 %v8520_v46  ;;  %6683 = vmatpush3.bf16.msra.mxu1 %v8555_v38  ;;  %v945_v46 = vadd.f32 %v944_v54, %v8731_v48  ;;  %7540 = vrcp.f32 %v978_v7  ;;  %v8810_v44 = vpack.c.bf16 %v1739_v43, %v1736_v39  ;;  %v1747_v7 = vld [vmem:[#allocation9 + $0x88] sm:$0xff] }
 0x203   : > { %5506 = vst.sshfl [vmem:[%s8409_s12 + $0x20] sm:$0x1 pattern:$0x73625140] %v1022_v53  ;;  %v1052_v4 = vrot.slane %v1024_v28, %v8716_v40  ;;  %v1054_v17 = vcombine.high %v1038_v12, %v1038_v12  ;;  %v1055_v62 = vcombine.high %v1045_v52, %v1045_v52  ;;  %1067 = vst [vmem:[%s8409_s12 + $0x10] sm:$0x1] %v1053_v57  ;;  %6655 = vmatprep.subr.bf16.mxu0 %v8525_v49 }
 0x204   : > { %5507 = vst.sshfl [vmem:[%s8409_s12 + $0x28] sm:$0x1 pattern:$0x73625140] %v1024_v28  ;;  %6684 = vmatprep.subr.bf16.mxu1 %v8021_v8  ;;  %v1738_v53 = vld [vmem:[#allocation9 + $0x40] sm:$0xff]  ;;  %v1743_v12 = vld [vmem:[#allocation9 + $0x68] sm:$0xff] }
 0x205   : > { %v1056_v37 = vcombine.high %v1052_v4, %v1052_v4  ;;  %1068 = vst [vmem:[%s8409_s12 + $0x18] sm:$0x1] %v1055_v62  ;;  %1071 = vst [vmem:[%s8409_s12 + $0x30] sm:$0x1] %v1054_v17  ;;  %v8813_v28 = vpack.c.bf16 %v1741_v27, %v1738_v53  ;;  %v1746_v52 = vld [vmem:[#allocation9 + $0x80] sm:$0xff]  ;;  %v1745_v4 = vld [vmem:[#allocation9 + $0x78] sm:$0xff] }
 0x206   : > { %6657 = vmatpush1.bf16.msra.mxu0 %v8534_v63  ;;  %6686 = vmatpush3.bf16.msra.mxu1 %v8570_v59  ;;  %v8817_v57 = vpack.c.bf16 %v1746_v52, %v1743_v12  ;;  %v1744_v17 = vld [vmem:[#allocation9 + $0x70] sm:$0xff]  ;;  %v8820_v62 = vpack.c.bf16 %v1745_v4, %v1742_v29  ;;  %v1771_v39 = vld [vmem:[#allocation9 + $0x148] sm:$0xff]  ;;  %v1773_v53 = vld [vmem:[#allocation9 + $0x158] sm:$0xff] }
 0x207   : > { %1072 = vst [vmem:[%s8409_s12 + $0x38] sm:$0x1] %v1056_v37  ;;  %6659 = vmatprep.subr.bf16.mxu0 %v8538_v1  ;;  %6687 = vmatprep.subr.bf16.mxu1 %v8021_v8  ;;  %v8823_v37 = vpack.c.bf16 %v1747_v7, %v1744_v17  ;;  %v8863_v43 = vpack.c.bf16 %v1771_v39, %v1768_v18  ;;  %v1776_v27 = vld [vmem:[#allocation9 + $0x170] sm:$0xff]  ;;  %v1775_v29 = vld [vmem:[#allocation9 + $0x168] sm:$0xff]  ;;  %v1774_v4 = vld [vmem:[#allocation9 + $0x160] sm:$0xff] }
 0x208   : > { %v7539_v38 = vpop.eup %7538  ;;  %v8867_v12 = vpack.c.bf16 %v1776_v27, %v1773_v53  ;;  %v1772_v52 = vld [vmem:[#allocation9 + $0x150] sm:$0xff]  ;;  %v1777_v7 = vld [vmem:[#allocation9 + $0x178] sm:$0xff]  ;;  %v5514_v18 = vld [vmem:[%s8384_s18 + $0x28] sm:$0xff] }
 0x209   : > { %v983_v49 = vmul.f32 %v7539_v38, %v945_v46  ;;  %v1749_v46 = vld [vmem:[#allocation9 + $0x98] sm:$0xff]  ;;  %v1752_v38 = vld [vmem:[#allocation9 + $0xb0] sm:$0xff]  ;;  %v8870_v17 = vpack.c.bf16 %v1775_v29, %v1772_v52 }
 0x20a   : > { %6661 = vmatpush1.bf16.msra.mxu0 %v8547_v22  ;;  %6689 = vmatpush3.bf16.msra.mxu1 %v8583_v32  ;;  %v5515_v53 = vld [vmem:[%s8394_s16 + $0x90] sm:$0xff] }
 0x20b   : > { %v984_v61 = vadd.f32 %v5499_v55, %v983_v49  ;;  %6663 = vmatprep.subr.bf16.mxu0 %v8552_v26  ;;  %6690 = vmatprep.subr.bf16.mxu1 %v8021_v8  ;;  %v8827_v55 = vpack.c.bf16 %v1752_v38, %v1749_v46  ;;  %v1748_v49 = vld [vmem:[#allocation9 + $0x90] sm:$0xff]  ;;  %v8873_v46 = vpack.c.bf16 %v1777_v7, %v1774_v4  ;;  %v1920_v38 = vld [vmem:[#allocation10 + $0x8] sm:$0xff] }
 0x20c   : > { %v7541_v63 = vpop.eup %7540 }
 0x20d   : > { %7542 = vtanh.f32 %v984_v61  ;;  %v986_v1 = vsub.f32 1.0, %v7541_v63  ;;  %v1751_v61 = vld [vmem:[#allocation9 + $0xa8] sm:$0xff] }
 0x20e   : > { %6665 = vmatpush1.bf16.msra.mxu0 %v8563_v47  ;;  %6692 = vmatpush3.bf16.msra.mxu1 %v8595_v58  ;;  %v988_v47 = vmul.f32 %v7541_v63, %v8609_v25  ;;  %v1750_v63 = vld [vmem:[#allocation9 + $0xa0] sm:$0xff] }
 0x20f   : > { %6667 = vmatprep.subr.bf16.mxu0 %v8567_v51  ;;  %6693 = vmatprep.subr.bf16.mxu1 %v8021_v8  ;;  %v1003_v51 = vpop.permute.xlu0 %1002 }
 0x210   : > { %vm1004_vm3 = vcmp.eq.s32.totalorder %v1003_v51, 1  ;;  %v1758_v51 = vld [vmem:[#allocation9 + $0xe0] sm:$0xff] }
 0x212   : > { %6669 = vmatpush1.bf16.msra.mxu0 %v8576_v6  ;;  %6695 = vmatpush3.bf16.msra.mxu1 %v8605_v14 }
 0x213   : > { %6671 = vmatprep.subr.bf16.mxu0 %v8580_v16  ;;  %6696 = vmatprep.subr.bf16.mxu1 %v8021_v8 }
 0x216   : > { %6673 = vmatpush1.bf16.msra.mxu0 %v8588_v42  ;;  %6698 = vmatpush3.bf16.msra.mxu1 %v8612_v34 }
 0x217   : > { %v7543_v22 = vpop.eup %7542  ;;  %6675 = vmatprep.subr.bf16.mxu0 %v8592_v50  ;;  %6699 = vmatprep.subr.bf16.mxu1 %v8021_v8 }
 0x218   : > { %v987_v26 = vmul.f32 %v7543_v22, %v986_v1  ;;  %v8830_v1 = vpack.c.bf16 %v1751_v61, %v1748_v49  ;;  %v1753_v22 = vld [vmem:[#allocation9 + $0xb8] sm:$0xff]  ;;  %v1923_v49 = vld [vmem:[#allocation10 + $0x20] sm:$0xff] }
 0x219   : > { %v8877_v61 = vpack.c.bf16 %v1923_v49, %v1920_v38 }
 0x21a   : > { %6677 = vmatpush1.bf16.msra.mxu0 %v8600_v3  ;;  %6701 = vmatpush3.bf16.msra.mxu1 %v8620_v41  ;;  %v989_v59 = vadd.f32 %v988_v47, %v987_v26  ;;  %v8833_v26 = vpack.c.bf16 %v1753_v22, %v1750_v63  ;;  %v1755_v47 = vld [vmem:[#allocation9 + $0xc8] sm:$0xff]  ;;  %v5512_v63 = vld [vmem:[%s8384_s18 + $0x18] sm:$0xff] }
 0x21b   : > { %6734 = vmatprep.subr.bf16.mxu1 %v8021_v8  ;;  %6703 = vmatprep.subr.bf16.mxu0 %v8798_v0 }
 0x21c   : > { %v8777_v6 = vsel %vm1004_vm3, %v989_v59, %v8609_v25  ;;  %v1073_v16 = vsel %vm1004_vm3, %v989_v59, 0.0  ;;  %v8837_v59 = vpack.c.bf16 %v1758_v51, %v1755_v47 }
 0x21d   : > { %v1075_v32 = vcombine.high %v1073_v16, %v1073_v16  ;;  %v1082_v42 = vrot.slane %v1073_v16, %v8716_v40  ;;  %1452 = vmatmul.mubr.f32.vlgmr.msra.gmra.mrb[6].mxu0 %v8777_v6  ;;  %6056 = vmatmul.mubr.f32.vlgmr.msra.gmra.mrb[6].mxu1 %v8777_v6  ;;  %v1754_v16 = vld [vmem:[#allocation9 + $0xc0] sm:$0xff] }
 0x21e   : > { %1842 = vmatprep.mubr.f32.mxu0 %v10076_v9  ;;  %6090 = vmatprep.mubr.msk.f32.mxu1 %vm8023_vm0, %v10076_v9 }
 0x21f   : > { %v1089_v50 = vrot.slane %v1075_v32, %v8716_v40  ;;  %v1090_v58 = vcombine.high %v1082_v42, %v1082_v42  ;;  %v1098_v3 = vrot.slane %v1082_v42, %v8716_v40  ;;  %5508 = vst.sshfl [vmem:[%s8411_s10 + $0x7] sm:$0x1 pattern:$0x73625140] %v1082_v42  ;;  %6705 = vmatpush1.bf16.msra.mxu0 %v8800_v21  ;;  %v1757_v32 = vld [vmem:[#allocation9 + $0xd8] sm:$0xff]  ;;  %v1756_v42 = vld [vmem:[#allocation9 + $0xd0] sm:$0xff] }
 0x220   : > { %6736 = vmatpush3.bf16.msra.mxu1 %v8803_v11  ;;  %6707 = vmatprep.subr.bf16.mxu0 %v8807_v33 }
 0x221   : > { %v1091_v14 = vcombine.high %v1089_v50, %v1089_v50  ;;  %v1105_v25 = vrot.slane %v1089_v50, %v8716_v40  ;;  %v1112_v34 = vrot.slane %v1090_v58, %v8716_v40  ;;  %v1120_v41 = vcombine.high %v1098_v3, %v1098_v3  ;;  %5509 = vst.sshfl [vmem:[%s8411_s10 + $0xf] sm:$0x1 pattern:$0x73625140] %v1090_v58  ;;  %v1759_v58 = vld [vmem:[#allocation9 + $0xe8] sm:$0xff] }
 0x222   : > { %5510 = vst.sshfl [vmem:[%s8411_s10 + $0x27] sm:$0x1 pattern:$0x73625140] %v1089_v50  ;;  %6737 = vmatprep.subr.bf16.mxu1 %v8021_v8  ;;  %v8840_v50 = vpack.c.bf16 %v1757_v32, %v1754_v16  ;;  %v8843_v3 = vpack.c.bf16 %v1759_v58, %v1756_v42 }
 0x223   : > { %v1119_v30 = vrot.slane %v1091_v14, %v8716_v40  ;;  %v1121_v45 = vcombine.high %v1105_v25, %v1105_v25  ;;  %v1122_v2 = vcombine.high %v1112_v34, %v1112_v34  ;;  %1134 = vst [vmem:[%s8411_s10 + $0x17] sm:$0x1] %v1120_v41  ;;  %5511 = vst.sshfl [vmem:[%s8411_s10 + $0x2f] sm:$0x1 pattern:$0x73625140] %v1091_v14  ;;  %6709 = vmatpush1.bf16.msra.mxu0 %v8810_v44 }
 0x224   : > { %6739 = vmatpush3.bf16.msra.mxu1 %v8813_v28  ;;  %6711 = vmatprep.subr.bf16.mxu0 %v8817_v57  ;;  %v1761_v14 = vld [vmem:[#allocation9 + $0xf8] sm:$0xff]  ;;  %v1764_v25 = vld [vmem:[#allocation9 + $0x110] sm:$0xff] }
 0x225   : > { %v1123_v54 = vcombine.high %v1119_v30, %v1119_v30  ;;  %1135 = vst [vmem:[%s8411_s10 + $0x1f] sm:$0x1] %v1122_v2  ;;  %1138 = vst [vmem:[%s8411_s10 + $0x37] sm:$0x1] %v1121_v45  ;;  %6740 = vmatprep.subr.bf16.mxu1 %v8021_v8  ;;  %v8847_v34 = vpack.c.bf16 %v1764_v25, %v1761_v14  ;;  %v1760_v41 = vld [vmem:[#allocation9 + $0xf0] sm:$0xff]  ;;  %v1763_v30 = vld [vmem:[#allocation9 + $0x108] sm:$0xff] }
 0x226   : > { %v1762_v45 = vld [vmem:[#allocation9 + $0x100] sm:$0xff]  ;;  %v8850_v2 = vpack.c.bf16 %v1763_v30, %v1760_v41 }
 0x227   : > { %1139 = vst [vmem:[%s8411_s10 + $0x3f] sm:$0x1] %v1123_v54  ;;  %6713 = vmatpush1.bf16.msra.mxu0 %v8820_v62  ;;  %v1765_v54 = vld [vmem:[#allocation9 + $0x118] sm:$0xff]  ;;  %v5513_v14 = vld [vmem:[%s8384_s18 + $0x20] sm:$0xff] }
 0x228   : > { %6742 = vmatpush3.bf16.msra.mxu1 %v8823_v37  ;;  %6715 = vmatprep.subr.bf16.mxu0 %v8827_v55  ;;  %v8853_v56 = vpack.c.bf16 %v1765_v54, %v1762_v45 }
 0x229   : > { %6743 = vmatprep.subr.bf16.mxu1 %v8021_v8 }
 0x22b   : > { %6717 = vmatpush1.bf16.msra.mxu0 %v8830_v1 }
 0x22c   : > { %6745 = vmatpush3.bf16.msra.mxu1 %v8833_v26  ;;  %6719 = vmatprep.subr.bf16.mxu0 %v8837_v59 }
 0x22d   : > { %6746 = vmatprep.subr.bf16.mxu1 %v8021_v8 }
 0x22f   : > { %6721 = vmatpush1.bf16.msra.mxu0 %v8840_v50 }
 0x230   : > { %6748 = vmatpush3.bf16.msra.mxu1 %v8843_v3  ;;  %6723 = vmatprep.subr.bf16.mxu0 %v8847_v34 }
 0x231   : > { %6749 = vmatprep.subr.bf16.mxu1 %v8021_v8 }
 0x233   : > { %6725 = vmatpush1.bf16.msra.mxu0 %v8850_v2 }
 0x234   : > { %6751 = vmatpush3.bf16.msra.mxu1 %v8853_v56  ;;  %6727 = vmatprep.subr.bf16.mxu0 %v8857_v19 }
 0x235   : > { %6752 = vmatprep.subr.bf16.mxu1 %v8021_v8 }
 0x237   : > { %6729 = vmatpush1.bf16.msra.mxu0 %v8860_v23 }
 0x238   : > { %6754 = vmatpush3.bf16.msra.mxu1 %v8863_v43  ;;  %6731 = vmatprep.subr.bf16.mxu0 %v8867_v12 }
 0x239   : > { %6755 = vmatprep.subr.bf16.mxu1 %v8021_v8 }
 0x23b   : > { %6733 = vmatpush1.bf16.msra.mxu0 %v8870_v17 }
 0x23c   : > { %6757 = vmatpush3.bf16.msra.mxu1 %v8873_v46  ;;  %6759 = vmatprep.subr.bf16.mxu0 %v8877_v61 }
 0x23d   : > { %6790 = vmatprep.subr.bf16.mxu1 %v8021_v8 }
 0x2d0   : > { %v1264_v22 = vpop.f32.mrb[4].mxu0  ;;  %v1335_v47 = vpop.f32.mrb[4].mxu1 }
 0x2d1   : > { %v1265_v51 = vadd.f32 %v1264_v22, %v8690_v13  ;;  %v1266_v16 = vpop.f32.mrb[5].mxu0  ;;  %v6022_v32 = vpop.f32.mrb[5].mxu1  ;;  %v1336_v15 = vadd.f32 %v1335_v47, %v8699_v10  ;;  %v5516_v22 = vld [vmem:[%s8394_s16 + $0x98] sm:$0xff] }
 0x2d2   : > { %v1267_v42 = vadd.f32 %v1266_v16, %v8692_v20 }
 0x2d3   : > { %v1528_v58 = vadd.f32 %v5512_v63, %v1265_v51 }
 0x2d4   : > { %v1529_v41 = vadd.f32 %v5513_v14, %v1267_v42 }
 0x2d5   : > { %v5518_v25 = vmul.f32 -1.442695, %v1528_v58  ;;  %v1919_v58 = vld [vmem:[#allocation10] sm:$0xff] }
 0x2d6   : > { %v5519_v30 = vmul.f32 -1.442695, %v1529_v41  ;;  %v1921_v41 = vld [vmem:[#allocation10 + $0x10] sm:$0xff] }
 0x2d7   : > { %7544 = vpow2.f32 %v5518_v25  ;;  %v1922_v25 = vld [vmem:[#allocation10 + $0x18] sm:$0xff] }
 0x2d8   : > { %7546 = vpow2.f32 %v5519_v30  ;;  %v1924_v30 = vld [vmem:[#allocation10 + $0x28] sm:$0xff] }
 0x2e1   : > { %v7545_v45 = vpop.eup %7544 }
 0x2e2   : > { %v1536_v54 = vadd.f32 1.0, %v7545_v45  ;;  %v7547_v60 = vpop.eup %7546  ;;  %v1577_v45 = vpop.permute.xlu1 %1576 }
 0x2e3   : > { %v1537_v5 = vadd.f32 1.0, %v7547_v60  ;;  %vm1578_vm4 = vcmp.eq.s32.totalorder %v1577_v45, 1 }
 0x2e4   : > { %7548 = vrcp.f32 %v1536_v54 }
 0x2e5   : > { %7550 = vrcp.f32 %v1537_v5  ;;  %v1926_v5 = vld [vmem:[#allocation10 + $0x38] sm:$0xff] }
 0x2ee   : > { %v7549_v36 = vpop.eup %7548 }
 0x2ef   : > { %v1542_v39 = vmul.f32 %v7549_v36, %v1336_v15  ;;  %v7551_v16 = vpop.eup %7550  ;;  %v1929_v15 = vld [vmem:[#allocation10 + $0x50] sm:$0xff] }
 0x2f0   : > { %v1453_v27 = vpop.f32.mrb[6].mxu0  ;;  %v8888_v52 = vpop.f32.mrb[6].mxu1  ;;  %v1545_v42 = vsub.f32 1.0, %v7551_v16  ;;  %v1547_v60 = vmul.f32 %v7551_v16, %v8719_v31 }
 0x2f1   : > { %v1543_v29 = vadd.f32 %v5514_v18, %v1542_v39  ;;  %v1454_v4 = vadd.f32 %v1453_v27, %v8705_v24  ;;  %v1455_v7 = vpop.f32.mrb[7].mxu0  ;;  %v6057_v38 = vpop.f32.mrb[7].mxu1  ;;  %v8894_v18 = vpack.c.bf16 %v1922_v25, %v1919_v58  ;;  %v8896_v39 = vpack.c.bf16 %v1924_v30, %v1921_v41  ;;  %v1928_v27 = vld [vmem:[#allocation10 + $0x48] sm:$0xff]  ;;  %v1934_v25 = vld [vmem:[#allocation10 + $0x78] sm:$0xff]  ;;  %v1933_v41 = vld [vmem:[#allocation10 + $0x70] sm:$0xff] }
 0x2f2   : > { %v1456_v49 = vadd.f32 %v1455_v7, %v8708_v35  ;;  %v8898_v7 = vpack.c.bf16 %v1929_v15, %v1926_v5  ;;  %v1930_v38 = vld [vmem:[#allocation10 + $0x58] sm:$0xff]  ;;  %v1941_v15 = vld [vmem:[#allocation10 + $0xb0] sm:$0xff] }
 0x2f3   : > { %7552 = vtanh.f32 %v1543_v29  ;;  %v1549_v63 = vadd.f32 %v5515_v53, %v1454_v4  ;;  %v1925_v53 = vld [vmem:[#allocation10 + $0x30] sm:$0xff]  ;;  %v1927_v29 = vld [vmem:[#allocation10 + $0x40] sm:$0xff]  ;;  %v1938_v5 = vld [vmem:[#allocation10 + $0x98] sm:$0xff] }
 0x2f4   : > { %v1550_v47 = vadd.f32 %v5516_v22, %v1456_v49  ;;  %v1932_v49 = vld [vmem:[#allocation10 + $0x68] sm:$0xff]  ;;  %v8910_v58 = vpack.c.bf16 %v1930_v38, %v1927_v29 }
 0x2f5   : > { %v5520_v51 = vmul.f32 -1.442695, %v1549_v63  ;;  %v1935_v63 = vld [vmem:[#allocation10 + $0x80] sm:$0xff] }
 0x2f6   : > { %v5521_v32 = vmul.f32 -1.442695, %v1550_v47 }
 0x2f7   : > { %7554 = vpow2.f32 %v5520_v51 }
 0x2f8   : > { %7556 = vpow2.f32 %v5521_v32 }
 0x2fd   : > { %v7553_v14 = vpop.eup %7552 }
 0x2fe   : > { %v1546_v54 = vmul.f32 %v7553_v14, %v1545_v42  ;;  %v8908_v42 = vpack.c.bf16 %v1928_v27, %v1925_v53  ;;  %v1931_v14 = vld [vmem:[#allocation10 + $0x60] sm:$0xff] }
 0x2ff   : > { %v8928_v38 = vpack.c.bf16 %v1934_v25, %v1931_v14  ;;  %v1940_v14 = vld [vmem:[#allocation10 + $0xa8] sm:$0xff]  ;;  %v1939_v25 = vld [vmem:[#allocation10 + $0xa0] sm:$0xff] }
 0x300   : > { %v1548_v36 = vadd.f32 %v1547_v60, %v1546_v54  ;;  %v1936_v60 = vld [vmem:[#allocation10 + $0x88] sm:$0xff] }
 0x301   : > { %v7555_v4 = vpop.eup %7554 }
 0x302   : > { %v8901_v22 = vsel %vm1578_vm4, %v1548_v36, %v8719_v31  ;;  %v1586_v51 = vsel %vm1578_vm4, %v1548_v36, 0.0  ;;  %v1557_v47 = vadd.f32 1.0, %v7555_v4  ;;  %v8912_v31 = vpack.c.bf16 %v1935_v63, %v1932_v49  ;;  %v7557_v4 = vpop.eup %7556 }
 0x303   : > { %v1588_v16 = vcombine.high %v1586_v51, %v1586_v51  ;;  %v1595_v32 = vrot.slane %v1586_v51, %v8716_v40  ;;  %1843 = vmatmul.mubr.f32.vlgmr.msra.gmra.mrb[8].mxu0 %v8901_v22  ;;  %6091 = vmatmul.mubr.f32.vlgmr.msra.gmra.mrb[8].mxu1 %v8901_v22  ;;  %v8930_v49 = vpack.c.bf16 %v1936_v60, %v1933_v41  ;;  %v1937_v51 = vld [vmem:[#allocation10 + $0x90] sm:$0xff]  ;;  %v1942_v41 = vld [vmem:[#allocation10 + $0xb8] sm:$0xff]  ;;  %v1558_v60 = vadd.f32 1.0, %v7557_v4 }
 0x304   : > { %7558 = vrcp.f32 %v1557_v47  ;;  %6761 = vmatpush1.bf16.msra.mxu0 %v8894_v18  ;;  %6792 = vmatpush3.bf16.msra.mxu1 %v8896_v39  ;;  %v8932_v63 = vpack.c.bf16 %v1941_v15, %v1938_v5  ;;  %v8943_v5 = vpack.c.bf16 %v1940_v14, %v1937_v51  ;;  %v8945_v15 = vpack.c.bf16 %v1942_v41, %v1939_v25  ;;  %v1945_v4 = vld [vmem:[#allocation10 + $0xd0] sm:$0xff]  ;;  %v1950_v51 = vld [vmem:[#allocation10 + $0xf8] sm:$0xff] }
 0x305   : > { %v1602_v30 = vrot.slane %v1588_v16, %v8716_v40  ;;  %v1603_v45 = vcombine.high %v1595_v32, %v1595_v32  ;;  %v1611_v54 = vrot.slane %v1595_v32, %v8716_v40  ;;  %5522 = vst.sshfl [vmem:[%s8409_s12 + $0x1] sm:$0x1 pattern:$0x73625140] %v1595_v32  ;;  %6763 = vmatprep.subr.bf16.mxu0 %v8898_v7  ;;  %v1953_v14 = vld [vmem:[#allocation10 + $0x110] sm:$0xff]  ;;  %7560 = vrcp.f32 %v1558_v60  ;;  %v1956_v60 = vld [vmem:[#allocation10 + $0x128] sm:$0xff] }
 0x306   : > { %6793 = vmatprep.subr.bf16.mxu1 %v8021_v8  ;;  %2031 = vmatprep.mubr.f32.mxu0 %v10076_v9  ;;  %10147 = vst [vmem:[#allocation35_spill] sm:$0xff] %v8932_v63 }
 0x307   : > { %6125 = vmatprep.mubr.msk.f32.mxu1 %vm8023_vm0, %v10076_v9  ;;  %v1604_v36 = vcombine.high %v1602_v30, %v1602_v30  ;;  %v1618_v53 = vrot.slane %v1602_v30, %v8716_v40  ;;  %v1625_v27 = vrot.slane %v1603_v45, %v8716_v40  ;;  %v1633_v29 = vcombine.high %v1611_v54, %v1611_v54  ;;  %v1952_v9 = vld [vmem:[#allocation10 + $0x108] sm:$0xff] }
 0x308   : > { %5523 = vst.sshfl [vmem:[%s8409_s12 + $0x9] sm:$0x1 pattern:$0x73625140] %v1603_v45  ;;  %6765 = vmatpush1.bf16.msra.mxu0 %v8908_v42  ;;  %6795 = vmatpush3.bf16.msra.mxu1 %v8910_v58  ;;  %v1947_v45 = vld [vmem:[#allocation10 + $0xe0] sm:$0xff] }
 0x309   : > { %5524 = vst.sshfl [vmem:[%s8409_s12 + $0x21] sm:$0x1 pattern:$0x73625140] %v1602_v30  ;;  %v1632_v47 = vrot.slane %v1604_v36, %v8716_v40  ;;  %v1634_v16 = vcombine.high %v1618_v53, %v1618_v53  ;;  %v1635_v32 = vcombine.high %v1625_v27, %v1625_v27  ;;  %1647 = vst [vmem:[%s8409_s12 + $0x11] sm:$0x1] %v1633_v29  ;;  %6767 = vmatprep.subr.bf16.mxu0 %v8912_v31 }
 0x30a   : > { %5525 = vst.sshfl [vmem:[%s8409_s12 + $0x29] sm:$0x1 pattern:$0x73625140] %v1604_v36  ;;  %6796 = vmatprep.subr.bf16.mxu1 %v8021_v8  ;;  %v1944_v30 = vld [vmem:[#allocation10 + $0xc8] sm:$0xff]  ;;  %v1943_v36 = vld [vmem:[#allocation10 + $0xc0] sm:$0xff]  ;;  %v1525_v53 = vadd.f32 %v8888_v52, %v8731_v48 }
 0x30b   : > { %v1636_v54 = vcombine.high %v1632_v47, %v1632_v47  ;;  %1648 = vst [vmem:[%s8409_s12 + $0x19] sm:$0x1] %v1635_v32  ;;  %1651 = vst [vmem:[%s8409_s12 + $0x31] sm:$0x1] %v1634_v16  ;;  %v8952_v27 = vpack.c.bf16 %v1947_v45, %v1944_v30  ;;  %v1946_v29 = vld [vmem:[#allocation10 + $0xd8] sm:$0xff]  ;;  %v1948_v47 = vld [vmem:[#allocation10 + $0xe8] sm:$0xff]  ;;  %v8963_v45 = vpack.c.bf16 %v1953_v14, %v1950_v51 }
 0x30c   : > { %6769 = vmatpush1.bf16.msra.mxu0 %v8928_v38  ;;  %6798 = vmatpush3.bf16.msra.mxu1 %v8930_v49  ;;  %v5517_v32 = vld [vmem:[%s8394_s16 + $0xa0] sm:$0xff]  ;;  %v8957_v52 = vpack.c.bf16 %v1946_v29, %v1943_v36  ;;  %v8959_v41 = vpack.c.bf16 %v1948_v47, %v1945_v4  ;;  %v1957_v51 = vld [vmem:[#allocation10 + $0x130] sm:$0xff]  ;;  %v1960_v14 = vld [vmem:[#allocation10 + $0x148] sm:$0xff] }
 0x30d   : > { %1652 = vst [vmem:[%s8409_s12 + $0x39] sm:$0x1] %v1636_v54  ;;  %6771 = vmatprep.subr.bf16.mxu0 %v8932_v63  ;;  %6799 = vmatprep.subr.bf16.mxu1 %v8021_v8  ;;  %v1949_v54 = vld [vmem:[#allocation10 + $0xf0] sm:$0xff]  ;;  %10149 = vst [vmem:[#allocation37_spill] sm:$0xff] %v8963_v45  ;;  %v1951_v63 = vld [vmem:[#allocation10 + $0x100] sm:$0xff] }
 0x30e   : > { %v7559_v16 = vpop.eup %7558  ;;  %10148 = vst [vmem:[#allocation36_spill] sm:$0xff] %v8959_v41  ;;  %v8967_v36 = vpack.c.bf16 %v1952_v9, %v1949_v54  ;;  %v1955_v4 = vld [vmem:[#allocation10 + $0x120] sm:$0xff]  ;;  %v1961_v54 = vld [vmem:[#allocation10 + $0x150] sm:$0xff] }
 0x30f   : > { %v1563_v25 = vmul.f32 %v7559_v16, %v1525_v53  ;;  %v1954_v53 = vld [vmem:[#allocation10 + $0x118] sm:$0xff]  ;;  %v1959_v16 = vld [vmem:[#allocation10 + $0x140] sm:$0xff] }
 0x310   : > { %6773 = vmatpush1.bf16.msra.mxu0 %v8943_v5  ;;  %6801 = vmatpush3.bf16.msra.mxu1 %v8945_v15  ;;  %v8969_v29 = vpack.c.bf16 %v1954_v53, %v1951_v63  ;;  %v8973_v47 = vpack.c.bf16 %v1959_v16, %v1956_v60  ;;  %v8979_v63 = vpack.c.bf16 %v1960_v14, %v1957_v51  ;;  %v7561_v53 = vpop.eup %7560  ;;  %v1964_v16 = vld [vmem:[#allocation10 + $0x168] sm:$0xff] }
 0x311   : > { %v1564_v30 = vadd.f32 %v5517_v32, %v1563_v25  ;;  %6775 = vmatprep.subr.bf16.mxu0 %v8952_v27  ;;  %6802 = vmatprep.subr.bf16.mxu1 %v8021_v8  ;;  %v1958_v32 = vld [vmem:[#allocation10 + $0x138] sm:$0xff] }
 0x312   : > { %10150 = vst [vmem:[#allocation38_spill] sm:$0xff] %v8969_v29  ;;  %v1962_v25 = vld [vmem:[#allocation10 + $0x158] sm:$0xff]  ;;  %v8977_v9 = vpack.c.bf16 %v1958_v32, %v1955_v4  ;;  %10151 = vst [vmem:[#allocation39_spill] sm:$0xff] %v8979_v63  ;;  %v1566_v32 = vsub.f32 1.0, %v7561_v53 }
 0x313   : > { %7562 = vtanh.f32 %v1564_v30  ;;  %v1965_v30 = vld [vmem:[#allocation10 + $0x170] sm:$0xff] }
 0x314   : > { %6777 = vmatpush1.bf16.msra.mxu0 %v8957_v52  ;;  %6804 = vmatpush3.bf16.msra.mxu1 %v8959_v41  ;;  %v8983_v60 = vpack.c.bf16 %v1965_v30, %v1962_v25  ;;  %v1966_v41 = vld [vmem:[#allocation10 + $0x178] sm:$0xff]  ;;  %v1568_v25 = vmul.f32 %v7561_v53, %v8777_v6  ;;  %v1583_v30 = vpop.permute.xlu1 %1582 }
 0x315   : > { %6779 = vmatprep.subr.bf16.mxu0 %v8963_v45  ;;  %6805 = vmatprep.subr.bf16.mxu1 %v8021_v8  ;;  %v1963_v45 = vld [vmem:[#allocation10 + $0x160] sm:$0xff]  ;;  %vm1584_vm5 = vcmp.eq.s32.totalorder %v1583_v30, 1 }
 0x316   : > { %v8989_v4 = vpack.c.bf16 %v1966_v41, %v1963_v45 }
 0x318   : > { %6781 = vmatpush1.bf16.msra.mxu0 %v8967_v36  ;;  %6807 = vmatpush3.bf16.msra.mxu1 %v8969_v29  ;;  %v8987_v29 = vpack.c.bf16 %v1964_v16, %v1961_v54 }
 0x319   : > { %6783 = vmatprep.subr.bf16.mxu0 %v8973_v47  ;;  %6808 = vmatprep.subr.bf16.mxu1 %v8021_v8 }
 0x31c   : > { %6785 = vmatpush1.bf16.msra.mxu0 %v8977_v9  ;;  %6810 = vmatpush3.bf16.msra.mxu1 %v8979_v63 }
 0x31d   : > { %v7563_v51 = vpop.eup %7562  ;;  %6787 = vmatprep.subr.bf16.mxu0 %v8983_v60  ;;  %6811 = vmatprep.subr.bf16.mxu1 %v8021_v8 }
 0x31e   : > { %v1567_v14 = vmul.f32 %v7563_v51, %v1566_v32 }
 0x320   : > { %6789 = vmatpush1.bf16.msra.mxu0 %v8987_v29  ;;  %6813 = vmatpush3.bf16.msra.mxu1 %v8989_v4  ;;  %v1569_v63 = vadd.f32 %v1568_v25, %v1567_v14 }
 0x321   : > { %6815 = vmatprep.subr.bf16.mxu0 %v8798_v0  ;;  %6846 = vmatprep.subr.bf16.mxu1 %v8021_v8 }
 0x322   : > { %v8999_v41 = vsel %vm1584_vm5, %v1569_v63, %v8777_v6  ;;  %v1653_v45 = vsel %vm1584_vm5, %v1569_v63, 0.0  ;;  %v10152_v63 = vmov 0.0  }
 0x323   : > { %v1655_v54 = vcombine.high %v1653_v45, %v1653_v45  ;;  %v1662_v16 = vrot.slane %v1653_v45, %v8716_v40  ;;  %2032 = vmatmul.mubr.f32.vlgmr.msra.gmra.mrb[10].mxu0 %v8999_v41  ;;  %6126 = vmatmul.mubr.f32.vlgmr.msra.gmra.mrb[10].mxu1 %v8999_v41 }
 0x324   : > { %6817 = vmatpush1.bf16.msra.mxu0 %v8800_v21  ;;  %6848 = vmatpush3.bf16.msra.mxu1 %v8803_v11 }
 0x325   : > { %v1669_v0 = vrot.slane %v1655_v54, %v8716_v40  ;;  %v1670_v53 = vcombine.high %v1662_v16, %v1662_v16  ;;  %v1678_v6 = vrot.slane %v1662_v16, %v8716_v40  ;;  %5526 = vst.sshfl [vmem:[%s8411_s10 + $0x6] sm:$0x1 pattern:$0x73625140] %v1662_v16  ;;  %6819 = vmatprep.subr.bf16.mxu0 %v8807_v33 }
 0x326   : > { %6849 = vmatprep.subr.bf16.mxu1 %v8021_v8  ;;  %2422 = vmatprep.mubr.f32.mxu0 %v10152_v63 }
 0x327   : > { %6160 = vmatprep.mubr.msk.f32.mxu1 %vm8023_vm0, %v10152_v63  ;;  %v1671_v21 = vcombine.high %v1669_v0, %v1669_v0  ;;  %v1685_v11 = vrot.slane %v1669_v0, %v8716_v40  ;;  %v1692_v32 = vrot.slane %v1670_v53, %v8716_v40  ;;  %v1700_v51 = vcombine.high %v1678_v6, %v1678_v6 }
 0x328   : > { %5527 = vst.sshfl [vmem:[%s8411_s10 + $0xe] sm:$0x1 pattern:$0x73625140] %v1670_v53  ;;  %6821 = vmatpush1.bf16.msra.mxu0 %v8810_v44  ;;  %6851 = vmatpush3.bf16.msra.mxu1 %v8813_v28  ;;  %v5530_v44 = vld [vmem:[%s8384_s18 + $0x30] sm:$0xff] }
 0x329   : > { %5528 = vst.sshfl [vmem:[%s8411_s10 + $0x26] sm:$0x1 pattern:$0x73625140] %v1669_v0  ;;  %v1699_v33 = vrot.slane %v1671_v21, %v8716_v40  ;;  %v1701_v14 = vcombine.high %v1685_v11, %v1685_v11  ;;  %v1702_v25 = vcombine.high %v1692_v32, %v1692_v32  ;;  %1714 = vst [vmem:[%s8411_s10 + $0x16] sm:$0x1] %v1700_v51  ;;  %6823 = vmatprep.subr.bf16.mxu0 %v8817_v57 }
 0x32a   : > { %5529 = vst.sshfl [vmem:[%s8411_s10 + $0x2e] sm:$0x1 pattern:$0x73625140] %v1671_v21  ;;  %6852 = vmatprep.subr.bf16.mxu1 %v8021_v8  ;;  %v5534_v32 = vld [vmem:[%s8394_s16 + $0x80] sm:$0xff] }
 0x32b   : > { %v1703_v30 = vcombine.high %v1699_v33, %v1699_v33  ;;  %1715 = vst [vmem:[%s8411_s10 + $0x1e] sm:$0x1] %v1702_v25  ;;  %1718 = vst [vmem:[%s8411_s10 + $0x36] sm:$0x1] %v1701_v14 }
 0x32c   : > { %6825 = vmatpush1.bf16.msra.mxu0 %v8820_v62  ;;  %6854 = vmatpush3.bf16.msra.mxu1 %v8823_v37 }
 0x32d   : > { %1719 = vst [vmem:[%s8411_s10 + $0x3e] sm:$0x1] %v1703_v30  ;;  %6827 = vmatprep.subr.bf16.mxu0 %v8827_v55  ;;  %6855 = vmatprep.subr.bf16.mxu1 %v8021_v8 }
 0x330   : > { %6829 = vmatpush1.bf16.msra.mxu0 %v8830_v1  ;;  %6857 = vmatpush3.bf16.msra.mxu1 %v8833_v26 }
 0x331   : > { %6831 = vmatprep.subr.bf16.mxu0 %v8837_v59  ;;  %6858 = vmatprep.subr.bf16.mxu1 %v8021_v8  ;;  %v5531_v59 = vld [vmem:[%s8384_s18 + $0x38] sm:$0xff] }
 0x334   : > { %6833 = vmatpush1.bf16.msra.mxu0 %v8840_v50  ;;  %6860 = vmatpush3.bf16.msra.mxu1 %v8843_v3 }
 0x335   : > { %6835 = vmatprep.subr.bf16.mxu0 %v8847_v34  ;;  %6861 = vmatprep.subr.bf16.mxu1 %v8021_v8 }
 0x338   : > { %6837 = vmatpush1.bf16.msra.mxu0 %v8850_v2  ;;  %6863 = vmatpush3.bf16.msra.mxu1 %v8853_v56 }
 0x339   : > { %6839 = vmatprep.subr.bf16.mxu0 %v8857_v19  ;;  %6864 = vmatprep.subr.bf16.mxu1 %v8021_v8 }
 0x33c   : > { %6841 = vmatpush1.bf16.msra.mxu0 %v8860_v23  ;;  %6866 = vmatpush3.bf16.msra.mxu1 %v8863_v43 }
 0x33d   : > { %6843 = vmatprep.subr.bf16.mxu0 %v8867_v12  ;;  %6867 = vmatprep.subr.bf16.mxu1 %v8021_v8 }
 0x340   : > { %6845 = vmatpush1.bf16.msra.mxu0 %v8870_v17  ;;  %6869 = vmatpush3.bf16.msra.mxu1 %v8873_v46  ;;  %v5532_v17 = vld [vmem:[%s8384_s18 + $0x40] sm:$0xff] }
 0x341   : > { %6871 = vmatprep.subr.bf16.mxu0 %v8877_v61  ;;  %6902 = vmatprep.subr.bf16.mxu1 %v8021_v8  ;;  %v5533_v61 = vld [vmem:[%s8394_s16 + $0x78] sm:$0xff] }
 0x3d6   : > { %v1844_v28 = vpop.f32.mrb[8].mxu0  ;;  %v1915_v57 = vpop.f32.mrb[8].mxu1 }
 0x3d7   : > { %v1845_v62 = vadd.f32 %v1844_v28, %v8690_v13  ;;  %v1846_v37 = vpop.f32.mrb[9].mxu0  ;;  %v6092_v55 = vpop.f32.mrb[9].mxu1  ;;  %v1916_v43 = vadd.f32 %v1915_v57, %v8699_v10 }
 0x3d8   : > { %v1847_v1 = vadd.f32 %v1846_v37, %v8692_v20 }
 0x3d9   : > { %v2108_v26 = vadd.f32 %v5530_v44, %v1845_v62  ;;  %v2157_v62 = vpop.permute.xlu0 %2156 }
 0x3da   : > { %v2109_v3 = vadd.f32 %v5531_v59, %v1847_v1  ;;  %vm2158_vm6 = vcmp.eq.s32.totalorder %v2157_v62, 1 }
 0x3db   : > { %v5536_v50 = vmul.f32 -1.442695, %v2108_v26 }
 0x3dc   : > { %v5537_v34 = vmul.f32 -1.442695, %v2109_v3 }
 0x3dd   : > { %7564 = vpow2.f32 %v5536_v50 }
 0x3de   : > { %7566 = vpow2.f32 %v5537_v34 }
 0x3e7   : > { %v7565_v2 = vpop.eup %7564 }
 0x3e8   : > { %v2116_v56 = vadd.f32 1.0, %v7565_v2  ;;  %v7567_v19 = vpop.eup %7566 }
 0x3e9   : > { %v2117_v23 = vadd.f32 1.0, %v7567_v19 }
 0x3ea   : > { %7568 = vrcp.f32 %v2116_v56 }
 0x3eb   : > { %7570 = vrcp.f32 %v2117_v23 }
 0x3f4   : > { %v7569_v12 = vpop.eup %7568 }
 0x3f5   : > { %v2122_v46 = vmul.f32 %v7569_v12, %v1916_v43  ;;  %v7571_v14 = vpop.eup %7570 }
 0x3f6   : > { %v2033_v45 = vpop.f32.mrb[10].mxu0  ;;  %v9059_v54 = vpop.f32.mrb[10].mxu1  ;;  %v2125_v30 = vsub.f32 1.0, %v7571_v14  ;;  %v2127_v57 = vmul.f32 %v7571_v14, %v8901_v22 }
 0x3f7   : > { %v2123_v16 = vadd.f32 %v5532_v17, %v2122_v46  ;;  %v2034_v0 = vadd.f32 %v2033_v45, %v8705_v24  ;;  %v2035_v53 = vpop.f32.mrb[11].mxu0  ;;  %v6127_v6 = vpop.f32.mrb[11].mxu1 }
 0x3f8   : > { %v2036_v21 = vadd.f32 %v2035_v53, %v8708_v35  ;;  %v2163_v53 = vpop.permute.xlu1 %2162 }
 0x3f9   : > { %7572 = vtanh.f32 %v2123_v16  ;;  %v2129_v11 = vadd.f32 %v5533_v61, %v2034_v0  ;;  %vm2164_vm7 = vcmp.eq.s32.totalorder %v2163_v53, 1  ;;  %v2918_v53 = vld [vmem:[#allocation9 + $0xe0] sm:$0xff] }
 0x3fa   : > { %v2130_v33 = vadd.f32 %v5534_v32, %v2036_v21 }
 0x3fb   : > { %v5538_v51 = vmul.f32 -1.442695, %v2129_v11 }
 0x3fc   : > { %v5539_v25 = vmul.f32 -1.442695, %v2130_v33 }
 0x3fd   : > { %7574 = vpow2.f32 %v5538_v51 }
 0x3fe   : > { %7576 = vpow2.f32 %v5539_v25 }
 0x403   : > { %v7573_v44 = vpop.eup %7572 }
 0x404   : > { %v2126_v28 = vmul.f32 %v7573_v44, %v2125_v30 }
 0x406   : > { %v2128_v37 = vadd.f32 %v2127_v57, %v2126_v28  ;;  %v2891_v28 = vld [vmem:[#allocation9 + $0x8] sm:$0xff]  ;;  %v2894_v57 = vld [vmem:[#allocation9 + $0x20] sm:$0xff] }
 0x407   : > { %v7575_v55 = vpop.eup %7574  ;;  %v9144_v62 = vpack.c.bf16 %v2894_v57, %v2891_v28  ;;  %v2927_v57 = vld [vmem:[#allocation9 + $0x128] sm:$0xff] }
 0x408   : > { %v2137_v1 = vadd.f32 1.0, %v7575_v55  ;;  %v9066_v26 = vsel %vm2158_vm6, %v2128_v37, %v8901_v22  ;;  %v2166_v59 = vsel %vm2158_vm6, %v2128_v37, 0.0  ;;  %v2890_v37 = vld [vmem:[#allocation9] sm:$0xff]  ;;  %v2893_v55 = vld [vmem:[#allocation9 + $0x18] sm:$0xff] }
 0x409   : > { %v2168_v50 = vcombine.high %v2166_v59, %v2166_v59  ;;  %v2175_v3 = vrot.slane %v2166_v59, %v8716_v40  ;;  %2423 = vmatmul.mubr.f32.vlgmr.msra.gmra.mrb[12].mxu0 %v9066_v26  ;;  %6161 = vmatmul.mubr.f32.vlgmr.msra.gmra.mrb[12].mxu1 %v9066_v26  ;;  %v9146_v59 = vpack.c.bf16 %v2893_v55, %v2890_v37  ;;  %v2930_v37 = vld [vmem:[#allocation9 + $0x140] sm:$0xff] }
 0x40a   : > { %7578 = vrcp.f32 %v2137_v1  ;;  %6873 = vmatpush1.bf16.msra.mxu0 %v8894_v18  ;;  %6904 = vmatpush3.bf16.msra.mxu1 %v8896_v39  ;;  %v2892_v1 = vld [vmem:[#allocation9 + $0x10] sm:$0xff]  ;;  %v9203_v55 = vpack.c.bf16 %v2930_v37, %v2927_v57 }
 0x40b   : > { %v2182_v34 = vrot.slane %v2168_v50, %v8716_v40  ;;  %v2183_v2 = vcombine.high %v2175_v3, %v2175_v3  ;;  %v2191_v22 = vrot.slane %v2175_v3, %v8716_v40  ;;  %5540 = vst.sshfl [vmem:[%s8409_s12 + $0x2] sm:$0x1 pattern:$0x73625140] %v2175_v3  ;;  %6875 = vmatprep.subr.bf16.mxu0 %v8898_v7  ;;  %v7577_v7 = vpop.eup %7576  ;;  %v2895_v50 = vld [vmem:[#allocation9 + $0x28] sm:$0xff] }
 0x40c   : > { %6905 = vmatprep.subr.bf16.mxu1 %v8021_v8  ;;  %2611 = vmatprep.mubr.f32.mxu0 %v10152_v63  ;;  %v2138_v17 = vadd.f32 1.0, %v7577_v7  ;;  %v9149_v3 = vpack.c.bf16 %v2895_v50, %v2892_v1  ;;  %v2901_v7 = vld [vmem:[#allocation9 + $0x58] sm:$0xff]  ;;  %v2926_v1 = vld [vmem:[#allocation9 + $0x120] sm:$0xff] }
 0x40d   : > { %6195 = vmatprep.mubr.msk.f32.mxu1 %vm8023_vm0, %v10152_v63  ;;  %v2184_v18 = vcombine.high %v2182_v34, %v2182_v34  ;;  %v2198_v39 = vrot.slane %v2182_v34, %v8716_v40  ;;  %v2205_v56 = vrot.slane %v2183_v2, %v8716_v40  ;;  %v2213_v19 = vcombine.high %v2191_v22, %v2191_v22  ;;  %v2929_v50 = vld [vmem:[#allocation9 + $0x138] sm:$0xff] }
 0x40e   : > { %5541 = vst.sshfl [vmem:[%s8409_s12 + $0xa] sm:$0x1 pattern:$0x73625140] %v2183_v2  ;;  %6877 = vmatpush1.bf16.msra.mxu0 %v8908_v42  ;;  %6907 = vmatpush3.bf16.msra.mxu1 %v8910_v58  ;;  %v2105_v42 = vadd.f32 %v9059_v54, %v8731_v48  ;;  %v10153_v58 = vld [vmem:[#allocation35_spill] sm:$0xff]  ;;  %7580 = vrcp.f32 %v2138_v17  ;;  %v10156_v54 = vld [vmem:[#allocation38_spill] sm:$0xff] }
 0x40f   : > { %5542 = vst.sshfl [vmem:[%s8409_s12 + $0x22] sm:$0x1 pattern:$0x73625140] %v2182_v34  ;;  %v2212_v23 = vrot.slane %v2184_v18, %v8716_v40  ;;  %v2214_v43 = vcombine.high %v2198_v39, %v2198_v39  ;;  %v2215_v12 = vcombine.high %v2205_v56, %v2205_v56  ;;  %2227 = vst [vmem:[%s8409_s12 + $0x12] sm:$0x1] %v2213_v19  ;;  %6879 = vmatprep.subr.bf16.mxu0 %v8912_v31 }
 0x410   : > { %5543 = vst.sshfl [vmem:[%s8409_s12 + $0x2a] sm:$0x1 pattern:$0x73625140] %v2184_v18  ;;  %6908 = vmatprep.subr.bf16.mxu1 %v8021_v8  ;;  %v5535_v31 = vld [vmem:[%s8394_s16 + $0x88] sm:$0xff]  ;;  %v2897_v34 = vld [vmem:[#allocation9 + $0x38] sm:$0xff] }
 0x411   : > { %v2216_v46 = vcombine.high %v2212_v23, %v2212_v23  ;;  %2228 = vst [vmem:[%s8409_s12 + $0x1a] sm:$0x1] %v2215_v12  ;;  %2231 = vst [vmem:[%s8409_s12 + $0x32] sm:$0x1] %v2214_v43  ;;  %v2900_v2 = vld [vmem:[#allocation9 + $0x50] sm:$0xff]  ;;  %v2899_v39 = vld [vmem:[#allocation9 + $0x48] sm:$0xff] }
 0x412   : > { %6881 = vmatpush1.bf16.msra.mxu0 %v8928_v38  ;;  %6910 = vmatpush3.bf16.msra.mxu1 %v8930_v49  ;;  %v10154_v38 = vld [vmem:[#allocation36_spill] sm:$0xff]  ;;  %v10155_v49 = vld [vmem:[#allocation37_spill] sm:$0xff]  ;;  %v9153_v22 = vpack.c.bf16 %v2900_v2, %v2897_v34  ;;  %v2896_v18 = vld [vmem:[#allocation9 + $0x30] sm:$0xff]  ;;  %v9206_v2 = vpack.c.bf16 %v2929_v50, %v2926_v1 }
 0x413   : > { %2232 = vst [vmem:[%s8409_s12 + $0x3a] sm:$0x1] %v2216_v46  ;;  %6883 = vmatprep.subr.bf16.mxu0 %v10153_v58  ;;  %6911 = vmatprep.subr.bf16.mxu1 %v8021_v8  ;;  %v2898_v56 = vld [vmem:[#allocation9 + $0x40] sm:$0xff]  ;;  %v9156_v19 = vpack.c.bf16 %v2899_v39, %v2896_v18  ;;  %v2903_v43 = vld [vmem:[#allocation9 + $0x68] sm:$0xff]  ;;  %v2904_v58 = vld [vmem:[#allocation9 + $0x70] sm:$0xff] }
 0x414   : > { %v7579_v61 = vpop.eup %7578  ;;  %v9159_v23 = vpack.c.bf16 %v2901_v7, %v2898_v56  ;;  %v2906_v12 = vld [vmem:[#allocation9 + $0x80] sm:$0xff]  ;;  %v2928_v34 = vld [vmem:[#allocation9 + $0x130] sm:$0xff]  ;;  %v2931_v18 = vld [vmem:[#allocation9 + $0x148] sm:$0xff] }
 0x415   : > { %v2143_v45 = vmul.f32 %v7579_v61, %v2105_v42  ;;  %v9163_v17 = vpack.c.bf16 %v2906_v12, %v2903_v43  ;;  %v2902_v46 = vld [vmem:[#allocation9 + $0x60] sm:$0xff]  ;;  %v2905_v42 = vld [vmem:[#allocation9 + $0x78] sm:$0xff]  ;;  %v9209_v39 = vpack.c.bf16 %v2931_v18, %v2928_v34  ;;  %v2936_v7 = vld [vmem:[#allocation9 + $0x170] sm:$0xff] }
 0x416   : > { %6885 = vmatpush1.bf16.msra.mxu0 %v8943_v5  ;;  %6913 = vmatpush3.bf16.msra.mxu1 %v8945_v15  ;;  %v10157_v15 = vld [vmem:[#allocation39_spill] sm:$0xff]  ;;  %v9166_v61 = vpack.c.bf16 %v2905_v42, %v2902_v46  ;;  %v2932_v12 = vld [vmem:[#allocation9 + $0x150] sm:$0xff]  ;;  %v2935_v46 = vld [vmem:[#allocation9 + $0x168] sm:$0xff] }
 0x417   : > { %v2144_v16 = vadd.f32 %v5535_v31, %v2143_v45  ;;  %6887 = vmatprep.subr.bf16.mxu0 %v8952_v27  ;;  %6914 = vmatprep.subr.bf16.mxu1 %v8021_v8  ;;  %v2907_v31 = vld [vmem:[#allocation9 + $0x88] sm:$0xff]  ;;  %v2933_v56 = vld [vmem:[#allocation9 + $0x158] sm:$0xff]  ;;  %v2934_v42 = vld [vmem:[#allocation9 + $0x160] sm:$0xff] }
 0x418   : > { %v7581_v5 = vpop.eup %7580  ;;  %v9169_v45 = vpack.c.bf16 %v2907_v31, %v2904_v58  ;;  %v9213_v43 = vpack.c.bf16 %v2936_v7, %v2933_v56  ;;  %v9216_v58 = vpack.c.bf16 %v2935_v46, %v2932_v12  ;;  %v2937_v31 = vld [vmem:[#allocation9 + $0x178] sm:$0xff]  ;;  %v5551_v56 = vld [vmem:[%s8394_s16 + $0x60] sm:$0xff] }
 0x419   : > { %7582 = vtanh.f32 %v2144_v16  ;;  %v2146_v27 = vsub.f32 1.0, %v7581_v5  ;;  %v2909_v16 = vld [vmem:[#allocation9 + $0x98] sm:$0xff] }
 0x41a   : > { %6889 = vmatpush1.bf16.msra.mxu0 %v8957_v52  ;;  %6916 = vmatpush3.bf16.msra.mxu1 %v10154_v38  ;;  %v2912_v38 = vld [vmem:[#allocation9 + $0xb0] sm:$0xff]  ;;  %v5550_v34 = vld [vmem:[%s8384_s18 + $0x58] sm:$0xff] }
 0x41b   : > { %6891 = vmatprep.subr.bf16.mxu0 %v10155_v49  ;;  %6917 = vmatprep.subr.bf16.mxu1 %v8021_v8  ;;  %v9173_v49 = vpack.c.bf16 %v2912_v38, %v2909_v16  ;;  %v9219_v16 = vpack.c.bf16 %v2937_v31, %v2934_v42  ;;  %v3080_v38 = vld [vmem:[#allocation10 + $0x8] sm:$0xff] }
 0x41e   : > { %6893 = vmatpush1.bf16.msra.mxu0 %v8967_v36  ;;  %6919 = vmatpush3.bf16.msra.mxu1 %v10156_v54  ;;  %v2148_v36 = vmul.f32 %v7581_v5, %v8999_v41  ;;  %v2908_v54 = vld [vmem:[#allocation9 + $0x90] sm:$0xff]  ;;  %v2911_v5 = vld [vmem:[#allocation9 + $0xa8] sm:$0xff] }
 0x41f   : > { %6895 = vmatprep.subr.bf16.mxu0 %v8973_v47  ;;  %6920 = vmatprep.subr.bf16.mxu1 %v8021_v8 }
 0x422   : > { %6897 = vmatpush1.bf16.msra.mxu0 %v8977_v9  ;;  %6922 = vmatpush3.bf16.msra.mxu1 %v10157_v15  ;;  %v2910_v15 = vld [vmem:[#allocation9 + $0xa0] sm:$0xff] }
 0x423   : > { %v7583_v52 = vpop.eup %7582  ;;  %6899 = vmatprep.subr.bf16.mxu0 %v8983_v60  ;;  %6923 = vmatprep.subr.bf16.mxu1 %v8021_v8 }
 0x424   : > { %v2147_v0 = vmul.f32 %v7583_v52, %v2146_v27  ;;  %v9176_v27 = vpack.c.bf16 %v2911_v5, %v2908_v54  ;;  %v2913_v52 = vld [vmem:[#allocation9 + $0xb8] sm:$0xff]  ;;  %v3083_v54 = vld [vmem:[#allocation10 + $0x20] sm:$0xff] }
 0x425   : > { %v9223_v5 = vpack.c.bf16 %v3083_v54, %v3080_v38 }
 0x426   : > { %6901 = vmatpush1.bf16.msra.mxu0 %v8987_v29  ;;  %6925 = vmatpush3.bf16.msra.mxu1 %v8989_v4  ;;  %v2149_v47 = vadd.f32 %v2148_v36, %v2147_v0  ;;  %v9179_v0 = vpack.c.bf16 %v2913_v52, %v2910_v15  ;;  %v2915_v36 = vld [vmem:[#allocation9 + $0xc8] sm:$0xff] }
 0x427   : > { %6958 = vmatprep.subr.bf16.mxu1 %v8021_v8  ;;  %6927 = vmatprep.subr.bf16.mxu0 %v9144_v62  ;;  %v5548_v15 = vld [vmem:[%s8384_s18 + $0x48] sm:$0xff] }
 0x428   : > { %v9123_v9 = vsel %vm2164_vm7, %v2149_v47, %v8999_v41  ;;  %v2233_v60 = vsel %vm2164_vm7, %v2149_v47, 0.0  ;;  %v9183_v47 = vpack.c.bf16 %v2918_v53, %v2915_v36 }
 0x429   : > { %v2235_v6 = vcombine.high %v2233_v60, %v2233_v60  ;;  %v2242_v21 = vrot.slane %v2233_v60, %v8716_v40  ;;  %2612 = vmatmul.mubr.f32.vlgmr.msra.gmra.mrb[14].mxu0 %v9123_v9  ;;  %6196 = vmatmul.mubr.f32.vlgmr.msra.gmra.mrb[14].mxu1 %v9123_v9  ;;  %v2914_v60 = vld [vmem:[#allocation9 + $0xc0] sm:$0xff] }
 0x42a   : > { %3002 = vmatprep.mubr.f32.mxu0 %v10152_v63  ;;  %6230 = vmatprep.mubr.msk.f32.mxu1 %vm8023_vm0, %v10152_v63 }
 0x42b   : > { %v2249_v29 = vrot.slane %v2235_v6, %v8716_v40  ;;  %v2250_v4 = vcombine.high %v2242_v21, %v2242_v21  ;;  %v2258_v41 = vrot.slane %v2242_v21, %v8716_v40  ;;  %5544 = vst.sshfl [vmem:[%s8411_s10 + $0x5] sm:$0x1 pattern:$0x73625140] %v2242_v21  ;;  %6929 = vmatpush1.bf16.msra.mxu0 %v9146_v59  ;;  %v2917_v6 = vld [vmem:[#allocation9 + $0xd8] sm:$0xff]  ;;  %v2916_v21 = vld [vmem:[#allocation9 + $0xd0] sm:$0xff] }
 0x42c   : > { %6960 = vmatpush3.bf16.msra.mxu1 %v9149_v3  ;;  %6931 = vmatprep.subr.bf16.mxu0 %v9153_v22 }
 0x42d   : > { %v2251_v11 = vcombine.high %v2249_v29, %v2249_v29  ;;  %v2265_v32 = vrot.slane %v2249_v29, %v8716_v40  ;;  %v2272_v51 = vrot.slane %v2250_v4, %v8716_v40  ;;  %v2280_v33 = vcombine.high %v2258_v41, %v2258_v41  ;;  %5545 = vst.sshfl [vmem:[%s8411_s10 + $0xd] sm:$0x1 pattern:$0x73625140] %v2250_v4  ;;  %v2919_v4 = vld [vmem:[#allocation9 + $0xe8] sm:$0xff] }
 0x42e   : > { %5546 = vst.sshfl [vmem:[%s8411_s10 + $0x25] sm:$0x1 pattern:$0x73625140] %v2249_v29  ;;  %6961 = vmatprep.subr.bf16.mxu1 %v8021_v8  ;;  %v9186_v29 = vpack.c.bf16 %v2917_v6, %v2914_v60  ;;  %v9189_v41 = vpack.c.bf16 %v2919_v4, %v2916_v21 }
 0x42f   : > { %v2279_v14 = vrot.slane %v2251_v11, %v8716_v40  ;;  %v2281_v25 = vcombine.high %v2265_v32, %v2265_v32  ;;  %v2282_v30 = vcombine.high %v2272_v51, %v2272_v51  ;;  %2294 = vst [vmem:[%s8411_s10 + $0x15] sm:$0x1] %v2280_v33  ;;  %5547 = vst.sshfl [vmem:[%s8411_s10 + $0x2d] sm:$0x1 pattern:$0x73625140] %v2251_v11  ;;  %6933 = vmatpush1.bf16.msra.mxu0 %v9156_v19 }
 0x430   : > { %6963 = vmatpush3.bf16.msra.mxu1 %v9159_v23  ;;  %6935 = vmatprep.subr.bf16.mxu0 %v9163_v17  ;;  %v2921_v11 = vld [vmem:[#allocation9 + $0xf8] sm:$0xff]  ;;  %v2924_v32 = vld [vmem:[#allocation9 + $0x110] sm:$0xff] }
 0x431   : > { %v2283_v44 = vcombine.high %v2279_v14, %v2279_v14  ;;  %2295 = vst [vmem:[%s8411_s10 + $0x1d] sm:$0x1] %v2282_v30  ;;  %2298 = vst [vmem:[%s8411_s10 + $0x35] sm:$0x1] %v2281_v25  ;;  %6964 = vmatprep.subr.bf16.mxu1 %v8021_v8  ;;  %v9193_v51 = vpack.c.bf16 %v2924_v32, %v2921_v11  ;;  %v2920_v33 = vld [vmem:[#allocation9 + $0xf0] sm:$0xff]  ;;  %v2923_v14 = vld [vmem:[#allocation9 + $0x108] sm:$0xff] }
 0x432   : > { %v2922_v25 = vld [vmem:[#allocation9 + $0x100] sm:$0xff]  ;;  %v9196_v30 = vpack.c.bf16 %v2923_v14, %v2920_v33  ;;  %v5549_v11 = vld [vmem:[%s8384_s18 + $0x50] sm:$0xff] }
 0x433   : > { %2299 = vst [vmem:[%s8411_s10 + $0x3d] sm:$0x1] %v2283_v44  ;;  %6937 = vmatpush1.bf16.msra.mxu0 %v9166_v61  ;;  %v2925_v44 = vld [vmem:[#allocation9 + $0x118] sm:$0xff] }
 0x434   : > { %6966 = vmatpush3.bf16.msra.mxu1 %v9169_v45  ;;  %6939 = vmatprep.subr.bf16.mxu0 %v9173_v49  ;;  %v9199_v28 = vpack.c.bf16 %v2925_v44, %v2922_v25 }
 0x435   : > { %6967 = vmatprep.subr.bf16.mxu1 %v8021_v8 }
 0x437   : > { %6941 = vmatpush1.bf16.msra.mxu0 %v9176_v27 }
 0x438   : > { %6969 = vmatpush3.bf16.msra.mxu1 %v9179_v0  ;;  %6943 = vmatprep.subr.bf16.mxu0 %v9183_v47 }
 0x439   : > { %6970 = vmatprep.subr.bf16.mxu1 %v8021_v8 }
 0x43b   : > { %6945 = vmatpush1.bf16.msra.mxu0 %v9186_v29 }
 0x43c   : > { %6972 = vmatpush3.bf16.msra.mxu1 %v9189_v41  ;;  %6947 = vmatprep.subr.bf16.mxu0 %v9193_v51 }
 0x43d   : > { %6973 = vmatprep.subr.bf16.mxu1 %v8021_v8 }
 0x43f   : > { %6949 = vmatpush1.bf16.msra.mxu0 %v9196_v30 }
 0x440   : > { %6975 = vmatpush3.bf16.msra.mxu1 %v9199_v28  ;;  %6951 = vmatprep.subr.bf16.mxu0 %v9203_v55 }
 0x441   : > { %6976 = vmatprep.subr.bf16.mxu1 %v8021_v8 }
 0x443   : > { %6953 = vmatpush1.bf16.msra.mxu0 %v9206_v2 }
 0x444   : > { %6978 = vmatpush3.bf16.msra.mxu1 %v9209_v39  ;;  %6955 = vmatprep.subr.bf16.mxu0 %v9213_v43 }
 0x445   : > { %6979 = vmatprep.subr.bf16.mxu1 %v8021_v8 }
 0x447   : > { %6957 = vmatpush1.bf16.msra.mxu0 %v9216_v58 }
 0x448   : > { %6981 = vmatpush3.bf16.msra.mxu1 %v9219_v16  ;;  %6983 = vmatprep.subr.bf16.mxu0 %v9223_v5 }
 0x449   : > { %7014 = vmatprep.subr.bf16.mxu1 %v8021_v8 }
 0x4dc   : > { %v2424_v52 = vpop.f32.mrb[12].mxu0  ;;  %v2495_v36 = vpop.f32.mrb[12].mxu1 }
 0x4dd   : > { %v2425_v53 = vadd.f32 %v2424_v52, %v8690_v13  ;;  %v2426_v60 = vpop.f32.mrb[13].mxu0  ;;  %v6162_v6 = vpop.f32.mrb[13].mxu1  ;;  %v2496_v1 = vadd.f32 %v2495_v36, %v8699_v10  ;;  %v5552_v52 = vld [vmem:[%s8394_s16 + $0x68] sm:$0xff] }
 0x4de   : > { %v2427_v21 = vadd.f32 %v2426_v60, %v8692_v20 }
 0x4df   : > { %v2688_v4 = vadd.f32 %v5548_v15, %v2425_v53 }
 0x4e0   : > { %v2689_v33 = vadd.f32 %v5549_v11, %v2427_v21 }
 0x4e1   : > { %v5554_v32 = vmul.f32 -1.442695, %v2688_v4  ;;  %v3079_v4 = vld [vmem:[#allocation10] sm:$0xff] }
 0x4e2   : > { %v5555_v14 = vmul.f32 -1.442695, %v2689_v33  ;;  %v3081_v33 = vld [vmem:[#allocation10 + $0x10] sm:$0xff] }
 0x4e3   : > { %7584 = vpow2.f32 %v5554_v32  ;;  %v3082_v32 = vld [vmem:[#allocation10 + $0x18] sm:$0xff] }
 0x4e4   : > { %7586 = vpow2.f32 %v5555_v14  ;;  %v3084_v14 = vld [vmem:[#allocation10 + $0x28] sm:$0xff] }
 0x4ed   : > { %v7585_v25 = vpop.eup %7584 }
 0x4ee   : > { %v2696_v44 = vadd.f32 1.0, %v7585_v25  ;;  %v7587_v57 = vpop.eup %7586 }
 0x4ef   : > { %v2697_v37 = vadd.f32 1.0, %v7587_v57  ;;  %v3086_v57 = vld [vmem:[#allocation10 + $0x38] sm:$0xff] }
 0x4f0   : > { %7588 = vrcp.f32 %v2696_v44 }
 0x4f1   : > { %7590 = vrcp.f32 %v2697_v37  ;;  %v3089_v37 = vld [vmem:[#allocation10 + $0x50] sm:$0xff] }
 0x4fa   : > { %v7589_v50 = vpop.eup %7588 }
 0x4fb   : > { %v2702_v18 = vmul.f32 %v7589_v50, %v2496_v1  ;;  %v7591_v60 = vpop.eup %7590  ;;  %v2737_v1 = vpop.permute.xlu0 %2736 }
 0x4fc   : > { %v2613_v7 = vpop.f32.mrb[14].mxu0  ;;  %v9234_v12 = vpop.f32.mrb[14].mxu1  ;;  %v2705_v21 = vsub.f32 1.0, %v7591_v60  ;;  %v2707_v44 = vmul.f32 %v7591_v60, %v9066_v26  ;;  %vm2738_vm8 = vcmp.eq.s32.totalorder %v2737_v1, 1  ;;  %v3101_v1 = vld [vmem:[#allocation10 + $0xb0] sm:$0xff] }
 0x4fd   : > { %v2703_v46 = vadd.f32 %v5550_v34, %v2702_v18  ;;  %v2614_v42 = vadd.f32 %v2613_v7, %v8705_v24  ;;  %v2615_v31 = vpop.f32.mrb[15].mxu0  ;;  %v6197_v38 = vpop.f32.mrb[15].mxu1  ;;  %v9240_v34 = vpack.c.bf16 %v3082_v32, %v3079_v4  ;;  %v9242_v18 = vpack.c.bf16 %v3084_v14, %v3081_v33  ;;  %v3088_v7 = vld [vmem:[#allocation10 + $0x48] sm:$0xff]  ;;  %v3094_v32 = vld [vmem:[#allocation10 + $0x78] sm:$0xff]  ;;  %v3093_v33 = vld [vmem:[#allocation10 + $0x70] sm:$0xff] }
 0x4fe   : > { %v2616_v54 = vadd.f32 %v2615_v31, %v8708_v35  ;;  %v9244_v31 = vpack.c.bf16 %v3089_v37, %v3086_v57  ;;  %v3090_v38 = vld [vmem:[#allocation10 + $0x58] sm:$0xff]  ;;  %v3096_v57 = vld [vmem:[#allocation10 + $0x88] sm:$0xff] }
 0x4ff   : > { %7592 = vtanh.f32 %v2703_v46  ;;  %v2709_v15 = vadd.f32 %v5551_v56, %v2614_v42  ;;  %v3085_v56 = vld [vmem:[#allocation10 + $0x30] sm:$0xff]  ;;  %v3087_v46 = vld [vmem:[#allocation10 + $0x40] sm:$0xff]  ;;  %v3098_v37 = vld [vmem:[#allocation10 + $0x98] sm:$0xff] }
 0x500   : > { %v2710_v36 = vadd.f32 %v5552_v52, %v2616_v54  ;;  %v3092_v54 = vld [vmem:[#allocation10 + $0x68] sm:$0xff]  ;;  %v9256_v4 = vpack.c.bf16 %v3090_v38, %v3087_v46 }
 0x501   : > { %v5556_v53 = vmul.f32 -1.442695, %v2709_v15  ;;  %v3095_v15 = vld [vmem:[#allocation10 + $0x80] sm:$0xff] }
 0x502   : > { %v5557_v6 = vmul.f32 -1.442695, %v2710_v36 }
 0x503   : > { %7594 = vpow2.f32 %v5556_v53 }
 0x504   : > { %7596 = vpow2.f32 %v5557_v6 }
 0x509   : > { %v7593_v11 = vpop.eup %7592 }
 0x50a   : > { %v2706_v25 = vmul.f32 %v7593_v11, %v2705_v21  ;;  %v9254_v21 = vpack.c.bf16 %v3088_v7, %v3085_v56  ;;  %v3091_v11 = vld [vmem:[#allocation10 + $0x60] sm:$0xff] }
 0x50b   : > { %v9274_v38 = vpack.c.bf16 %v3094_v32, %v3091_v11  ;;  %v3100_v11 = vld [vmem:[#allocation10 + $0xa8] sm:$0xff]  ;;  %v3099_v32 = vld [vmem:[#allocation10 + $0xa0] sm:$0xff] }
 0x50c   : > { %v2708_v50 = vadd.f32 %v2707_v44, %v2706_v25 }
 0x50d   : > { %v7595_v42 = vpop.eup %7594 }
 0x50e   : > { %v2717_v52 = vadd.f32 1.0, %v7595_v42  ;;  %v9247_v53 = vsel %vm2738_vm8, %v2708_v50, %v9066_v26  ;;  %v2746_v36 = vsel %vm2738_vm8, %v2708_v50, 0.0  ;;  %v9258_v26 = vpack.c.bf16 %v3095_v15, %v3092_v54  ;;  %v7597_v42 = vpop.eup %7596 }
 0x50f   : > { %v2748_v60 = vcombine.high %v2746_v36, %v2746_v36  ;;  %v2755_v6 = vrot.slane %v2746_v36, %v8716_v40  ;;  %3003 = vmatmul.mubr.f32.vlgmr.msra.gmra.mrb[16].mxu0 %v9247_v53  ;;  %6231 = vmatmul.mubr.f32.vlgmr.msra.gmra.mrb[16].mxu1 %v9247_v53  ;;  %v9276_v54 = vpack.c.bf16 %v3096_v57, %v3093_v33  ;;  %v3102_v33 = vld [vmem:[#allocation10 + $0xb8] sm:$0xff] }
 0x510   : > { %7598 = vrcp.f32 %v2717_v52  ;;  %6985 = vmatpush1.bf16.msra.mxu0 %v9240_v34  ;;  %7016 = vmatpush3.bf16.msra.mxu1 %v9242_v18  ;;  %v9278_v15 = vpack.c.bf16 %v3101_v1, %v3098_v37  ;;  %v3097_v52 = vld [vmem:[#allocation10 + $0x90] sm:$0xff]  ;;  %v9291_v1 = vpack.c.bf16 %v3102_v33, %v3099_v32 }
 0x511   : > { %v2762_v14 = vrot.slane %v2748_v60, %v8716_v40  ;;  %v2763_v25 = vcombine.high %v2755_v6, %v2755_v6  ;;  %v2771_v44 = vrot.slane %v2755_v6, %v8716_v40  ;;  %5558 = vst.sshfl [vmem:[%s8409_s12 + $0x3] sm:$0x1 pattern:$0x73625140] %v2755_v6  ;;  %6987 = vmatprep.subr.bf16.mxu0 %v9244_v31 }
 0x512   : > { %7017 = vmatprep.subr.bf16.mxu1 %v8021_v8  ;;  %3191 = vmatprep.mubr.f32.mxu0 %v10152_v63  ;;  %10158 = vst [vmem:[#allocation35_spill] sm:$0xff] %v9278_v15  ;;  %v9289_v37 = vpack.c.bf16 %v3100_v11, %v3097_v52  ;;  %v3110_v52 = vld [vmem:[#allocation10 + $0xf8] sm:$0xff]  ;;  %v3113_v11 = vld [vmem:[#allocation10 + $0x110] sm:$0xff] }
 0x513   : > { %6265 = vmatprep.mubr.msk.f32.mxu1 %vm8023_vm0, %v10152_v63  ;;  %v2764_v50 = vcombine.high %v2762_v14, %v2762_v14  ;;  %v2778_v56 = vrot.slane %v2762_v14, %v8716_v40  ;;  %v2785_v7 = vrot.slane %v2763_v25, %v8716_v40  ;;  %v2793_v46 = vcombine.high %v2771_v44, %v2771_v44 }
 0x514   : > { %5559 = vst.sshfl [vmem:[%s8409_s12 + $0xb] sm:$0x1 pattern:$0x73625140] %v2763_v25  ;;  %6989 = vmatpush1.bf16.msra.mxu0 %v9254_v21  ;;  %7019 = vmatpush3.bf16.msra.mxu1 %v9256_v4  ;;  %v3107_v25 = vld [vmem:[#allocation10 + $0xe0] sm:$0xff]  ;;  %v2718_v44 = vadd.f32 1.0, %v7597_v42 }
 0x515   : > { %5560 = vst.sshfl [vmem:[%s8409_s12 + $0x23] sm:$0x1 pattern:$0x73625140] %v2762_v14  ;;  %v2792_v36 = vrot.slane %v2764_v50, %v8716_v40  ;;  %v2794_v60 = vcombine.high %v2778_v56, %v2778_v56  ;;  %v2795_v6 = vcombine.high %v2785_v7, %v2785_v7  ;;  %2807 = vst [vmem:[%s8409_s12 + $0x13] sm:$0x1] %v2793_v46  ;;  %6991 = vmatprep.subr.bf16.mxu0 %v9258_v26 }
 0x516   : > { %5561 = vst.sshfl [vmem:[%s8409_s12 + $0x2b] sm:$0x1 pattern:$0x73625140] %v2764_v50  ;;  %7020 = vmatprep.subr.bf16.mxu1 %v8021_v8  ;;  %v3104_v14 = vld [vmem:[#allocation10 + $0xc8] sm:$0xff]  ;;  %v3103_v50 = vld [vmem:[#allocation10 + $0xc0] sm:$0xff]  ;;  %v2685_v56 = vadd.f32 %v9234_v12, %v8731_v48  ;;  %7600 = vrcp.f32 %v2718_v44 }
 0x517   : > { %v2796_v57 = vcombine.high %v2792_v36, %v2792_v36  ;;  %2808 = vst [vmem:[%s8409_s12 + $0x1b] sm:$0x1] %v2795_v6  ;;  %2811 = vst [vmem:[%s8409_s12 + $0x33] sm:$0x1] %v2794_v60  ;;  %v9298_v7 = vpack.c.bf16 %v3107_v25, %v3104_v14  ;;  %v3106_v46 = vld [vmem:[#allocation10 + $0xd8] sm:$0xff]  ;;  %v3105_v42 = vld [vmem:[#allocation10 + $0xd0] sm:$0xff]  ;;  %v9309_v25 = vpack.c.bf16 %v3113_v11, %v3110_v52 }
 0x518   : > { %6993 = vmatpush1.bf16.msra.mxu0 %v9274_v38  ;;  %7022 = vmatpush3.bf16.msra.mxu1 %v9276_v54  ;;  %v3108_v36 = vld [vmem:[#allocation10 + $0xe8] sm:$0xff]  ;;  %v5553_v6 = vld [vmem:[%s8394_s16 + $0x70] sm:$0xff]  ;;  %v9303_v12 = vpack.c.bf16 %v3106_v46, %v3103_v50  ;;  %v3111_v48 = vld [vmem:[#allocation10 + $0x100] sm:$0xff] }
 0x519   : > { %2812 = vst [vmem:[%s8409_s12 + $0x3b] sm:$0x1] %v2796_v57  ;;  %6995 = vmatprep.subr.bf16.mxu0 %v9278_v15  ;;  %7023 = vmatprep.subr.bf16.mxu1 %v8021_v8  ;;  %v9305_v33 = vpack.c.bf16 %v3108_v36, %v3105_v42  ;;  %v3109_v57 = vld [vmem:[#allocation10 + $0xf0] sm:$0xff]  ;;  %10160 = vst [vmem:[#allocation37_spill] sm:$0xff] %v9309_v25  ;;  %v3112_v15 = vld [vmem:[#allocation10 + $0x108] sm:$0xff] }
 0x51a   : > { %v7599_v60 = vpop.eup %7598  ;;  %v3116_v44 = vld [vmem:[#allocation10 + $0x128] sm:$0xff]  ;;  %v9313_v50 = vpack.c.bf16 %v3112_v15, %v3109_v57  ;;  %v3115_v42 = vld [vmem:[#allocation10 + $0x120] sm:$0xff]  ;;  %v3117_v52 = vld [vmem:[#allocation10 + $0x130] sm:$0xff] }
 0x51b   : > { %v2723_v32 = vmul.f32 %v7599_v60, %v2685_v56  ;;  %10159 = vst [vmem:[#allocation36_spill] sm:$0xff] %v9305_v33  ;;  %v3114_v56 = vld [vmem:[#allocation10 + $0x118] sm:$0xff]  ;;  %v3119_v60 = vld [vmem:[#allocation10 + $0x140] sm:$0xff]  ;;  %v3120_v11 = vld [vmem:[#allocation10 + $0x148] sm:$0xff] }
 0x51c   : > { %6997 = vmatpush1.bf16.msra.mxu0 %v9289_v37  ;;  %7025 = vmatpush3.bf16.msra.mxu1 %v9291_v1  ;;  %v9315_v46 = vpack.c.bf16 %v3114_v56, %v3111_v48  ;;  %v9319_v36 = vpack.c.bf16 %v3119_v60, %v3116_v44  ;;  %v9325_v48 = vpack.c.bf16 %v3120_v11, %v3117_v52  ;;  %v3121_v57 = vld [vmem:[#allocation10 + $0x150] sm:$0xff]  ;;  %v3124_v60 = vld [vmem:[#allocation10 + $0x168] sm:$0xff] }
 0x51d   : > { %v2724_v14 = vadd.f32 %v5553_v6, %v2723_v32  ;;  %6999 = vmatprep.subr.bf16.mxu0 %v9298_v7  ;;  %7026 = vmatprep.subr.bf16.mxu1 %v8021_v8  ;;  %v3118_v6 = vld [vmem:[#allocation10 + $0x138] sm:$0xff] }
 0x51e   : > { %10161 = vst [vmem:[#allocation38_spill] sm:$0xff] %v9315_v46  ;;  %v3122_v32 = vld [vmem:[#allocation10 + $0x158] sm:$0xff]  ;;  %v9323_v15 = vpack.c.bf16 %v3118_v6, %v3115_v42  ;;  %10162 = vst [vmem:[#allocation39_spill] sm:$0xff] %v9325_v48 }
 0x51f   : > { %7602 = vtanh.f32 %v2724_v14  ;;  %v3125_v14 = vld [vmem:[#allocation10 + $0x170] sm:$0xff] }
 0x520   : > { %7001 = vmatpush1.bf16.msra.mxu0 %v9303_v12  ;;  %7028 = vmatpush3.bf16.msra.mxu1 %v9305_v33  ;;  %v7601_v56 = vpop.eup %7600  ;;  %v9329_v44 = vpack.c.bf16 %v3125_v14, %v3122_v32  ;;  %v3126_v33 = vld [vmem:[#allocation10 + $0x178] sm:$0xff]  ;;  %v2743_v14 = vpop.permute.xlu1 %2742 }
 0x521   : > { %7003 = vmatprep.subr.bf16.mxu0 %v9309_v25  ;;  %7029 = vmatprep.subr.bf16.mxu1 %v8021_v8  ;;  %v3123_v25 = vld [vmem:[#allocation10 + $0x160] sm:$0xff]  ;;  %v2726_v6 = vsub.f32 1.0, %v7601_v56  ;;  %v2728_v32 = vmul.f32 %v7601_v56, %v9123_v9  ;;  %vm2744_vm9 = vcmp.eq.s32.totalorder %v2743_v14, 1 }
 0x522   : > { %v9335_v42 = vpack.c.bf16 %v3126_v33, %v3123_v25 }
 0x524   : > { %7005 = vmatpush1.bf16.msra.mxu0 %v9313_v50  ;;  %7031 = vmatpush3.bf16.msra.mxu1 %v9315_v46  ;;  %v9333_v46 = vpack.c.bf16 %v3124_v60, %v3121_v57 }
 0x525   : > { %7007 = vmatprep.subr.bf16.mxu0 %v9319_v36  ;;  %7032 = vmatprep.subr.bf16.mxu1 %v8021_v8 }
 0x528   : > { %7009 = vmatpush1.bf16.msra.mxu0 %v9323_v15  ;;  %7034 = vmatpush3.bf16.msra.mxu1 %v9325_v48 }
 0x529   : > { %v7603_v52 = vpop.eup %7602  ;;  %7011 = vmatprep.subr.bf16.mxu0 %v9329_v44  ;;  %7035 = vmatprep.subr.bf16.mxu1 %v8021_v8 }
 0x52a   : > { %v2727_v11 = vmul.f32 %v7603_v52, %v2726_v6 }
 0x52c   : > { %7013 = vmatpush1.bf16.msra.mxu0 %v9333_v46  ;;  %7037 = vmatpush3.bf16.msra.mxu1 %v9335_v42  ;;  %v2729_v48 = vadd.f32 %v2728_v32, %v2727_v11 }
 0x52d   : > { %7039 = vmatprep.subr.bf16.mxu0 %v9144_v62  ;;  %7070 = vmatprep.subr.bf16.mxu1 %v8021_v8 }
 0x52e   : > { %v9345_v33 = vsel %vm2744_vm9, %v2729_v48, %v9123_v9  ;;  %v2813_v25 = vsel %vm2744_vm9, %v2729_v48, 0.0 }
 0x52f   : > { %v2815_v57 = vcombine.high %v2813_v25, %v2813_v25  ;;  %v2822_v60 = vrot.slane %v2813_v25, %v8716_v40  ;;  %3192 = vmatmul.mubr.f32.vlgmr.msra.gmra.mrb[18].mxu0 %v9345_v33  ;;  %6266 = vmatmul.mubr.f32.vlgmr.msra.gmra.mrb[18].mxu1 %v9345_v33 }
 0x530   : > { %7041 = vmatpush1.bf16.msra.mxu0 %v9146_v59  ;;  %7072 = vmatpush3.bf16.msra.mxu1 %v9149_v3 }
 0x531   : > { %v2829_v62 = vrot.slane %v2815_v57, %v8716_v40  ;;  %v2830_v56 = vcombine.high %v2822_v60, %v2822_v60  ;;  %v2838_v9 = vrot.slane %v2822_v60, %v8716_v40  ;;  %5562 = vst.sshfl [vmem:[%s8411_s10 + $0x4] sm:$0x1 pattern:$0x73625140] %v2822_v60  ;;  %7043 = vmatprep.subr.bf16.mxu0 %v9153_v22 }
 0x532   : > { %7073 = vmatprep.subr.bf16.mxu1 %v8021_v8  ;;  %3582 = vmatprep.mubr.f32.mxu0 %v10152_v63 }
 0x533   : > { %6300 = vmatprep.mubr.msk.f32.mxu1 %vm8023_vm0, %v10152_v63  ;;  %v2831_v59 = vcombine.high %v2829_v62, %v2829_v62  ;;  %v2845_v3 = vrot.slane %v2829_v62, %v8716_v40  ;;  %v2852_v48 = vrot.slane %v2830_v56, %v8716_v40  ;;  %v2860_v6 = vcombine.high %v2838_v9, %v2838_v9 }
 0x534   : > { %5563 = vst.sshfl [vmem:[%s8411_s10 + $0xc] sm:$0x1 pattern:$0x73625140] %v2830_v56  ;;  %7045 = vmatpush1.bf16.msra.mxu0 %v9156_v19  ;;  %7075 = vmatpush3.bf16.msra.mxu1 %v9159_v23  ;;  %v5566_v19 = vld [vmem:[%s8384_s18 + $0x60] sm:$0xff] }
 0x535   : > { %5564 = vst.sshfl [vmem:[%s8411_s10 + $0x24] sm:$0x1 pattern:$0x73625140] %v2829_v62  ;;  %v2859_v22 = vrot.slane %v2831_v59, %v8716_v40  ;;  %v2861_v52 = vcombine.high %v2845_v3, %v2845_v3  ;;  %v2862_v11 = vcombine.high %v2852_v48, %v2852_v48  ;;  %2874 = vst [vmem:[%s8411_s10 + $0x14] sm:$0x1] %v2860_v6  ;;  %7047 = vmatprep.subr.bf16.mxu0 %v9163_v17 }
 0x536   : > { %5565 = vst.sshfl [vmem:[%s8411_s10 + $0x2c] sm:$0x1 pattern:$0x73625140] %v2831_v59  ;;  %7076 = vmatprep.subr.bf16.mxu1 %v8021_v8  ;;  %v5570_v3 = vld [vmem:[%s8394_s16 + $0x50] sm:$0xff] }
 0x537   : > { %v2863_v32 = vcombine.high %v2859_v22, %v2859_v22  ;;  %2875 = vst [vmem:[%s8411_s10 + $0x1c] sm:$0x1] %v2862_v11  ;;  %2878 = vst [vmem:[%s8411_s10 + $0x34] sm:$0x1] %v2861_v52 }
 0x538   : > { %7049 = vmatpush1.bf16.msra.mxu0 %v9166_v61  ;;  %7078 = vmatpush3.bf16.msra.mxu1 %v9169_v45 }
 0x539   : > { %2879 = vst [vmem:[%s8411_s10 + $0x3c] sm:$0x1] %v2863_v32  ;;  %7051 = vmatprep.subr.bf16.mxu0 %v9173_v49  ;;  %7079 = vmatprep.subr.bf16.mxu1 %v8021_v8 }
 0x53c   : > { %7053 = vmatpush1.bf16.msra.mxu0 %v9176_v27  ;;  %7081 = vmatpush3.bf16.msra.mxu1 %v9179_v0 }
 0x53d   : > { %7055 = vmatprep.subr.bf16.mxu0 %v9183_v47  ;;  %7082 = vmatprep.subr.bf16.mxu1 %v8021_v8  ;;  %v5567_v47 = vld [vmem:[%s8384_s18 + $0x68] sm:$0xff] }
 0x540   : > { %7057 = vmatpush1.bf16.msra.mxu0 %v9186_v29  ;;  %7084 = vmatpush3.bf16.msra.mxu1 %v9189_v41 }
 0x541   : > { %7059 = vmatprep.subr.bf16.mxu0 %v9193_v51  ;;  %7085 = vmatprep.subr.bf16.mxu1 %v8021_v8 }
 0x544   : > { %7061 = vmatpush1.bf16.msra.mxu0 %v9196_v30  ;;  %7087 = vmatpush3.bf16.msra.mxu1 %v9199_v28 }
 0x545   : > { %7063 = vmatprep.subr.bf16.mxu0 %v9203_v55  ;;  %7088 = vmatprep.subr.bf16.mxu1 %v8021_v8 }
 0x548   : > { %7065 = vmatpush1.bf16.msra.mxu0 %v9206_v2  ;;  %7090 = vmatpush3.bf16.msra.mxu1 %v9209_v39 }
 0x549   : > { %7067 = vmatprep.subr.bf16.mxu0 %v9213_v43  ;;  %7091 = vmatprep.subr.bf16.mxu1 %v8021_v8 }
 0x54c   : > { %7069 = vmatpush1.bf16.msra.mxu0 %v9216_v58  ;;  %7093 = vmatpush3.bf16.msra.mxu1 %v9219_v16  ;;  %v5568_v58 = vld [vmem:[%s8384_s18 + $0x70] sm:$0xff] }
 0x54d   : > { %7095 = vmatprep.subr.bf16.mxu0 %v9223_v5  ;;  %7126 = vmatprep.subr.bf16.mxu1 %v8021_v8  ;;  %v5569_v5 = vld [vmem:[%s8394_s16 + $0x48] sm:$0xff] }
 0x5e2   : > { %v3004_v23 = vpop.f32.mrb[16].mxu0  ;;  %v3075_v17 = vpop.f32.mrb[16].mxu1 }
 0x5e3   : > { %v3005_v61 = vadd.f32 %v3004_v23, %v8690_v13  ;;  %v3006_v45 = vpop.f32.mrb[17].mxu0  ;;  %v6232_v49 = vpop.f32.mrb[17].mxu1  ;;  %v3076_v39 = vadd.f32 %v3075_v17, %v8699_v10 }
 0x5e4   : > { %v3007_v27 = vadd.f32 %v3006_v45, %v8692_v20  ;;  %v3317_v17 = vpop.permute.xlu0 %3316 }
 0x5e5   : > { %v3268_v0 = vadd.f32 %v5566_v19, %v3005_v61  ;;  %vm3318_vm10 = vcmp.eq.s32.totalorder %v3317_v17, 1 }
 0x5e6   : > { %v3269_v41 = vadd.f32 %v5567_v47, %v3007_v27 }
 0x5e7   : > { %v5572_v29 = vmul.f32 -1.442695, %v3268_v0 }
 0x5e8   : > { %v5573_v51 = vmul.f32 -1.442695, %v3269_v41 }
 0x5e9   : > { %7604 = vpow2.f32 %v5572_v29 }
 0x5ea   : > { %7606 = vpow2.f32 %v5573_v51 }
 0x5f3   : > { %v7605_v30 = vpop.eup %7604 }
 0x5f4   : > { %v3276_v28 = vadd.f32 1.0, %v7605_v30  ;;  %v7607_v55 = vpop.eup %7606 }
 0x5f5   : > { %v3277_v2 = vadd.f32 1.0, %v7607_v55 }
 0x5f6   : > { %7608 = vrcp.f32 %v3276_v28 }
 0x5f7   : > { %7610 = vrcp.f32 %v3277_v2 }
 0x600   : > { %v7609_v43 = vpop.eup %7608 }
 0x601   : > { %v3282_v16 = vmul.f32 %v7609_v43, %v3076_v39  ;;  %v7611_v22 = vpop.eup %7610 }
 0x602   : > { %v3193_v14 = vpop.f32.mrb[18].mxu0  ;;  %v9405_v25 = vpop.f32.mrb[18].mxu1  ;;  %v3285_v11 = vsub.f32 1.0, %v7611_v22  ;;  %v3287_v23 = vmul.f32 %v7611_v22, %v9247_v53 }
 0x603   : > { %v3283_v57 = vadd.f32 %v5568_v58, %v3282_v16  ;;  %v3194_v60 = vadd.f32 %v3193_v14, %v8705_v24  ;;  %v3195_v62 = vpop.f32.mrb[19].mxu0  ;;  %v6267_v56 = vpop.f32.mrb[19].mxu1  ;;  %v10164_v16 = vld [vmem:[#allocation35_spill] sm:$0xff] }
 0x604   : > { %v3196_v9 = vadd.f32 %v3195_v62, %v8708_v35  ;;  %v3323_v62 = vpop.permute.xlu1 %3322 }
 0x605   : > { %7612 = vtanh.f32 %v3283_v57  ;;  %v3289_v59 = vadd.f32 %v5569_v5, %v3194_v60  ;;  %vm3324_vm11 = vcmp.eq.s32.totalorder %v3323_v62, 1  ;;  %v4078_v62 = vld [vmem:[#allocation9 + $0xe0] sm:$0xff] }
 0x606   : > { %v3290_v6 = vadd.f32 %v5570_v3, %v3196_v9 }
 0x607   : > { %v5574_v48 = vmul.f32 -1.442695, %v3289_v59 }
 0x608   : > { %v5575_v52 = vmul.f32 -1.442695, %v3290_v6 }
 0x609   : > { %7614 = vpow2.f32 %v5574_v48 }
 0x60a   : > { %7616 = vpow2.f32 %v5575_v52 }
 0x60f   : > { %v7613_v32 = vpop.eup %7612 }
 0x610   : > { %v3286_v19 = vmul.f32 %v7613_v32, %v3285_v11 }
 0x612   : > { %v3288_v61 = vadd.f32 %v3287_v23, %v3286_v19  ;;  %v4051_v19 = vld [vmem:[#allocation9 + $0x8] sm:$0xff]  ;;  %v4054_v23 = vld [vmem:[#allocation9 + $0x20] sm:$0xff] }
 0x613   : > { %v7615_v45 = vpop.eup %7614  ;;  %v9490_v17 = vpack.c.bf16 %v4054_v23, %v4051_v19  ;;  %v4087_v23 = vld [vmem:[#allocation9 + $0x128] sm:$0xff] }
 0x614   : > { %v3297_v49 = vadd.f32 1.0, %v7615_v45  ;;  %v9412_v27 = vsel %vm3318_vm10, %v3288_v61, %v9247_v53  ;;  %v3326_v0 = vsel %vm3318_vm10, %v3288_v61, 0.0  ;;  %v4050_v61 = vld [vmem:[#allocation9] sm:$0xff]  ;;  %v4053_v45 = vld [vmem:[#allocation9 + $0x18] sm:$0xff] }
 0x615   : > { %v3328_v47 = vcombine.high %v3326_v0, %v3326_v0  ;;  %v3335_v29 = vrot.slane %v3326_v0, %v8716_v40  ;;  %3583 = vmatmul.mubr.f32.vlgmr.msra.gmra.mrb[20].mxu0 %v9412_v27  ;;  %6301 = vmatmul.mubr.f32.vlgmr.msra.gmra.mrb[20].mxu1 %v9412_v27  ;;  %v9492_v0 = vpack.c.bf16 %v4053_v45, %v4050_v61  ;;  %v4090_v61 = vld [vmem:[#allocation9 + $0x140] sm:$0xff] }
 0x616   : > { %7618 = vrcp.f32 %v3297_v49  ;;  %7097 = vmatpush1.bf16.msra.mxu0 %v9240_v34  ;;  %7128 = vmatpush3.bf16.msra.mxu1 %v9242_v18  ;;  %v4052_v49 = vld [vmem:[#allocation9 + $0x10] sm:$0xff]  ;;  %v9549_v45 = vpack.c.bf16 %v4090_v61, %v4087_v23 }
 0x617   : > { %v3342_v41 = vrot.slane %v3328_v47, %v8716_v40  ;;  %v3343_v51 = vcombine.high %v3335_v29, %v3335_v29  ;;  %v3351_v53 = vrot.slane %v3335_v29, %v8716_v40  ;;  %5576 = vst.sshfl [vmem:[%s8409_s12 + $0x4] sm:$0x1 pattern:$0x73625140] %v3335_v29  ;;  %7099 = vmatprep.subr.bf16.mxu0 %v9244_v31  ;;  %v7617_v31 = vpop.eup %7616  ;;  %v4055_v47 = vld [vmem:[#allocation9 + $0x28] sm:$0xff] }
 0x618   : > { %7129 = vmatprep.subr.bf16.mxu1 %v8021_v8  ;;  %3771 = vmatprep.mubr.f32.mxu0 %v10152_v63  ;;  %v3298_v43 = vadd.f32 1.0, %v7617_v31  ;;  %v9495_v29 = vpack.c.bf16 %v4055_v47, %v4052_v49  ;;  %v4061_v31 = vld [vmem:[#allocation9 + $0x58] sm:$0xff]  ;;  %v4086_v49 = vld [vmem:[#allocation9 + $0x120] sm:$0xff] }
 0x619   : > { %6335 = vmatprep.mubr.msk.f32.mxu1 %vm8023_vm0, %v10152_v63  ;;  %v3344_v34 = vcombine.high %v3342_v41, %v3342_v41  ;;  %v3358_v18 = vrot.slane %v3342_v41, %v8716_v40  ;;  %v3365_v30 = vrot.slane %v3343_v51, %v8716_v40  ;;  %v3373_v28 = vcombine.high %v3351_v53, %v3351_v53  ;;  %v4089_v47 = vld [vmem:[#allocation9 + $0x138] sm:$0xff] }
 0x61a   : > { %5577 = vst.sshfl [vmem:[%s8409_s12 + $0xc] sm:$0x1 pattern:$0x73625140] %v3343_v51  ;;  %7101 = vmatpush1.bf16.msra.mxu0 %v9254_v21  ;;  %7131 = vmatpush3.bf16.msra.mxu1 %v9256_v4  ;;  %v10163_v21 = vld [vmem:[#allocation34_spill] sm:$0xff]  ;;  %7620 = vrcp.f32 %v3298_v43 }
 0x61b   : > { %5578 = vst.sshfl [vmem:[%s8409_s12 + $0x24] sm:$0x1 pattern:$0x73625140] %v3342_v41  ;;  %v3372_v55 = vrot.slane %v3344_v34, %v8716_v40  ;;  %v3374_v2 = vcombine.high %v3358_v18, %v3358_v18  ;;  %v3375_v39 = vcombine.high %v3365_v30, %v3365_v30  ;;  %3387 = vst [vmem:[%s8409_s12 + $0x14] sm:$0x1] %v3373_v28  ;;  %7103 = vmatprep.subr.bf16.mxu0 %v9258_v26 }
 0x61c   : > { %5579 = vst.sshfl [vmem:[%s8409_s12 + $0x2c] sm:$0x1 pattern:$0x73625140] %v3344_v34  ;;  %7132 = vmatprep.subr.bf16.mxu1 %v8021_v8  ;;  %v3265_v4 = vadd.f32 %v9405_v25, %v10163_v21  ;;  %v5571_v26 = vld [vmem:[%s8394_s16 + $0x58] sm:$0xff]  ;;  %v10167_v25 = vld [vmem:[#allocation38_spill] sm:$0xff] }
 0x61d   : > { %v3376_v58 = vcombine.high %v3372_v55, %v3372_v55  ;;  %3388 = vst [vmem:[%s8409_s12 + $0x1c] sm:$0x1] %v3375_v39  ;;  %3391 = vst [vmem:[%s8409_s12 + $0x34] sm:$0x1] %v3374_v2  ;;  %v4057_v41 = vld [vmem:[#allocation9 + $0x38] sm:$0xff]  ;;  %v4060_v51 = vld [vmem:[#allocation9 + $0x50] sm:$0xff] }
 0x61e   : > { %7105 = vmatpush1.bf16.msra.mxu0 %v9274_v38  ;;  %7134 = vmatpush3.bf16.msra.mxu1 %v9276_v54  ;;  %v10165_v38 = vld [vmem:[#allocation36_spill] sm:$0xff]  ;;  %v10166_v54 = vld [vmem:[#allocation37_spill] sm:$0xff]  ;;  %v9499_v53 = vpack.c.bf16 %v4060_v51, %v4057_v41  ;;  %v4056_v34 = vld [vmem:[#allocation9 + $0x30] sm:$0xff]  ;;  %v9552_v51 = vpack.c.bf16 %v4089_v47, %v4086_v49 }
 0x61f   : > { %3392 = vst [vmem:[%s8409_s12 + $0x3c] sm:$0x1] %v3376_v58  ;;  %7107 = vmatprep.subr.bf16.mxu0 %v10164_v16  ;;  %7135 = vmatprep.subr.bf16.mxu1 %v8021_v8  ;;  %v4059_v18 = vld [vmem:[#allocation9 + $0x48] sm:$0xff]  ;;  %v4058_v30 = vld [vmem:[#allocation9 + $0x40] sm:$0xff]  ;;  %v4064_v16 = vld [vmem:[#allocation9 + $0x70] sm:$0xff] }
 0x620   : > { %v7619_v5 = vpop.eup %7618  ;;  %v9502_v28 = vpack.c.bf16 %v4059_v18, %v4056_v34  ;;  %v9505_v55 = vpack.c.bf16 %v4061_v31, %v4058_v30  ;;  %v4063_v2 = vld [vmem:[#allocation9 + $0x68] sm:$0xff]  ;;  %v4066_v39 = vld [vmem:[#allocation9 + $0x80] sm:$0xff]  ;;  %v4088_v41 = vld [vmem:[#allocation9 + $0x130] sm:$0xff] }
 0x621   : > { %v3303_v14 = vmul.f32 %v7619_v5, %v3265_v4  ;;  %v9509_v43 = vpack.c.bf16 %v4066_v39, %v4063_v2  ;;  %v4062_v58 = vld [vmem:[#allocation9 + $0x60] sm:$0xff]  ;;  %v4065_v4 = vld [vmem:[#allocation9 + $0x78] sm:$0xff]  ;;  %v4091_v34 = vld [vmem:[#allocation9 + $0x148] sm:$0xff] }
 0x622   : > { %7109 = vmatpush1.bf16.msra.mxu0 %v9289_v37  ;;  %7137 = vmatpush3.bf16.msra.mxu1 %v9291_v1  ;;  %v10168_v1 = vld [vmem:[#allocation39_spill] sm:$0xff]  ;;  %v9512_v5 = vpack.c.bf16 %v4065_v4, %v4062_v58  ;;  %v9555_v18 = vpack.c.bf16 %v4091_v34, %v4088_v41  ;;  %v4096_v31 = vld [vmem:[#allocation9 + $0x170] sm:$0xff]  ;;  %v4095_v58 = vld [vmem:[#allocation9 + $0x168] sm:$0xff] }
 0x623   : > { %v3304_v57 = vadd.f32 %v5571_v26, %v3303_v14  ;;  %7111 = vmatprep.subr.bf16.mxu0 %v9298_v7  ;;  %7138 = vmatprep.subr.bf16.mxu1 %v8021_v8  ;;  %v4067_v26 = vld [vmem:[#allocation9 + $0x88] sm:$0xff]  ;;  %v4093_v30 = vld [vmem:[#allocation9 + $0x158] sm:$0xff]  ;;  %v4092_v39 = vld [vmem:[#allocation9 + $0x150] sm:$0xff] }
 0x624   : > { %v7621_v37 = vpop.eup %7620  ;;  %v9515_v14 = vpack.c.bf16 %v4067_v26, %v4064_v16  ;;  %v9559_v2 = vpack.c.bf16 %v4096_v31, %v4093_v30  ;;  %v4094_v4 = vld [vmem:[#allocation9 + $0x160] sm:$0xff]  ;;  %v9562_v16 = vpack.c.bf16 %v4095_v58, %v4092_v39  ;;  %v4097_v26 = vld [vmem:[#allocation9 + $0x178] sm:$0xff]  ;;  %v5586_v41 = vld [vmem:[%s8384_s18 + $0x88] sm:$0xff] }
 0x625   : > { %7622 = vtanh.f32 %v3304_v57  ;;  %v3306_v7 = vsub.f32 1.0, %v7621_v37  ;;  %v4069_v57 = vld [vmem:[#allocation9 + $0x98] sm:$0xff]  ;;  %v5587_v30 = vld [vmem:[%s8394_s16 + $0x30] sm:$0xff] }
 0x626   : > { %7113 = vmatpush1.bf16.msra.mxu0 %v9303_v12  ;;  %7140 = vmatpush3.bf16.msra.mxu1 %v10165_v38  ;;  %v4072_v38 = vld [vmem:[#allocation9 + $0xb0] sm:$0xff] }
 0x627   : > { %7115 = vmatprep.subr.bf16.mxu0 %v10166_v54  ;;  %7141 = vmatprep.subr.bf16.mxu1 %v8021_v8  ;;  %v9519_v54 = vpack.c.bf16 %v4072_v38, %v4069_v57  ;;  %v9565_v57 = vpack.c.bf16 %v4097_v26, %v4094_v4  ;;  %v4240_v38 = vld [vmem:[#allocation10 + $0x8] sm:$0xff] }
 0x62a   : > { %7117 = vmatpush1.bf16.msra.mxu0 %v9313_v50  ;;  %7143 = vmatpush3.bf16.msra.mxu1 %v10167_v25  ;;  %v3308_v50 = vmul.f32 %v7621_v37, %v9345_v33  ;;  %v4068_v25 = vld [vmem:[#allocation9 + $0x90] sm:$0xff]  ;;  %v4071_v37 = vld [vmem:[#allocation9 + $0xa8] sm:$0xff] }
 0x62b   : > { %7119 = vmatprep.subr.bf16.mxu0 %v9319_v36  ;;  %7144 = vmatprep.subr.bf16.mxu1 %v8021_v8 }
 0x62e   : > { %7121 = vmatpush1.bf16.msra.mxu0 %v9323_v15  ;;  %7146 = vmatpush3.bf16.msra.mxu1 %v10168_v1  ;;  %v4070_v1 = vld [vmem:[#allocation9 + $0xa0] sm:$0xff] }
 0x62f   : > { %v7623_v12 = vpop.eup %7622  ;;  %7123 = vmatprep.subr.bf16.mxu0 %v9329_v44  ;;  %7147 = vmatprep.subr.bf16.mxu1 %v8021_v8 }
 0x630   : > { %v3307_v60 = vmul.f32 %v7623_v12, %v3306_v7  ;;  %v9522_v7 = vpack.c.bf16 %v4071_v37, %v4068_v25  ;;  %v4073_v12 = vld [vmem:[#allocation9 + $0xb8] sm:$0xff]  ;;  %v4243_v25 = vld [vmem:[#allocation10 + $0x20] sm:$0xff] }
 0x631   : > { %v9569_v37 = vpack.c.bf16 %v4243_v25, %v4240_v38 }
 0x632   : > { %7125 = vmatpush1.bf16.msra.mxu0 %v9333_v46  ;;  %7149 = vmatpush3.bf16.msra.mxu1 %v9335_v42  ;;  %v3309_v36 = vadd.f32 %v3308_v50, %v3307_v60  ;;  %v9525_v60 = vpack.c.bf16 %v4073_v12, %v4070_v1  ;;  %v4075_v50 = vld [vmem:[#allocation9 + $0xc8] sm:$0xff]  ;;  %v5584_v1 = vld [vmem:[%s8384_s18 + $0x78] sm:$0xff] }
 0x633   : > { %7182 = vmatprep.subr.bf16.mxu1 %v8021_v8  ;;  %7151 = vmatprep.subr.bf16.mxu0 %v9490_v17 }
 0x634   : > { %v9469_v15 = vsel %vm3324_vm11, %v3309_v36, %v9345_v33  ;;  %v3393_v44 = vsel %vm3324_vm11, %v3309_v36, 0.0  ;;  %v9529_v36 = vpack.c.bf16 %v4078_v62, %v4075_v50 }
 0x635   : > { %v3395_v56 = vcombine.high %v3393_v44, %v3393_v44  ;;  %v3402_v9 = vrot.slane %v3393_v44, %v8716_v40  ;;  %3772 = vmatmul.mubr.f32.vlgmr.msra.gmra.mrb[22].mxu0 %v9469_v15  ;;  %6336 = vmatmul.mubr.f32.vlgmr.msra.gmra.mrb[22].mxu1 %v9469_v15  ;;  %v4074_v44 = vld [vmem:[#allocation9 + $0xc0] sm:$0xff] }
 0x636   : > { %4162 = vmatprep.mubr.f32.mxu0 %v10152_v63  ;;  %6370 = vmatprep.mubr.msk.f32.mxu1 %vm8023_vm0, %v10152_v63 }
 0x637   : > { %v3409_v46 = vrot.slane %v3395_v56, %v8716_v40  ;;  %v3410_v42 = vcombine.high %v3402_v9, %v3402_v9  ;;  %v3418_v33 = vrot.slane %v3402_v9, %v8716_v40  ;;  %5580 = vst.sshfl [vmem:[%s8411_s10 + $0x3] sm:$0x1 pattern:$0x73625140] %v3402_v9  ;;  %7153 = vmatpush1.bf16.msra.mxu0 %v9492_v0  ;;  %v4077_v56 = vld [vmem:[#allocation9 + $0xd8] sm:$0xff]  ;;  %v4076_v9 = vld [vmem:[#allocation9 + $0xd0] sm:$0xff] }
 0x638   : > { %7184 = vmatpush3.bf16.msra.mxu1 %v9495_v29  ;;  %7155 = vmatprep.subr.bf16.mxu0 %v9499_v53 }
 0x639   : > { %v3411_v59 = vcombine.high %v3409_v46, %v3409_v46  ;;  %v3425_v3 = vrot.slane %v3409_v46, %v8716_v40  ;;  %v3432_v48 = vrot.slane %v3410_v42, %v8716_v40  ;;  %v3440_v6 = vcombine.high %v3418_v33, %v3418_v33  ;;  %5581 = vst.sshfl [vmem:[%s8411_s10 + $0xb] sm:$0x1 pattern:$0x73625140] %v3410_v42  ;;  %v4079_v42 = vld [vmem:[#allocation9 + $0xe8] sm:$0xff] }
 0x63a   : > { %5582 = vst.sshfl [vmem:[%s8411_s10 + $0x23] sm:$0x1 pattern:$0x73625140] %v3409_v46  ;;  %7185 = vmatprep.subr.bf16.mxu1 %v8021_v8  ;;  %v9532_v46 = vpack.c.bf16 %v4077_v56, %v4074_v44  ;;  %v9535_v33 = vpack.c.bf16 %v4079_v42, %v4076_v9 }
 0x63b   : > { %v3439_v22 = vrot.slane %v3411_v59, %v8716_v40  ;;  %v3441_v52 = vcombine.high %v3425_v3, %v3425_v3  ;;  %v3442_v11 = vcombine.high %v3432_v48, %v3432_v48  ;;  %3454 = vst [vmem:[%s8411_s10 + $0x13] sm:$0x1] %v3440_v6  ;;  %5583 = vst.sshfl [vmem:[%s8411_s10 + $0x2b] sm:$0x1 pattern:$0x73625140] %v3411_v59  ;;  %7157 = vmatpush1.bf16.msra.mxu0 %v9502_v28 }
 0x63c   : > { %7187 = vmatpush3.bf16.msra.mxu1 %v9505_v55  ;;  %7159 = vmatprep.subr.bf16.mxu0 %v9509_v43  ;;  %v4081_v59 = vld [vmem:[#allocation9 + $0xf8] sm:$0xff]  ;;  %v4084_v3 = vld [vmem:[#allocation9 + $0x110] sm:$0xff] }
 0x63d   : > { %v3443_v32 = vcombine.high %v3439_v22, %v3439_v22  ;;  %3455 = vst [vmem:[%s8411_s10 + $0x1b] sm:$0x1] %v3442_v11  ;;  %3458 = vst [vmem:[%s8411_s10 + $0x33] sm:$0x1] %v3441_v52  ;;  %7188 = vmatprep.subr.bf16.mxu1 %v8021_v8  ;;  %v9539_v48 = vpack.c.bf16 %v4084_v3, %v4081_v59  ;;  %v4080_v6 = vld [vmem:[#allocation9 + $0xf0] sm:$0xff]  ;;  %v4083_v22 = vld [vmem:[#allocation9 + $0x108] sm:$0xff] }
 0x63e   : > { %v4082_v52 = vld [vmem:[#allocation9 + $0x100] sm:$0xff]  ;;  %v9542_v11 = vpack.c.bf16 %v4083_v22, %v4080_v6 }
 0x63f   : > { %3459 = vst [vmem:[%s8411_s10 + $0x3b] sm:$0x1] %v3443_v32  ;;  %7161 = vmatpush1.bf16.msra.mxu0 %v9512_v5  ;;  %v4085_v32 = vld [vmem:[#allocation9 + $0x118] sm:$0xff]  ;;  %v5585_v59 = vld [vmem:[%s8384_s18 + $0x80] sm:$0xff] }
 0x640   : > { %7190 = vmatpush3.bf16.msra.mxu1 %v9515_v14  ;;  %7163 = vmatprep.subr.bf16.mxu0 %v9519_v54  ;;  %v9545_v19 = vpack.c.bf16 %v4085_v32, %v4082_v52 }
 0x641   : > { %7191 = vmatprep.subr.bf16.mxu1 %v8021_v8 }
 0x643   : > { %7165 = vmatpush1.bf16.msra.mxu0 %v9522_v7 }
 0x644   : > { %7193 = vmatpush3.bf16.msra.mxu1 %v9525_v60  ;;  %7167 = vmatprep.subr.bf16.mxu0 %v9529_v36 }
 0x645   : > { %7194 = vmatprep.subr.bf16.mxu1 %v8021_v8 }
 0x647   : > { %7169 = vmatpush1.bf16.msra.mxu0 %v9532_v46 }
 0x648   : > { %7196 = vmatpush3.bf16.msra.mxu1 %v9535_v33  ;;  %7171 = vmatprep.subr.bf16.mxu0 %v9539_v48 }
 0x649   : > { %7197 = vmatprep.subr.bf16.mxu1 %v8021_v8 }
 0x64b   : > { %7173 = vmatpush1.bf16.msra.mxu0 %v9542_v11 }
 0x64c   : > { %7199 = vmatpush3.bf16.msra.mxu1 %v9545_v19  ;;  %7175 = vmatprep.subr.bf16.mxu0 %v9549_v45 }
 0x64d   : > { %7200 = vmatprep.subr.bf16.mxu1 %v8021_v8 }
 0x64f   : > { %7177 = vmatpush1.bf16.msra.mxu0 %v9552_v51 }
 0x650   : > { %7202 = vmatpush3.bf16.msra.mxu1 %v9555_v18  ;;  %7179 = vmatprep.subr.bf16.mxu0 %v9559_v2 }
 0x651   : > { %7203 = vmatprep.subr.bf16.mxu1 %v8021_v8 }
 0x653   : > { %7181 = vmatpush1.bf16.msra.mxu0 %v9562_v16 }
 0x654   : > { %7205 = vmatpush3.bf16.msra.mxu1 %v9565_v57  ;;  %7207 = vmatprep.subr.bf16.mxu0 %v9569_v37 }
 0x655   : > { %7238 = vmatprep.subr.bf16.mxu1 %v8021_v8 }
 0x6e8   : > { %v3584_v12 = vpop.f32.mrb[20].mxu0  ;;  %v3655_v50 = vpop.f32.mrb[20].mxu1 }
 0x6e9   : > { %v3585_v62 = vadd.f32 %v3584_v12, %v8690_v13  ;;  %v3586_v44 = vpop.f32.mrb[21].mxu0  ;;  %v6302_v56 = vpop.f32.mrb[21].mxu1  ;;  %v3656_v49 = vadd.f32 %v3655_v50, %v8699_v10  ;;  %v5588_v12 = vld [vmem:[%s8394_s16 + $0x38] sm:$0xff] }
 0x6ea   : > { %v3587_v9 = vadd.f32 %v3586_v44, %v8692_v20 }
 0x6eb   : > { %v3848_v42 = vadd.f32 %v5584_v1, %v3585_v62 }
 0x6ec   : > { %v3849_v6 = vadd.f32 %v5585_v59, %v3587_v9 }
 0x6ed   : > { %v5590_v3 = vmul.f32 -1.442695, %v3848_v42  ;;  %v4239_v42 = vld [vmem:[#allocation10] sm:$0xff] }
 0x6ee   : > { %v5591_v22 = vmul.f32 -1.442695, %v3849_v6  ;;  %v4241_v6 = vld [vmem:[#allocation10 + $0x10] sm:$0xff] }
 0x6ef   : > { %7624 = vpow2.f32 %v5590_v3  ;;  %v4242_v3 = vld [vmem:[#allocation10 + $0x18] sm:$0xff] }
 0x6f0   : > { %7626 = vpow2.f32 %v5591_v22  ;;  %v4244_v22 = vld [vmem:[#allocation10 + $0x28] sm:$0xff] }
 0x6f9   : > { %v7625_v52 = vpop.eup %7624 }
 0x6fa   : > { %v3856_v32 = vadd.f32 1.0, %v7625_v52  ;;  %v7627_v23 = vpop.eup %7626 }
 0x6fb   : > { %v3857_v61 = vadd.f32 1.0, %v7627_v23  ;;  %v4246_v23 = vld [vmem:[#allocation10 + $0x38] sm:$0xff] }
 0x6fc   : > { %7628 = vrcp.f32 %v3856_v32 }
 0x6fd   : > { %7630 = vrcp.f32 %v3857_v61  ;;  %v4249_v61 = vld [vmem:[#allocation10 + $0x50] sm:$0xff] }
 0x706   : > { %v7629_v47 = vpop.eup %7628 }
 0x707   : > { %v3862_v34 = vmul.f32 %v7629_v47, %v3656_v49  ;;  %v7631_v44 = vpop.eup %7630  ;;  %v3897_v49 = vpop.permute.xlu0 %3896 }
 0x708   : > { %v3773_v31 = vpop.f32.mrb[22].mxu0  ;;  %v9580_v39 = vpop.f32.mrb[22].mxu1  ;;  %v3865_v9 = vsub.f32 1.0, %v7631_v44  ;;  %v3867_v32 = vmul.f32 %v7631_v44, %v9412_v27  ;;  %vm3898_vm12 = vcmp.eq.s32.totalorder %v3897_v49, 1  ;;  %v4261_v49 = vld [vmem:[#allocation10 + $0xb0] sm:$0xff] }
 0x709   : > { %v3863_v58 = vadd.f32 %v5586_v41, %v3862_v34  ;;  %v3774_v4 = vadd.f32 %v3773_v31, %v8705_v24  ;;  %v3775_v26 = vpop.f32.mrb[23].mxu0  ;;  %v6337_v38 = vpop.f32.mrb[23].mxu1  ;;  %v9586_v41 = vpack.c.bf16 %v4242_v3, %v4239_v42  ;;  %v9588_v34 = vpack.c.bf16 %v4244_v22, %v4241_v6  ;;  %v4248_v31 = vld [vmem:[#allocation10 + $0x48] sm:$0xff]  ;;  %v4254_v3 = vld [vmem:[#allocation10 + $0x78] sm:$0xff]  ;;  %v4253_v6 = vld [vmem:[#allocation10 + $0x70] sm:$0xff] }
 0x70a   : > { %v3776_v25 = vadd.f32 %v3775_v26, %v8708_v35  ;;  %v9590_v26 = vpack.c.bf16 %v4249_v61, %v4246_v23  ;;  %v4250_v38 = vld [vmem:[#allocation10 + $0x58] sm:$0xff]  ;;  %v4256_v23 = vld [vmem:[#allocation10 + $0x88] sm:$0xff] }
 0x70b   : > { %7632 = vtanh.f32 %v3863_v58  ;;  %v3869_v1 = vadd.f32 %v5587_v30, %v3774_v4  ;;  %v4245_v30 = vld [vmem:[#allocation10 + $0x30] sm:$0xff]  ;;  %v4247_v58 = vld [vmem:[#allocation10 + $0x40] sm:$0xff]  ;;  %v4258_v61 = vld [vmem:[#allocation10 + $0x98] sm:$0xff] }
 0x70c   : > { %v3870_v50 = vadd.f32 %v5588_v12, %v3776_v25  ;;  %v4252_v25 = vld [vmem:[#allocation10 + $0x68] sm:$0xff]  ;;  %v9602_v42 = vpack.c.bf16 %v4250_v38, %v4247_v58 }
 0x70d   : > { %v5592_v62 = vmul.f32 -1.442695, %v3869_v1  ;;  %v4255_v1 = vld [vmem:[#allocation10 + $0x80] sm:$0xff] }
 0x70e   : > { %v5593_v56 = vmul.f32 -1.442695, %v3870_v50 }
 0x70f   : > { %7634 = vpow2.f32 %v5592_v62 }
 0x710   : > { %7636 = vpow2.f32 %v5593_v56 }
 0x715   : > { %v7633_v59 = vpop.eup %7632 }
 0x716   : > { %v3866_v52 = vmul.f32 %v7633_v59, %v3865_v9  ;;  %v9600_v9 = vpack.c.bf16 %v4248_v31, %v4245_v30  ;;  %v4251_v59 = vld [vmem:[#allocation10 + $0x60] sm:$0xff] }
 0x717   : > { %v9620_v38 = vpack.c.bf16 %v4254_v3, %v4251_v59  ;;  %v4260_v59 = vld [vmem:[#allocation10 + $0xa8] sm:$0xff]  ;;  %v4259_v3 = vld [vmem:[#allocation10 + $0xa0] sm:$0xff] }
 0x718   : > { %v3868_v47 = vadd.f32 %v3867_v32, %v3866_v52 }
 0x719   : > { %v7635_v4 = vpop.eup %7634 }
 0x71a   : > { %v3877_v12 = vadd.f32 1.0, %v7635_v4  ;;  %v9593_v62 = vsel %vm3898_vm12, %v3868_v47, %v9412_v27  ;;  %v3906_v50 = vsel %vm3898_vm12, %v3868_v47, 0.0  ;;  %v9604_v27 = vpack.c.bf16 %v4255_v1, %v4252_v25  ;;  %v7637_v4 = vpop.eup %7636 }
 0x71b   : > { %v3908_v44 = vcombine.high %v3906_v50, %v3906_v50  ;;  %v3915_v56 = vrot.slane %v3906_v50, %v8716_v40  ;;  %4163 = vmatmul.mubr.f32.vlgmr.msra.gmra.mrb[24].mxu0 %v9593_v62  ;;  %6371 = vmatmul.mubr.f32.vlgmr.msra.gmra.mrb[24].mxu1 %v9593_v62  ;;  %v9622_v25 = vpack.c.bf16 %v4256_v23, %v4253_v6  ;;  %v4262_v6 = vld [vmem:[#allocation10 + $0xb8] sm:$0xff] }
 0x71c   : > { %7638 = vrcp.f32 %v3877_v12  ;;  %7209 = vmatpush1.bf16.msra.mxu0 %v9586_v41  ;;  %7240 = vmatpush3.bf16.msra.mxu1 %v9588_v34  ;;  %v9624_v1 = vpack.c.bf16 %v4261_v49, %v4258_v61  ;;  %v4257_v12 = vld [vmem:[#allocation10 + $0x90] sm:$0xff]  ;;  %v9637_v49 = vpack.c.bf16 %v4262_v6, %v4259_v3 }
 0x71d   : > { %v3922_v22 = vrot.slane %v3908_v44, %v8716_v40  ;;  %v3923_v52 = vcombine.high %v3915_v56, %v3915_v56  ;;  %v3931_v32 = vrot.slane %v3915_v56, %v8716_v40  ;;  %5594 = vst.sshfl [vmem:[%s8409_s12 + $0x5] sm:$0x1 pattern:$0x73625140] %v3915_v56  ;;  %7211 = vmatprep.subr.bf16.mxu0 %v9590_v26 }
 0x71e   : > { %7241 = vmatprep.subr.bf16.mxu1 %v8021_v8  ;;  %4351 = vmatprep.mubr.f32.mxu0 %v10152_v63  ;;  %10169 = vst [vmem:[#allocation35_spill] sm:$0xff] %v9624_v1  ;;  %v9635_v61 = vpack.c.bf16 %v4260_v59, %v4257_v12  ;;  %v4270_v12 = vld [vmem:[#allocation10 + $0xf8] sm:$0xff]  ;;  %v4273_v59 = vld [vmem:[#allocation10 + $0x110] sm:$0xff] }
 0x71f   : > { %6405 = vmatprep.mubr.msk.f32.mxu1 %vm8023_vm0, %v10152_v63  ;;  %v3924_v47 = vcombine.high %v3922_v22, %v3922_v22  ;;  %v3938_v30 = vrot.slane %v3922_v22, %v8716_v40  ;;  %v3945_v31 = vrot.slane %v3923_v52, %v8716_v40  ;;  %v3953_v58 = vcombine.high %v3931_v32, %v3931_v32 }
 0x720   : > { %5595 = vst.sshfl [vmem:[%s8409_s12 + $0xd] sm:$0x1 pattern:$0x73625140] %v3923_v52  ;;  %7213 = vmatpush1.bf16.msra.mxu0 %v9600_v9  ;;  %7243 = vmatpush3.bf16.msra.mxu1 %v9602_v42  ;;  %v4267_v52 = vld [vmem:[#allocation10 + $0xe0] sm:$0xff]  ;;  %v3878_v32 = vadd.f32 1.0, %v7637_v4 }
 0x721   : > { %5596 = vst.sshfl [vmem:[%s8409_s12 + $0x25] sm:$0x1 pattern:$0x73625140] %v3922_v22  ;;  %v3952_v50 = vrot.slane %v3924_v47, %v8716_v40  ;;  %v3954_v44 = vcombine.high %v3938_v30, %v3938_v30  ;;  %v3955_v56 = vcombine.high %v3945_v31, %v3945_v31  ;;  %3967 = vst [vmem:[%s8409_s12 + $0x15] sm:$0x1] %v3953_v58  ;;  %7215 = vmatprep.subr.bf16.mxu0 %v9604_v27 }
 0x722   : > { %5597 = vst.sshfl [vmem:[%s8409_s12 + $0x2d] sm:$0x1 pattern:$0x73625140] %v3924_v47  ;;  %7244 = vmatprep.subr.bf16.mxu1 %v8021_v8  ;;  %v4264_v22 = vld [vmem:[#allocation10 + $0xc8] sm:$0xff]  ;;  %v4263_v47 = vld [vmem:[#allocation10 + $0xc0] sm:$0xff]  ;;  %v3845_v30 = vadd.f32 %v9580_v39, %v10163_v21  ;;  %7640 = vrcp.f32 %v3878_v32 }
 0x723   : > { %v3956_v23 = vcombine.high %v3952_v50, %v3952_v50  ;;  %3968 = vst [vmem:[%s8409_s12 + $0x1d] sm:$0x1] %v3955_v56  ;;  %3971 = vst [vmem:[%s8409_s12 + $0x35] sm:$0x1] %v3954_v44  ;;  %v9644_v31 = vpack.c.bf16 %v4267_v52, %v4264_v22  ;;  %v4266_v58 = vld [vmem:[#allocation10 + $0xd8] sm:$0xff]  ;;  %v4265_v4 = vld [vmem:[#allocation10 + $0xd0] sm:$0xff]  ;;  %v9655_v52 = vpack.c.bf16 %v4273_v59, %v4270_v12 }
 0x724   : > { %7217 = vmatpush1.bf16.msra.mxu0 %v9620_v38  ;;  %7246 = vmatpush3.bf16.msra.mxu1 %v9622_v25  ;;  %v4268_v50 = vld [vmem:[#allocation10 + $0xe8] sm:$0xff]  ;;  %v5589_v56 = vld [vmem:[%s8394_s16 + $0x40] sm:$0xff]  ;;  %v9649_v39 = vpack.c.bf16 %v4266_v58, %v4263_v47  ;;  %v4277_v12 = vld [vmem:[#allocation10 + $0x130] sm:$0xff] }
 0x725   : > { %3972 = vst [vmem:[%s8409_s12 + $0x3d] sm:$0x1] %v3956_v23  ;;  %7219 = vmatprep.subr.bf16.mxu0 %v9624_v1  ;;  %7247 = vmatprep.subr.bf16.mxu1 %v8021_v8  ;;  %v9651_v6 = vpack.c.bf16 %v4268_v50, %v4265_v4  ;;  %v4269_v23 = vld [vmem:[#allocation10 + $0xf0] sm:$0xff]  ;;  %10171 = vst [vmem:[#allocation37_spill] sm:$0xff] %v9655_v52  ;;  %v4272_v1 = vld [vmem:[#allocation10 + $0x108] sm:$0xff] }
 0x726   : > { %v7639_v44 = vpop.eup %7638  ;;  %v4271_v21 = vld [vmem:[#allocation10 + $0x100] sm:$0xff]  ;;  %v4276_v32 = vld [vmem:[#allocation10 + $0x128] sm:$0xff]  ;;  %v9659_v47 = vpack.c.bf16 %v4272_v1, %v4269_v23  ;;  %v4281_v23 = vld [vmem:[#allocation10 + $0x150] sm:$0xff] }
 0x727   : > { %v3883_v3 = vmul.f32 %v7639_v44, %v3845_v30  ;;  %10170 = vst [vmem:[#allocation36_spill] sm:$0xff] %v9651_v6  ;;  %v4274_v30 = vld [vmem:[#allocation10 + $0x118] sm:$0xff]  ;;  %v4279_v44 = vld [vmem:[#allocation10 + $0x140] sm:$0xff]  ;;  %v4280_v59 = vld [vmem:[#allocation10 + $0x148] sm:$0xff] }
 0x728   : > { %7221 = vmatpush1.bf16.msra.mxu0 %v9635_v61  ;;  %7249 = vmatpush3.bf16.msra.mxu1 %v9637_v49  ;;  %v9661_v58 = vpack.c.bf16 %v4274_v30, %v4271_v21  ;;  %v4275_v4 = vld [vmem:[#allocation10 + $0x120] sm:$0xff]  ;;  %v9665_v50 = vpack.c.bf16 %v4279_v44, %v4276_v32  ;;  %v9671_v21 = vpack.c.bf16 %v4280_v59, %v4277_v12  ;;  %v4284_v44 = vld [vmem:[#allocation10 + $0x168] sm:$0xff] }
 0x729   : > { %v3884_v22 = vadd.f32 %v5589_v56, %v3883_v3  ;;  %7223 = vmatprep.subr.bf16.mxu0 %v9644_v31  ;;  %7250 = vmatprep.subr.bf16.mxu1 %v8021_v8  ;;  %v4278_v56 = vld [vmem:[#allocation10 + $0x138] sm:$0xff] }
 0x72a   : > { %10172 = vst [vmem:[#allocation38_spill] sm:$0xff] %v9661_v58  ;;  %v4282_v3 = vld [vmem:[#allocation10 + $0x158] sm:$0xff]  ;;  %v9669_v1 = vpack.c.bf16 %v4278_v56, %v4275_v4  ;;  %10173 = vst [vmem:[#allocation39_spill] sm:$0xff] %v9671_v21 }
 0x72b   : > { %7642 = vtanh.f32 %v3884_v22  ;;  %v4285_v22 = vld [vmem:[#allocation10 + $0x170] sm:$0xff] }
 0x72c   : > { %7225 = vmatpush1.bf16.msra.mxu0 %v9649_v39  ;;  %7252 = vmatpush3.bf16.msra.mxu1 %v9651_v6  ;;  %v7641_v30 = vpop.eup %7640  ;;  %v9675_v32 = vpack.c.bf16 %v4285_v22, %v4282_v3  ;;  %v4286_v6 = vld [vmem:[#allocation10 + $0x178] sm:$0xff]  ;;  %v3903_v22 = vpop.permute.xlu1 %3902 }
 0x72d   : > { %7227 = vmatprep.subr.bf16.mxu0 %v9655_v52  ;;  %7253 = vmatprep.subr.bf16.mxu1 %v8021_v8  ;;  %v4283_v52 = vld [vmem:[#allocation10 + $0x160] sm:$0xff]  ;;  %v3886_v56 = vsub.f32 1.0, %v7641_v30  ;;  %v3888_v3 = vmul.f32 %v7641_v30, %v9469_v15  ;;  %vm3904_vm13 = vcmp.eq.s32.totalorder %v3903_v22, 1 }
 0x72e   : > { %v9681_v4 = vpack.c.bf16 %v4286_v6, %v4283_v52 }
 0x730   : > { %7229 = vmatpush1.bf16.msra.mxu0 %v9659_v47  ;;  %7255 = vmatpush3.bf16.msra.mxu1 %v9661_v58  ;;  %v9679_v58 = vpack.c.bf16 %v4284_v44, %v4281_v23 }
 0x731   : > { %7231 = vmatprep.subr.bf16.mxu0 %v9665_v50  ;;  %7256 = vmatprep.subr.bf16.mxu1 %v8021_v8 }
 0x734   : > { %7233 = vmatpush1.bf16.msra.mxu0 %v9669_v1  ;;  %7258 = vmatpush3.bf16.msra.mxu1 %v9671_v21 }
 0x735   : > { %v7643_v12 = vpop.eup %7642  ;;  %7235 = vmatprep.subr.bf16.mxu0 %v9675_v32  ;;  %7259 = vmatprep.subr.bf16.mxu1 %v8021_v8 }
 0x736   : > { %v3887_v59 = vmul.f32 %v7643_v12, %v3886_v56 }
 0x738   : > { %7237 = vmatpush1.bf16.msra.mxu0 %v9679_v58  ;;  %7261 = vmatpush3.bf16.msra.mxu1 %v9681_v4  ;;  %v3889_v21 = vadd.f32 %v3888_v3, %v3887_v59 }
 0x739   : > { %7263 = vmatprep.subr.bf16.mxu0 %v9490_v17  ;;  %7294 = vmatprep.subr.bf16.mxu1 %v8021_v8 }
 0x73a   : > { %v9691_v6 = vsel %vm3904_vm13, %v3889_v21, %v9469_v15  ;;  %v3973_v52 = vsel %vm3904_vm13, %v3889_v21, 0.0 }
 0x73b   : > { %v3975_v23 = vcombine.high %v3973_v52, %v3973_v52  ;;  %v3982_v44 = vrot.slane %v3973_v52, %v8716_v40  ;;  %4352 = vmatmul.mubr.f32.vlgmr.msra.gmra.mrb[26].mxu0 %v9691_v6  ;;  %6406 = vmatmul.mubr.f32.vlgmr.msra.gmra.mrb[26].mxu1 %v9691_v6 }
 0x73c   : > { %7265 = vmatpush1.bf16.msra.mxu0 %v9492_v0  ;;  %7296 = vmatpush3.bf16.msra.mxu1 %v9495_v29 }
 0x73d   : > { %v3989_v17 = vrot.slane %v3975_v23, %v8716_v40  ;;  %v3990_v30 = vcombine.high %v3982_v44, %v3982_v44  ;;  %v3998_v15 = vrot.slane %v3982_v44, %v8716_v40  ;;  %5598 = vst.sshfl [vmem:[%s8411_s10 + $0x2] sm:$0x1 pattern:$0x73625140] %v3982_v44  ;;  %7267 = vmatprep.subr.bf16.mxu0 %v9499_v53 }
 0x73e   : > { %7297 = vmatprep.subr.bf16.mxu1 %v8021_v8  ;;  %4741 = vmatprep.mubr.f32.mxu0 %v10152_v63 }
 0x73f   : > { %6440 = vmatprep.mubr.msk.f32.mxu1 %vm8023_vm0, %v10152_v63  ;;  %v3991_v0 = vcombine.high %v3989_v17, %v3989_v17  ;;  %v4005_v29 = vrot.slane %v3989_v17, %v8716_v40  ;;  %v4012_v21 = vrot.slane %v3990_v30, %v8716_v40  ;;  %v4020_v56 = vcombine.high %v3998_v15, %v3998_v15 }
 0x740   : > { %5599 = vst.sshfl [vmem:[%s8411_s10 + $0xa] sm:$0x1 pattern:$0x73625140] %v3990_v30  ;;  %7269 = vmatpush1.bf16.msra.mxu0 %v9502_v28  ;;  %7299 = vmatpush3.bf16.msra.mxu1 %v9505_v55  ;;  %v5602_v28 = vld [vmem:[%s8384_s18 + $0x90] sm:$0xff] }
 0x741   : > { %5600 = vst.sshfl [vmem:[%s8411_s10 + $0x22] sm:$0x1 pattern:$0x73625140] %v3989_v17  ;;  %v4019_v53 = vrot.slane %v3991_v0, %v8716_v40  ;;  %v4021_v12 = vcombine.high %v4005_v29, %v4005_v29  ;;  %v4022_v59 = vcombine.high %v4012_v21, %v4012_v21  ;;  %4034 = vst [vmem:[%s8411_s10 + $0x12] sm:$0x1] %v4020_v56  ;;  %7271 = vmatprep.subr.bf16.mxu0 %v9509_v43 }
 0x742   : > { %5601 = vst.sshfl [vmem:[%s8411_s10 + $0x2a] sm:$0x1 pattern:$0x73625140] %v3991_v0  ;;  %7300 = vmatprep.subr.bf16.mxu1 %v8021_v8  ;;  %v5606_v29 = vld [vmem:[%s8394_s16 + $0x20] sm:$0xff] }
 0x743   : > { %v4023_v3 = vcombine.high %v4019_v53, %v4019_v53  ;;  %4035 = vst [vmem:[%s8411_s10 + $0x1a] sm:$0x1] %v4022_v59  ;;  %4038 = vst [vmem:[%s8411_s10 + $0x32] sm:$0x1] %v4021_v12 }
 0x744   : > { %7273 = vmatpush1.bf16.msra.mxu0 %v9512_v5  ;;  %7302 = vmatpush3.bf16.msra.mxu1 %v9515_v14 }
 0x745   : > { %4039 = vst [vmem:[%s8411_s10 + $0x3a] sm:$0x1] %v4023_v3  ;;  %7275 = vmatprep.subr.bf16.mxu0 %v9519_v54  ;;  %7303 = vmatprep.subr.bf16.mxu1 %v8021_v8 }
 0x748   : > { %7277 = vmatpush1.bf16.msra.mxu0 %v9522_v7  ;;  %7305 = vmatpush3.bf16.msra.mxu1 %v9525_v60 }
 0x749   : > { %7279 = vmatprep.subr.bf16.mxu0 %v9529_v36  ;;  %7306 = vmatprep.subr.bf16.mxu1 %v8021_v8  ;;  %v5603_v36 = vld [vmem:[%s8384_s18 + $0x98] sm:$0xff] }
 0x74c   : > { %7281 = vmatpush1.bf16.msra.mxu0 %v9532_v46  ;;  %7308 = vmatpush3.bf16.msra.mxu1 %v9535_v33 }
 0x74d   : > { %7283 = vmatprep.subr.bf16.mxu0 %v9539_v48  ;;  %7309 = vmatprep.subr.bf16.mxu1 %v8021_v8 }
 0x750   : > { %7285 = vmatpush1.bf16.msra.mxu0 %v9542_v11  ;;  %7311 = vmatpush3.bf16.msra.mxu1 %v9545_v19 }
 0x751   : > { %7287 = vmatprep.subr.bf16.mxu0 %v9549_v45  ;;  %7312 = vmatprep.subr.bf16.mxu1 %v8021_v8 }
 0x754   : > { %7289 = vmatpush1.bf16.msra.mxu0 %v9552_v51  ;;  %7314 = vmatpush3.bf16.msra.mxu1 %v9555_v18 }
 0x755   : > { %7291 = vmatprep.subr.bf16.mxu0 %v9559_v2  ;;  %7315 = vmatprep.subr.bf16.mxu1 %v8021_v8 }
 0x758   : > { %7293 = vmatpush1.bf16.msra.mxu0 %v9562_v16  ;;  %7317 = vmatpush3.bf16.msra.mxu1 %v9565_v57  ;;  %v5604_v16 = vld [vmem:[%s8384_s18 + $0xa0] sm:$0xff] }
 0x759   : > { %7319 = vmatprep.subr.bf16.mxu0 %v9569_v37  ;;  %7350 = vmatprep.subr.bf16.mxu1 %v8021_v8  ;;  %v5605_v37 = vld [vmem:[%s8394_s16 + $0x18] sm:$0xff] }
 0x7ee   : > { %v4164_v55 = vpop.f32.mrb[24].mxu0  ;;  %v4235_v43 = vpop.f32.mrb[24].mxu1 }
 0x7ef   : > { %v4165_v5 = vadd.f32 %v4164_v55, %v8690_v13  ;;  %v4166_v14 = vpop.f32.mrb[25].mxu0  ;;  %v6372_v54 = vpop.f32.mrb[25].mxu1  ;;  %v4236_v18 = vadd.f32 %v4235_v43, %v8699_v10 }
 0x7f0   : > { %v4167_v7 = vadd.f32 %v4166_v14, %v8692_v20  ;;  %v4477_v43 = vpop.permute.xlu0 %4476 }
 0x7f1   : > { %v4428_v60 = vadd.f32 %v5602_v28, %v4165_v5  ;;  %vm4478_vm14 = vcmp.eq.s32.totalorder %v4477_v43, 1 }
 0x7f2   : > { %v4429_v33 = vadd.f32 %v5603_v36, %v4167_v7 }
 0x7f3   : > { %v5608_v46 = vmul.f32 -1.442695, %v4428_v60 }
 0x7f4   : > { %v5609_v48 = vmul.f32 -1.442695, %v4429_v33 }
 0x7f5   : > { %7644 = vpow2.f32 %v5608_v46 }
 0x7f6   : > { %7646 = vpow2.f32 %v5609_v48 }
 0x7ff   : > { %v7645_v11 = vpop.eup %7644 }
 0x800   : > { %v4436_v19 = vadd.f32 1.0, %v7645_v11  ;;  %v7647_v45 = vpop.eup %7646 }
 0x801   : > { %v4437_v51 = vadd.f32 1.0, %v7647_v45 }
 0x802   : > { %7648 = vrcp.f32 %v4436_v19 }
 0x803   : > { %7650 = vrcp.f32 %v4437_v51 }
 0x80c   : > { %v7649_v2 = vpop.eup %7648 }
 0x80d   : > { %v4442_v57 = vmul.f32 %v7649_v2, %v4236_v18  ;;  %v7651_v53 = vpop.eup %7650 }
 0x80e   : > { %v4353_v22 = vpop.f32.mrb[26].mxu0  ;;  %v9751_v52 = vpop.f32.mrb[26].mxu1  ;;  %v4445_v59 = vsub.f32 1.0, %v7651_v53  ;;  %v4447_v55 = vmul.f32 %v7651_v53, %v9593_v62 }
 0x80f   : > { %v4443_v23 = vadd.f32 %v5604_v16, %v4442_v57  ;;  %v4354_v44 = vadd.f32 %v4353_v22, %v8705_v24  ;;  %v4355_v17 = vpop.f32.mrb[27].mxu0  ;;  %v6407_v30 = vpop.f32.mrb[27].mxu1  ;;  %v10175_v16 = vld [vmem:[#allocation35_spill] sm:$0xff] }
 0x810   : > { %v4356_v15 = vadd.f32 %v4355_v17, %v8708_v35 }
 0x811   : > { %7652 = vtanh.f32 %v4443_v23  ;;  %v4449_v0 = vadd.f32 %v5605_v37, %v4354_v44  ;;  %v4483_v44 = vpop.permute.xlu1 %4482 }
 0x812   : > { %v4450_v56 = vadd.f32 %v5606_v29, %v4356_v15 }
 0x813   : > { %v5610_v21 = vmul.f32 -1.442695, %v4449_v0 }
 0x814   : > { %v5611_v12 = vmul.f32 -1.442695, %v4450_v56 }
 0x815   : > { %7654 = vpow2.f32 %v5610_v21 }
 0x816   : > { %7656 = vpow2.f32 %v5611_v12 }
 0x81b   : > { %v7653_v3 = vpop.eup %7652 }
 0x81c   : > { %v4446_v28 = vmul.f32 %v7653_v3, %v4445_v59  ;;  %v5620_v59 = vld [vmem:[%s8384_s18 + $0xa8] sm:$0xff] }
 0x81e   : > { %v4448_v5 = vadd.f32 %v4447_v55, %v4446_v28 }
 0x81f   : > { %v7655_v14 = vpop.eup %7654 }
 0x820   : > { %v4457_v54 = vadd.f32 1.0, %v7655_v14  ;;  %v9758_v7 = vsel %vm4478_vm14, %v4448_v5, %v9593_v62  ;;  %v4486_v60 = vsel %vm4478_vm14, %v4448_v5, 0.0 }
 0x821   : > { %v4488_v36 = vcombine.high %v4486_v60, %v4486_v60  ;;  %v4495_v46 = vrot.slane %v4486_v60, %v8716_v40  ;;  %4742 = vmatmul.mubr.f32.vlgmr.msra.gmra.mrb[28].mxu0 %v9758_v7  ;;  %6441 = vmatmul.mubr.f32.vlgmr.msra.gmra.mrb[28].mxu1 %v9758_v7  ;;  %v5621_v60 = vld [vmem:[%s8384_s18 + $0xb0] sm:$0xff] }
 0x822   : > { %7658 = vrcp.f32 %v4457_v54  ;;  %7321 = vmatpush1.bf16.msra.mxu0 %v9586_v41  ;;  %7352 = vmatpush3.bf16.msra.mxu1 %v9588_v34 }
 0x823   : > { %v4502_v33 = vrot.slane %v4488_v36, %v8716_v40  ;;  %v4503_v48 = vcombine.high %v4495_v46, %v4495_v46  ;;  %v4511_v62 = vrot.slane %v4495_v46, %v8716_v40  ;;  %5612 = vst.sshfl [vmem:[%s8409_s12 + $0x6] sm:$0x1 pattern:$0x73625140] %v4495_v46  ;;  %7323 = vmatprep.subr.bf16.mxu0 %v9590_v26  ;;  %v7657_v26 = vpop.eup %7656 }
 0x824   : > { %7353 = vmatprep.subr.bf16.mxu1 %v8021_v8  ;;  %4930 = vmatprep.mubr.f32.mxu0 %v10152_v63  ;;  %v4458_v18 = vadd.f32 1.0, %v7657_v26 }
 0x825   : > { %6475 = vmatprep.mubr.msk.f32.mxu1 %vm8023_vm0, %v10152_v63  ;;  %v4504_v41 = vcombine.high %v4502_v33, %v4502_v33  ;;  %v4518_v34 = vrot.slane %v4502_v33, %v8716_v40  ;;  %v4525_v11 = vrot.slane %v4503_v48, %v8716_v40  ;;  %v4533_v19 = vcombine.high %v4511_v62, %v4511_v62 }
 0x826   : > { %5613 = vst.sshfl [vmem:[%s8409_s12 + $0xe] sm:$0x1 pattern:$0x73625140] %v4503_v48  ;;  %7325 = vmatpush1.bf16.msra.mxu0 %v9600_v9  ;;  %7355 = vmatpush3.bf16.msra.mxu1 %v9602_v42  ;;  %v10174_v9 = vld [vmem:[#allocation34_spill] sm:$0xff]  ;;  %7660 = vrcp.f32 %v4458_v18  ;;  %vm4484_vm0 = vcmp.eq.s32.totalorder %v4483_v44, 1 }
 0x827   : > { %5614 = vst.sshfl [vmem:[%s8409_s12 + $0x26] sm:$0x1 pattern:$0x73625140] %v4502_v33  ;;  %v4532_v45 = vrot.slane %v4504_v41, %v8716_v40  ;;  %v4534_v51 = vcombine.high %v4518_v34, %v4518_v34  ;;  %v4535_v63 = vcombine.high %v4525_v11, %v4525_v11  ;;  %4547 = vst [vmem:[%s8409_s12 + $0x16] sm:$0x1] %v4533_v19  ;;  %7327 = vmatprep.subr.bf16.mxu0 %v9604_v27 }
 0x828   : > { %5615 = vst.sshfl [vmem:[%s8409_s12 + $0x2e] sm:$0x1 pattern:$0x73625140] %v4504_v41  ;;  %7356 = vmatprep.subr.bf16.mxu1 %v8021_v8  ;;  %v4425_v42 = vadd.f32 %v9751_v52, %v10174_v9  ;;  %v5607_v27 = vld [vmem:[%s8394_s16 + $0x28] sm:$0xff]  ;;  %v10178_v52 = vld [vmem:[#allocation38_spill] sm:$0xff] }
 0x829   : > { %v4536_v2 = vcombine.high %v4532_v45, %v4532_v45  ;;  %4548 = vst [vmem:[%s8409_s12 + $0x1e] sm:$0x1] %v4535_v63  ;;  %4551 = vst [vmem:[%s8409_s12 + $0x36] sm:$0x1] %v4534_v51  ;;  %v5622_v19 = vld [vmem:[%s8384_s18 + $0xb8] sm:$0xff] }
 0x82a   : > { %7329 = vmatpush1.bf16.msra.mxu0 %v9620_v38  ;;  %7358 = vmatpush3.bf16.msra.mxu1 %v9622_v25  ;;  %v10176_v38 = vld [vmem:[#allocation36_spill] sm:$0xff]  ;;  %v10177_v25 = vld [vmem:[#allocation37_spill] sm:$0xff] }
 0x82b   : > { %4552 = vst [vmem:[%s8409_s12 + $0x3e] sm:$0x1] %v4536_v2  ;;  %7331 = vmatprep.subr.bf16.mxu0 %v10175_v16  ;;  %7359 = vmatprep.subr.bf16.mxu1 %v8021_v8 }
 0x82c   : > { %v7659_v57 = vpop.eup %7658 }
 0x82d   : > { %v4463_v37 = vmul.f32 %v7659_v57, %v4425_v42 }
 0x82e   : > { %7333 = vmatpush1.bf16.msra.mxu0 %v9635_v61  ;;  %7361 = vmatpush3.bf16.msra.mxu1 %v9637_v49  ;;  %v10179_v49 = vld [vmem:[#allocation39_spill] sm:$0xff] }
 0x82f   : > { %v4464_v22 = vadd.f32 %v5607_v27, %v4463_v37  ;;  %7335 = vmatprep.subr.bf16.mxu0 %v9644_v31  ;;  %7362 = vmatprep.subr.bf16.mxu1 %v8021_v8  ;;  %v4627_v27 = vld [vmem:[%s8394_s16 + $0x8] sm:$0xff] }
 0x830   : > { %v7661_v61 = vpop.eup %7660 }
 0x831   : > { %7662 = vtanh.f32 %v4464_v22  ;;  %v4466_v31 = vsub.f32 1.0, %v7661_v61 }
 0x832   : > { %7337 = vmatpush1.bf16.msra.mxu0 %v9649_v39  ;;  %7364 = vmatpush3.bf16.msra.mxu1 %v10176_v38 }
 0x833   : > { %7339 = vmatprep.subr.bf16.mxu0 %v10177_v25  ;;  %7365 = vmatprep.subr.bf16.mxu1 %v8021_v8 }
 0x836   : > { %7341 = vmatpush1.bf16.msra.mxu0 %v9659_v47  ;;  %7367 = vmatpush3.bf16.msra.mxu1 %v10178_v52  ;;  %v4468_v47 = vmul.f32 %v7661_v61, %v9691_v6  ;;  %v5056_v61 = vpop.permute.xlu0 %5055 }
 0x837   : > { %7343 = vmatprep.subr.bf16.mxu0 %v9665_v50  ;;  %7368 = vmatprep.subr.bf16.mxu1 %v8021_v8  ;;  %vm5057_vm15 = vcmp.eq.s32.totalorder %v5056_v61, 1 }
 0x83a   : > { %7345 = vmatpush1.bf16.msra.mxu0 %v9669_v1  ;;  %7370 = vmatpush3.bf16.msra.mxu1 %v10179_v49 }
 0x83b   : > { %v7663_v39 = vpop.eup %7662  ;;  %7347 = vmatprep.subr.bf16.mxu0 %v9675_v32  ;;  %7371 = vmatprep.subr.bf16.mxu1 %v8021_v8 }
 0x83c   : > { %v4467_v23 = vmul.f32 %v7663_v39, %v4466_v31 }
 0x83e   : > { %7349 = vmatpush1.bf16.msra.mxu0 %v9679_v58  ;;  %7373 = vmatpush3.bf16.msra.mxu1 %v9681_v4  ;;  %v4469_v50 = vadd.f32 %v4468_v47, %v4467_v23 }
 0x840   : > { %v9814_v1 = vsel %vm4484_vm0, %v4469_v50, %v9691_v6  ;;  %v4553_v17 = vsel %vm4484_vm0, %v4469_v50, 0.0 }
 0x841   : > { %v4555_v32 = vcombine.high %v4553_v17, %v4553_v17  ;;  %v4562_v8 = vrot.slane %v4553_v17, %v8716_v40  ;;  %4931 = vmatmul.mubr.f32.vlgmr.msra.gmra.mrb[30].mxu0 %v9814_v1  ;;  %6476 = vmatmul.mubr.f32.vlgmr.msra.gmra.mrb[30].mxu1 %v9814_v1 }
 0x843   : > { %v4569_v58 = vrot.slane %v4555_v32, %v8716_v40  ;;  %v4570_v4 = vcombine.high %v4562_v8, %v4562_v8  ;;  %v4578_v30 = vrot.slane %v4562_v8, %v8716_v40  ;;  %5616 = vst.sshfl [vmem:[%s8411_s10 + $0x1] sm:$0x1 pattern:$0x73625140] %v4562_v8 }
 0x845   : > { %v4571_v6 = vcombine.high %v4569_v58, %v4569_v58  ;;  %v4585_v15 = vrot.slane %v4569_v58, %v8716_v40  ;;  %v4592_v0 = vrot.slane %v4570_v4, %v8716_v40  ;;  %v4600_v29 = vcombine.high %v4578_v30, %v4578_v30  ;;  %5617 = vst.sshfl [vmem:[%s8411_s10 + $0x9] sm:$0x1 pattern:$0x73625140] %v4570_v4 }
 0x846   : > { %5618 = vst.sshfl [vmem:[%s8411_s10 + $0x21] sm:$0x1 pattern:$0x73625140] %v4569_v58 }
 0x847   : > { %v4599_v21 = vrot.slane %v4571_v6, %v8716_v40  ;;  %v4601_v56 = vcombine.high %v4585_v15, %v4585_v15  ;;  %v4602_v53 = vcombine.high %v4592_v0, %v4592_v0  ;;  %4614 = vst [vmem:[%s8411_s10 + $0x11] sm:$0x1] %v4600_v29  ;;  %5619 = vst.sshfl [vmem:[%s8411_s10 + $0x29] sm:$0x1 pattern:$0x73625140] %v4571_v6 }
 0x849   : > { %v4603_v12 = vcombine.high %v4599_v21, %v4599_v21  ;;  %4615 = vst [vmem:[%s8411_s10 + $0x19] sm:$0x1] %v4602_v53  ;;  %4618 = vst [vmem:[%s8411_s10 + $0x31] sm:$0x1] %v4601_v56 }
 0x84b   : > { %4619 = vst [vmem:[%s8411_s10 + $0x39] sm:$0x1] %v4603_v12 }
 0x8f4   : > { %v4743_v3 = vpop.f32.mrb[28].mxu0  ;;  %v4814_v28 = vpop.f32.mrb[28].mxu1 }
 0x8f5   : > { %v4744_v55 = vadd.f32 %v4743_v3, %v8690_v13  ;;  %v4745_v43 = vpop.f32.mrb[29].mxu0  ;;  %v6442_v5 = vpop.f32.mrb[29].mxu1  ;;  %v4815_v13 = vadd.f32 %v4814_v28, %v8699_v10 }
 0x8f6   : > { %v4746_v14 = vadd.f32 %v4745_v43, %v8692_v20  ;;  %v4626_v20 = vld [vmem:[%s8394_s16] sm:$0xff] }
 0x8f7   : > { %v5007_v54 = vadd.f32 %v5620_v59, %v4744_v55  ;;  %v4628_v59 = vld [vmem:[%s8394_s16 + $0x10] sm:$0xff] }
 0x8f8   : > { %v5008_v46 = vadd.f32 %v5621_v60, %v4746_v14  ;;  %v5062_v14 = vpop.permute.xlu1 %5061 }
 0x8f9   : > { %v5623_v36 = vmul.f32 -1.442695, %v5007_v54  ;;  %vm5063_vm1 = vcmp.eq.s32.totalorder %v5062_v14, 1 }
 0x8fa   : > { %v5624_v33 = vmul.f32 -1.442695, %v5008_v46 }
 0x8fb   : > { %7664 = vpow2.f32 %v5623_v36 }
 0x8fc   : > { %7666 = vpow2.f32 %v5624_v33 }
 0x905   : > { %v7665_v48 = vpop.eup %7664 }
 0x906   : > { %v5015_v62 = vadd.f32 1.0, %v7665_v48  ;;  %v7667_v41 = vpop.eup %7666 }
 0x907   : > { %v5016_v34 = vadd.f32 1.0, %v7667_v41 }
 0x908   : > { %7668 = vrcp.f32 %v5015_v62 }
 0x909   : > { %7670 = vrcp.f32 %v5016_v34 }
 0x912   : > { %v7669_v11 = vpop.eup %7668 }
 0x913   : > { %v5021_v26 = vmul.f32 %v7669_v11, %v4815_v13  ;;  %v7671_v10 = vpop.eup %7670 }
 0x914   : > { %v4932_v45 = vpop.f32.mrb[30].mxu0  ;;  %v5003_v51 = vpop.f32.mrb[30].mxu1  ;;  %v5024_v25 = vsub.f32 1.0, %v7671_v10  ;;  %v5026_v31 = vmul.f32 %v7671_v10, %v9758_v7 }
 0x915   : > { %v5022_v63 = vadd.f32 %v5622_v19, %v5021_v26  ;;  %v4933_v18 = vadd.f32 %v4932_v45, %v8705_v24  ;;  %v4934_v2 = vpop.f32.mrb[31].mxu0  ;;  %v6477_v42 = vpop.f32.mrb[31].mxu1  ;;  %v5004_v53 = vadd.f32 %v5003_v51, %v10174_v9 }
 0x916   : > { %v4935_v16 = vadd.f32 %v4934_v2, %v8708_v35 }
 0x917   : > { %7672 = vtanh.f32 %v5022_v63  ;;  %v5028_v57 = vadd.f32 %v4933_v18, %v4626_v20 }
 0x918   : > { %v5029_v22 = vadd.f32 %v4935_v16, %v4627_v27 }
 0x919   : > { %v5625_v37 = vmul.f32 -1.442695, %v5028_v57 }
 0x91a   : > { %v5626_v38 = vmul.f32 -1.442695, %v5029_v22 }
 0x91b   : > { %7674 = vpow2.f32 %v5625_v37 }
 0x91c   : > { %7676 = vpow2.f32 %v5626_v38 }
 0x921   : > { %v7673_v52 = vpop.eup %7672 }
 0x922   : > { %v5025_v49 = vmul.f32 %v7673_v52, %v5024_v25 }
 0x924   : > { %v5027_v24 = vadd.f32 %v5026_v31, %v5025_v49 }
 0x925   : > { %v7675_v39 = vpop.eup %7674 }
 0x926   : > { %v9844_v35 = vsel %vm5057_vm15, %v5027_v24, %v9758_v7  ;;  %v5065_v23 = vsel %vm5057_vm15, %v5027_v24, 0.0  ;;  %v5036_v47 = vadd.f32 1.0, %v7675_v39  ;;  %v7677_v6 = vpop.eup %7676 }
 0x927   : > { %v5067_v44 = vcombine.high %v5065_v23, %v5065_v23  ;;  %v5074_v50 = vrot.slane %v5065_v23, %v8716_v40  ;;  %5199 = vst [vmem:[#allocation2] sm:$0xff] %v9844_v35  ;;  %v5037_v56 = vadd.f32 1.0, %v7677_v6  ;;  %5205 = vst [vmem:[#allocation15] sm:$0xff] (!%p5635_p1), %v9844_v35 }
 0x928   : > { %7678 = vrcp.f32 %v5036_v47 }
 0x929   : > { %v5081_v17 = vrot.slane %v5067_v44, %v8716_v40  ;;  %v5082_v32 = vcombine.high %v5074_v50, %v5074_v50  ;;  %v5090_v8 = vrot.slane %v5074_v50, %v8716_v40  ;;  %5627 = vst.sshfl [vmem:[%s8409_s12 + $0x7] sm:$0x1 pattern:$0x73625140] %v5074_v50  ;;  %7680 = vrcp.f32 %v5037_v56 }
 0x92b   : > { %v5083_v7 = vcombine.high %v5081_v17, %v5081_v17  ;;  %v5097_v58 = vrot.slane %v5081_v17, %v8716_v40  ;;  %v5104_v4 = vrot.slane %v5082_v32, %v8716_v40  ;;  %v5112_v30 = vcombine.high %v5090_v8, %v5090_v8  ;;  %5628 = vst.sshfl [vmem:[%s8409_s12 + $0xf] sm:$0x1 pattern:$0x73625140] %v5082_v32 }
 0x92c   : > { %5629 = vst.sshfl [vmem:[%s8409_s12 + $0x27] sm:$0x1 pattern:$0x73625140] %v5081_v17 }
 0x92d   : > { %v5111_v15 = vrot.slane %v5083_v7, %v8716_v40  ;;  %v5113_v0 = vcombine.high %v5097_v58, %v5097_v58  ;;  %v5114_v29 = vcombine.high %v5104_v4, %v5104_v4  ;;  %5126 = vst [vmem:[%s8409_s12 + $0x17] sm:$0x1] %v5112_v30  ;;  %5630 = vst.sshfl [vmem:[%s8409_s12 + $0x2f] sm:$0x1 pattern:$0x73625140] %v5083_v7 }
 0x92f   : > { %v5115_v21 = vcombine.high %v5111_v15, %v5111_v15  ;;  %5127 = vst [vmem:[%s8409_s12 + $0x1f] sm:$0x1] %v5114_v29  ;;  %5130 = vst [vmem:[%s8409_s12 + $0x37] sm:$0x1] %v5113_v0 }
 0x931   : > { %5131 = vst [vmem:[%s8409_s12 + $0x3f] sm:$0x1] %v5115_v21 }
 0x932   : > { %v7679_v12 = vpop.eup %7678 }
 0x933   : > { %v5042_v3 = vmul.f32 %v7679_v12, %v5004_v53  ;;  %v7681_v55 = vpop.eup %7680 }
 0x934   : > { %v5045_v43 = vsub.f32 1.0, %v7681_v55  ;;  %v5047_v60 = vmul.f32 %v7681_v55, %v9814_v1 }
 0x935   : > { %v5043_v28 = vadd.f32 %v5042_v3, %v4628_v59 }
 0x937   : > { %7682 = vtanh.f32 %v5043_v28 }
 0x941   : > { %v7683_v5 = vpop.eup %7682 }
 0x942   : > { %v5046_v54 = vmul.f32 %v7683_v5, %v5045_v43 }
 0x944   : > { %v5048_v36 = vadd.f32 %v5047_v60, %v5046_v54 }
 0x946   : > { %v5064_v9 = vsel %vm5063_vm1, %v5048_v36, %v9814_v1  ;;  %v5132_v46 = vsel %vm5063_vm1, %v5048_v36, 0.0 }
 0x947   : > { %v5134_v33 = vcombine.high %v5132_v46, %v5132_v46  ;;  %v5141_v48 = vrot.slane %v5132_v46, %v8716_v40  ;;  %5200 = vst [vmem:[#allocation3] sm:$0xff] %v5064_v9  ;;  %5206 = vst [vmem:[#allocation16] sm:$0xff] (!%p5635_p1), %v5064_v9 }
 0x949   : > { %v5148_v62 = vrot.slane %v5134_v33, %v8716_v40  ;;  %v5149_v41 = vcombine.high %v5141_v48, %v5141_v48  ;;  %v5157_v34 = vrot.slane %v5141_v48, %v8716_v40  ;;  %5631 = vst.sshfl [vmem:[%s8411_s10] sm:$0x1 pattern:$0x73625140] %v5141_v48 }
 0x94b   : > { %v5150_v13 = vcombine.high %v5148_v62, %v5148_v62  ;;  %v5164_v11 = vrot.slane %v5148_v62, %v8716_v40  ;;  %v5171_v1 = vrot.slane %v5149_v41, %v8716_v40  ;;  %v5179_v19 = vcombine.high %v5157_v34, %v5157_v34  ;;  %5632 = vst.sshfl [vmem:[%s8411_s10 + $0x8] sm:$0x1 pattern:$0x73625140] %v5149_v41  ;;  %5204 = sbr.rel (%p5635_p1) target bundleno = 2386 (0x952), region = 72 }
 0x94c   : > { %5633 = vst.sshfl [vmem:[%s8411_s10 + $0x20] sm:$0x1 pattern:$0x73625140] %v5148_v62 }
 0x94d   : > { %v5178_v26 = vrot.slane %v5150_v13, %v8716_v40  ;;  %v5180_v20 = vcombine.high %v5164_v11, %v5164_v11  ;;  %v5181_v45 = vcombine.high %v5171_v1, %v5171_v1  ;;  %5193 = vst [vmem:[%s8411_s10 + $0x10] sm:$0x1] %v5179_v19  ;;  %5634 = vst.sshfl [vmem:[%s8411_s10 + $0x28] sm:$0x1 pattern:$0x73625140] %v5150_v13 }
 0x94f   : > { %v5182_v51 = vcombine.high %v5178_v26, %v5178_v26  ;;  %5194 = vst [vmem:[%s8411_s10 + $0x18] sm:$0x1] %v5181_v45  ;;  %5197 = vst [vmem:[%s8411_s10 + $0x30] sm:$0x1] %v5180_v20 }
 0x951   : > { %5198 = vst [vmem:[%s8411_s10 + $0x38] sm:$0x1] %v5182_v51 }
 0x952 PF: > { %s10180_s18 = sld [smem:[#allocation28_spill]]  ;;  %s10181_s16 = sld [smem:[#allocation29_spill]] }
 0x953   : > { %s5247_s23 = sshll.u32 %s8411_s10, 4  ;;  %s10182_s13 = sld [smem:[#allocation47_spill]]  ;;  %s9883_s23 = int_to_ptr.vmem [resolvable:$true] %s5247_s23 }
 0x954   : > { %s9892_s0 = scalar_lea.sflag [#allocation14], %s445_s19  ;;  %s7801_s6 = scalar_lea.vmem %s9883_s23, 1024 }
 0x955   : > { %p7802_p2 = scmp.ne.s32.totalorder %s9883_s23, %s7801_s6  ;;  %s8026_s10 = smov [#allocation13]  }
 0x956   : > { %s7805_s5 = sshll.u32 %s8026_s10, 4  ;;  %s7806_s5 = int_to_ptr.vmem [resolvable:$false] %s7805_s5 }
 0x957   : > { %s7807_s9 = scalar_lea.vmem %s7806_s5, 2048  ;;  %p7808_p3 = scmp.lt.s32.totalorder %s9883_s23, %s7806_s5 }
 0x958   : > { %s5238_s30 = ssub.s32 1, %s10180_s18  ;;  %p10184_p7 = scmp.ne.s32.totalorder %s10181_s16, 0 }
 0x959   : > { %s5639_s24 = sshll.u32 %s5238_s30, 7  ;;  %s10183_s3 = smov %s10182_s13 }
 0x95a   : > { %s9888_s11 = scalar_lea.hbm %s10182_s13, %s5639_s24  ;;  %p7803_p5 = pnand %p7802_p2, %p10184_p7 }
 0x95b   : > { %p7809_p4 = scmp.lt.s32.totalorder %s7807_s9, %s7801_s6 }
 0x95c   : > { %p7804_p11 = pneg %p7803_p5 }
 0x95d   : > { %p7810_p9 = por %p7809_p4, %p7808_p3 }
 0x95f   : > { %p7811_p0 = pnand %p7810_p9, %p7804_p11 }
 0x961   : > { %7814 = shalt.err (!%p7811_p0)
}
 0x962   : > { %s7815_s19 = scalar_lea.hbm %s9888_s11, 1024  ;;  %s7819_s29 = scalar_lea.hbm %s10183_s3, 2048 }
 0x963   : > { %p7816_p12 = scmp.ne.s32.totalorder %s9888_s11, %s7815_s19  ;;  %p7820_p8 = scmp.lt.u32.totalorder %s9888_s11, %s10183_s3 }
 0x964   : > { %p7821_p13 = scmp.lt.u32.totalorder %s7819_s29, %s7815_s19  ;;  %p7823_p2 = scmp.lt.u32.totalorder %s7815_s19, %s9888_s11 }
 0x965   : > { %p7817_p10 = pnand %p7816_p12, %p10184_p7 }
 0x966   : > { %p7822_p1 = por %p7821_p13, %p7820_p8 }
 0x967   : > { %p7818_p6 = pneg %p7817_p10 }
 0x968   : > { %p7824_p5 = por %p7823_p2, %p7822_p1 }
 0x96a   : > { %p7825_p11 = pnand %p7824_p5, %p7818_p6 }
 0x96c   : > { %7828 = shalt.err (!%p7825_p11)
}
 0x96d   : > { %s8027_s24 = smov 128   ;;  %s10185_s27 = sld [smem:[#allocation32_spill]] }
 0x96e   : > { %s8028_s26 = smov 256   ;;  %s8029_s13 = smov 8  }
 0x96f   : > { %7392 = dma.vmem_to_hbm [thread:$0]  (%p10184_p7), %s9883_s23, 1024, %s9888_s11, %s9892_s0, %s8027_s24, %s8028_s26, %s8029_s13  }
 0x970   : > { %s5638_s6 = sshll.u32 %s10180_s18, 7  ;;  %s5228_s10 = sshll.u32 %s8409_s12, 4  ;;  %s9926_s10 = int_to_ptr.vmem [resolvable:$true] %s5228_s10 }
 0x971   : > { %s10186_s19 = sld [smem:[#allocation46_spill]]  ;;  %s5208_s29 = scalar_lea.sflag [#allocation6], %s8380_s4 }
 0x972   : > { %s7829_s28 = scalar_lea.vmem %s9926_s10, 1024  ;;  %s8030_s16 = smov [#allocation12]  }
 0x973   : > { %p7830_p3 = scmp.ne.s32.totalorder %s9926_s10, %s7829_s28  ;;  %p10188_p4 = scmp.ne.s32.totalorder %s10185_s27, 0 }
 0x974   : > { %s7833_s23 = sshll.u32 %s8030_s16, 4  ;;  %s7834_s23 = int_to_ptr.vmem [resolvable:$false] %s7833_s23 }
 0x975   : > { %p7831_p9 = pnand %p7830_p3, %p10188_p4  ;;  %s7835_s12 = scalar_lea.vmem %s7834_s23, 2048 }
 0x976   : > { %p7836_p7 = scmp.lt.s32.totalorder %s9926_s10, %s7834_s23  ;;  %p7837_p12 = scmp.lt.s32.totalorder %s7835_s12, %s7829_s28 }
 0x977   : > { %s10187_s25 = smov %s10186_s19  ;;  %s9924_s7 = scalar_lea.hbm %s10186_s19, %s5638_s6 }
 0x978   : > { %p7832_p0 = pneg %p7831_p9  ;;  %p7838_p10 = por %p7837_p12, %p7836_p7 }
 0x97a   : > { %p7839_p6 = pnand %p7838_p10, %p7832_p0 }
 0x97c   : > { %7842 = shalt.err (!%p7839_p6)
}
 0x97d   : > { %s7843_s18 = scalar_lea.hbm %s9924_s7, 1024  ;;  %s7847_s30 = scalar_lea.hbm %s10187_s25, 2048 }
 0x97e   : > { %p7844_p8 = scmp.ne.s32.totalorder %s9924_s7, %s7843_s18  ;;  %p7848_p2 = scmp.lt.u32.totalorder %s9924_s7, %s10187_s25 }
 0x97f   : > { %p7849_p5 = scmp.lt.u32.totalorder %s7847_s30, %s7843_s18  ;;  %p7851_p3 = scmp.lt.u32.totalorder %s7843_s18, %s9924_s7 }
 0x980   : > { %p7845_p13 = pnand %p7844_p8, %p10188_p4 }
 0x981   : > { %p7850_p11 = por %p7849_p5, %p7848_p2 }
 0x982   : > { %p7846_p1 = pneg %p7845_p13 }
 0x983   : > { %p7852_p9 = por %p7851_p3, %p7850_p11 }
 0x985   : > { %p7853_p0 = pnand %p7852_p9, %p7846_p1 }
 0x987   : > { %7856 = shalt.err (!%p7853_p0)
}
 0x988   : > { %7391 = dma.vmem_to_hbm [thread:$0]  (%p10188_p4), %s9926_s10, 1024, %s9924_s7, %s5208_s29, %s8027_s24, %s8028_s26, %s8029_s13  }
 0x989   : > { %s8031_s9 = smov [#allocation15]   ;;  %s8032_s28 = smov [#allocation16]  }
 0x98a   : > { %s5263_s19 = sshll.u32 %s8031_s9, 4  ;;  %s5276_s16 = sshll.u32 %s8032_s28, 4  ;;  %s5264_s19 = int_to_ptr.vmem [resolvable:$true] %s5263_s19  ;;  %s5277_s16 = int_to_ptr.vmem [resolvable:$true] %s5276_s16 }
 0x98b   : > { %s7857_s23 = scalar_lea.vmem %s5264_s19, 128  ;;  %p10189_p12 = scmp.eq.s32.totalorder %s8132_s22, 1 }
 0x98c   : > { %p7858_p7 = scmp.ne.s32.totalorder %s5264_s19, %s7857_s23  ;;  %p7864_p8 = scmp.lt.s32.totalorder %s5264_s19, %s5264_s19 }
 0x98d   : > { %p7865_p13 = scmp.lt.s32.totalorder %s7857_s23, %s7857_s23 }
 0x98e   : > { %p7859_p10 = pnand %p7858_p7, %p10189_p12 }
 0x98f   : > { %p7866_p1 = por %p7865_p13, %p7864_p8 }
 0x990   : > { %p7860_p6 = pneg %p7859_p10 }
 0x992   : > { %p7867_p2 = pnand %p7866_p1, %p7860_p6 }
 0x994   : > { %7870 = shalt.err (!%p7867_p2)
}
 0x995   : > { %s10190_s12 = sld [smem:[#allocation48_spill]]  ;;  %p10191_p5 = pmov %p10189_p12 }
 0x99b   : > { %s7871_s24 = scalar_lea.hbm %s10190_s12, 128 }
 0x99c   : > { %p7872_p4 = scmp.ne.s32.totalorder %s10190_s12, %s7871_s24  ;;  %p7877_p9 = scmp.lt.u32.totalorder %s7871_s24, %s10190_s12 }
 0x99e   : > { %p7873_p11 = pnand %p7872_p4, %p10191_p5 }
 0x9a0   : > { %p7874_p3 = pneg %p7873_p11 }
 0x9a2   : > { %p7879_p0 = pnand %p7877_p9, %p7874_p3 }
 0x9a4   : > { %7882 = shalt.err (!%p7879_p0)
}
 0x9a5   : > { %p10192_p7 = pmov %p10191_p5  ;;  %s7883_s11 = scalar_lea.vmem %s5277_s16, 128 }
 0x9a6   : > { %p7884_p12 = scmp.ne.s32.totalorder %s5277_s16, %s7883_s11  ;;  %p10193_p10 = pmov %p10191_p5 }
 0x9a7   : > { %7394 = dma.vmem_to_hbm [thread:$0]  (%p10192_p7), %s5264_s19, 128, %s10190_s12, [#allocation14]  }
 0x9a8   : > { %p7885_p6 = pnand %p7884_p12, %p10193_p10  ;;  %p7890_p13 = scmp.lt.s32.totalorder %s5277_s16, %s5277_s16 }
 0x9a9   : > { %p7891_p1 = scmp.lt.s32.totalorder %s7883_s11, %s7883_s11 }
 0x9aa   : > { %p7886_p8 = pneg %p7885_p6 }
 0x9ab   : > { %p7892_p2 = por %p7891_p1, %p7890_p13 }
 0x9ad   : > { %p7893_p4 = pnand %p7892_p2, %p7886_p8 }
 0x9af   : > { %7896 = shalt.err (!%p7893_p4)
}
 0x9b0   : > { %s10194_s6 = sld [smem:[#allocation49_spill]]  ;;  %p10195_p11 = pmov %p10192_p7 }
 0x9b6   : > { %s7897_s5 = scalar_lea.hbm %s10194_s6, 128 }
 0x9b7   : > { %p7898_p5 = scmp.ne.s32.totalorder %s10194_s6, %s7897_s5  ;;  %p7903_p0 = scmp.lt.u32.totalorder %s7897_s5, %s10194_s6 }
 0x9b9   : > { %p7899_p3 = pnand %p7898_p5, %p10195_p11 }
 0x9bb   : > { %p7900_p9 = pneg %p7899_p3 }
 0x9bd   : > { %p7905_p7 = pnand %p7903_p0, %p7900_p9 }
 0x9bf   : > { %7908 = shalt.err (!%p7905_p7)
}
 0x9c0   : > { %p10196_p12 = pmov %p10193_p10 }
 0x9c2   : > { %7396 = dma.vmem_to_hbm [thread:$0]  (%p10196_p12), %s5277_s16, 128, %s10194_s6, [#allocation17]  }
 0x9c3   : > { %7962 = dma.done.wait (%p10193_p10), [#allocation14], 128   ;;  %p10197_p6 = pmov %p10193_p10 }
 0x9c5   : > { %7964 = vsyncadd (%p10197_p6), [#allocation14], 4294967168  ;;  %p10198_p8 = pmov %p10197_p6 }
 0x9c6   : > { %p10199_p13 = pmov %p10197_p6 }
 0x9c7   : > { %7966 = dma.done.wait (%p10198_p8), [#allocation17], 128  }
 0x9c8   : > { %7968 = vsyncadd (%p10199_p13), [#allocation17], 4294967168 }
 0x9c9 PF: > { %s10200_s24 = sld [smem:[#allocation26_spill]]  ;;  %s10201_s26 = sld [smem:[#allocation30_spill]] }
 0x9ca   : > { %p10203_p2 = scmp.ge.s32.totalorder %s8011_s21, 2 }
 0x9cf   : > { %s5296_s13 = sand.u32 1, %s10200_s24   ;;  %p10202_p1 = scmp.ne.s32.totalorder %s10201_s26, 0 }
 0x9d0   : > { %s5297_s16 = scalar_lea.sflag [#allocation6], %s5296_s13 }
 0x9d1   : > { %p7418_p4 = pnand %p10203_p2, %p10202_p1 }
 0x9d3   : > { %7970 = dma.done.wait (!%p7418_p4), %s5297_s16, 1024  }
 0x9d4   : > { %7972 = vsyncadd (!%p7418_p4), %s5297_s16, 4294966272  ;;  %s10204_s10 = sadd.s32 4294967294, %s8011_s21   ;;  %s10205_s7 = sld [smem:[#allocation31_spill]] }
 0x9d5   : > { %s5305_s29 = sand.u32 1, %s10204_s10   ;;  %p10207_p11 = pmov %p10203_p2 }
 0x9d6   : > { %s5306_s22 = scalar_lea.sflag [#allocation14], %s5305_s29 }
 0x9da   : > { %p10206_p5 = scmp.ne.s32.totalorder %s10205_s7, 0 }
 0x9dc   : > { %p7421_p3 = pnand %p10207_p11, %p10206_p5 }
 0x9de   : > { %7974 = dma.done.wait (!%p7421_p3), %s5306_s22, 1024  }
 0x9df   : > { %7976 = vsyncadd (!%p7421_p3), %s5306_s22, 4294966272  ;;  %s35_s21 = sadd.s32 1, %s8011_s21   ;;  %s10208_s18 = sld [smem:[#allocation27_spill]] }
 0x9e0   : > { %p32_p9 = scmp.ge.s32.totalorder %s35_s21, 4   ;;  %s10209_s11 = sld [smem:[#allocation33_spill]] }
 0x9e1   : > { %s10210_s13 = smov %s7983_s14  ;;  %s10211_s14 = smov %s7987_s15 }
 0x9e2   : > { %s10212_s15 = smov %s8338_s1  ;;  %s10213_s16 = smov %s7995_s17 }
 0x9e3   : > { %s10216_s19 = smov %s8007_s20  ;;  %s10217_s20 = smov %s10219_s8 }
 0x9e4   :  { %34 = sbr.rel (!%p32_p9) target bundleno = 25 (0x19), region = 174 }
 0x9e5   : > { %s10214_s17 = smov %s10208_s18 }
 0x9e6   : > { %s10215_s18 = smov %s10209_s11 }
 0x9eb   :  { %5311 = vsyncpa [#allocation5], 1 }
 0x9ec   :  { %5313 = vsyncpa [#allocation5 + $0x1], 1 }
 0x9ed   :  { %5314 = vsyncpa [#allocation8], 1 }
 0x9ee   :  { %5316 = vsyncpa [#allocation8 + $0x1], 1 }
 0x9ef   :  { %5317 = vsyncpa [#allocation11], 1 }
 0x9f0   :  { %5318 = vsyncpa [#allocation6], 1 }
 0x9f1   :  { %5320 = vsyncpa [#allocation6 + $0x1], 1 }
 0x9f2   :  { %5321 = vsyncpa [#allocation14], 1 }
 0x9f3   :  { %5323 = vsyncpa [#allocation14 + $0x1], 1 }
 0x9f4   :  { %5324 = vsyncpa [#allocation17], 1 }

</bundles_post_ra>
